<compile_context>
chip_gen: v6e
topology: v6e:2x2x1
jax: 0.10.0
libtpu: 0.0.40
codegen_flags: <defaults>
</compile_context>

<pallas_src>
import functools

import jax
import jax.numpy as jnp
from jax.experimental import pallas as pl
from jax.experimental.pallas import tpu as pltpu


def _mha_kernel(x_ref, mask_ref, wqkv_ref, bqkv_ref, wo_ref, bo_ref,
                o_ref, kT_scr, v_scr, ctx_scr,
                *, num_heads, head_size, q_block, seq_len,
                compute_dtype, exp_dtype, approx_recip):
    H = num_heads * head_size
    qi = pl.program_id(1)

    # ---- per-batch prologue: K / V projection into resident VMEM -----------
    @pl.when(qi == 0)
    def _():
        x = x_ref[...]                                           # (S, H)
        kv = jnp.dot(x, wqkv_ref[:, H:3 * H],
                     preferred_element_type=jnp.float32)         # (S, 2H) f32
        kv = kv + bqkv_ref[:, H:3 * H]
        # K stored transposed: one transpose per batch instead of a relayout
        # per (q-tile, head) inside the scores matmul.
        kT_scr[...] = kv[:, 0:H].astype(compute_dtype).T         # (H, S)
        v_scr[...] = kv[:, H:2 * H].astype(compute_dtype)        # (S, H)

    # ---- per-q-tile: project only this tile's Q rows ------------------------
    q_off = pl.multiple_of(qi * q_block, q_block)
    x_tile = x_ref[pl.ds(q_off, q_block), :]                     # (TQ, H)
    q = jnp.dot(x_tile, wqkv_ref[:, 0:H],
                preferred_element_type=jnp.float32) + bqkv_ref[:, 0:H]
    scale = 1.0 / jnp.sqrt(jnp.float32(head_size))
    q = (q * scale).astype(compute_dtype)                        # (TQ, H)

    # Key-side additive mask, broadcast once (outside the head loop).
    mask_add = jnp.broadcast_to(
        (1.0 - mask_ref[...]) * jnp.float32(-10000.0),
        (q_block, seq_len))                                      # (TQ, S) f32

    # TODO(synk): head loop stays statically unrolled so every lane slice has
    # a static start (robust lowering); per-head ctx goes straight to VMEM
    # scratch so scores/e live ranges stay per-iteration.
    for h in range(num_heads):
        lo, hi = h * head_size, (h + 1) * head_size
        # (TQ, dH) @ (dH, S) scores — K already transposed in scratch.
        scores = jnp.dot(q[:, lo:hi], kT_scr[lo:hi, :],
                         preferred_element_type=jnp.float32)     # (TQ, S)
        scores = scores + mask_add

        m = jnp.max(scores, axis=-1, keepdims=True)
        e = jnp.exp((scores - m).astype(exp_dtype))
        denom = jnp.sum(e, axis=-1, keepdims=True, dtype=jnp.float32)  # (TQ,1)

        ctx = jnp.dot(e.astype(compute_dtype), v_scr[:, lo:hi],
                      preferred_element_type=jnp.float32)        # (TQ, dH)
        ctx = ctx * pl.reciprocal(denom, approx=approx_recip)
        ctx_scr[:, lo:hi] = ctx.astype(compute_dtype)

    # ---- fused output projection: one full-K (TQ, H) @ (H, H) matmul --------
    out = jnp.dot(ctx_scr[...], wo_ref[...],
                  preferred_element_type=jnp.float32) + bo_ref[...]
    o_ref[...] = out.astype(o_ref.dtype)


def _pick_q_block(seq_len, target=256):
    """Largest query tile <= target that divides S (multiple of 8), else S."""
    if seq_len <= target:
        return seq_len
    for tq in range(target, 7, -8):
        if seq_len % tq == 0:
            return tq
    return seq_len


def multi_head_attention(hidden_states, params, attention_mask=None, *,
                         num_heads, compute_dtype=jnp.bfloat16,
                         exp_dtype=None, q_block_target=256):
    """hidden_states: [B, S, H]. params: dict of per-projection weights/biases."""
    B, S, H = hidden_states.shape
    assert H % num_heads == 0, "hidden_size must be divisible by num_heads"
    assert S % 8 == 0, "seq_len must be a multiple of 8 (sublane tiling)"
    head_size = H // num_heads
    tq = _pick_q_block(S, q_block_target)
    n_q = S // tq
    out_dtype = hidden_states.dtype

    if exp_dtype is None:
        # bf16 exponentials hit the bf16 EUP path on v6e/v7x; on v5e (no bf16
        # EUP) callers should pass exp_dtype=jnp.float32 explicitly.
        exp_dtype = compute_dtype if compute_dtype == jnp.bfloat16 else jnp.float32
    approx_recip = compute_dtype != jnp.float32

    # Compact key-side mask [B, 1, S]; (1-mask)*-1e4 is built in-kernel.
    if attention_mask is None:
        mask = jnp.ones((B, 1, S), dtype=jnp.float32)
    elif attention_mask.ndim == 2:                       # [B, S] padding mask
        mask = attention_mask.astype(jnp.float32)[:, None, :]
    else:
        # TODO(synk): general per-query [B,S,S]/[B,1,S,S] masks would need a
        # (1, TQ, S) mask block per q-tile; only key-side masks supported.
        raise NotImplementedError("only None or [B, S] key-side masks supported")

    # bf16 x halves DMA bytes + the resident (S, H) VMEM block (numerics
    # unchanged vs. the previous in-kernel cast).
    x = hidden_states.astype(compute_dtype)
    wqkv = jnp.concatenate([params["wq"], params["wk"], params["wv"]],
                           axis=1).astype(compute_dtype)          # (H, 3H)
    bqkv = jnp.concatenate([params["bq"], params["bk"], params["bv"]],
                           axis=1).astype(jnp.float32)            # (1, 3H)
    wo = params["wo"].astype(compute_dtype)                       # (H, H)
    bo = params["bo"].astype(jnp.float32)                         # (1, H)

    kernel = functools.partial(
        _mha_kernel, num_heads=num_heads, head_size=head_size, q_block=tq,
        seq_len=S, compute_dtype=compute_dtype, exp_dtype=exp_dtype,
        approx_recip=approx_recip)

    # Explicit scoped-VMEM budget (v7x has 64 MiB/TC; defaults are 16-32 MiB).
    cd = jnp.dtype(compute_dtype).itemsize
    resident = (
        2 * S * H * cd                        # x block (double-buffered)
        + 2 * S * 4                           # mask block
        + 2 * (3 * H * H + H * H) * cd        # wqkv + wo blocks (double-buffered)
        + 2 * 4 * H * 4                       # biases
        + 2 * tq * H * jnp.dtype(out_dtype).itemsize   # output block
        + (H * S + S * H + tq * H) * cd                 # K^T / V / ctx scratch
        + 6 * tq * S * 4 + 6 * tq * H * 4               # live intermediates
    )
    vmem_limit = min(max(int(resident * 1.5) + (8 << 20), 32 << 20), 100 << 20)
    # TODO(synk): constant-index weight blocks stay default (double) buffered;
    # single-buffering them (pl.Buffered(1) or ANY + one-time copy) would
    # reclaim ~half the weight VMEM on v7x.

    return pl.pallas_call(
        kernel,
        out_shape=jax.ShapeDtypeStruct((B, S, H), out_dtype),
        grid_spec=pltpu.PrefetchScalarGridSpec(
            num_scalar_prefetch=0,
            grid=(B, n_q),                        # qi innermost (sequential)
            in_specs=[
                pl.BlockSpec((None, S, H), lambda b, qi: (b, 0, 0)),    # x
                pl.BlockSpec((None, 1, S), lambda b, qi: (b, 0, 0)),    # key mask
                pl.BlockSpec((H, 3 * H), lambda b, qi: (0, 0)),         # fused QKV W
                pl.BlockSpec((1, 3 * H), lambda b, qi: (0, 0)),         # fused QKV b
                pl.BlockSpec((H, H), lambda b, qi: (0, 0)),             # output W
                pl.BlockSpec((1, H), lambda b, qi: (0, 0)),             # output b
            ],
            out_specs=pl.BlockSpec((None, tq, H), lambda b, qi: (b, qi, 0)),
            scratch_shapes=[
                pltpu.VMEM((H, S), compute_dtype),    # K transposed
                pltpu.VMEM((S, H), compute_dtype),    # V
                pltpu.VMEM((tq, H), compute_dtype),   # per-tile multi-head ctx
            ]),
        compiler_params=pltpu.CompilerParams(
            # qi carries K/V scratch state -> arbitrary; batch is parallel
            # (shards across the two TensorCores on v7x when B >= 2).
            dimension_semantics=("parallel", "arbitrary"),
            vmem_limit_bytes=vmem_limit),
    )(x, mask, wqkv, bqkv, wo, bo)


def init_params(key, hidden_size):
    """Deterministic synthetic parameters (shapes match nn.Linear(H, H) x4)."""
    ks = jax.random.split(key, 8)
    std = 0.02

    def w(k):
        return jax.random.normal(k, (hidden_size, hidden_size),
                                 dtype=jnp.float32) * std

    def b(k):
        return jax.random.normal(k, (1, hidden_size), dtype=jnp.float32) * std

    return {
        "wq": w(ks[0]), "bq": b(ks[1]),
        "wk": w(ks[2]), "bk": b(ks[3]),
        "wv": w(ks[4]), "bv": b(ks[5]),
        "wo": w(ks[6]), "bo": b(ks[7]),
    }


def _reference(hidden_states, params, attention_mask, num_heads):
    """Pure-JAX f32 reference mirroring the PyTorch forward (eval mode)."""
    B, S, H = hidden_states.shape
    dH = H // num_heads

    def proj(x, w, b):
        return jnp.einsum("bsh,hd->bsd", x, w) + b[0]

    q = proj(hidden_states, params["wq"], params["bq"])
    k = proj(hidden_states, params["wk"], params["bk"])
    v = proj(hidden_states, params["wv"], params["bv"])

    def split(x):
        return x.reshape(B, S, num_heads, dH).transpose(0, 2, 1, 3)

    q, k, v = split(q), split(k), split(v)
    scores = jnp.einsum("bhqd,bhkd->bhqk", q, k) / jnp.sqrt(jnp.float32(dH))
    mask = jnp.broadcast_to(attention_mask[:, None, None, :].astype(jnp.float32),
                            (B, 1, S, S))
    scores = scores + (1.0 - mask) * -10000.0
    probs = jax.nn.softmax(scores, axis=-1)
    ctx = jnp.einsum("bhqk,bhkd->bhqd", probs, v)
    ctx = ctx.transpose(0, 2, 1, 3).reshape(B, S, H)
    return jnp.einsum("bsh,hd->bsd", ctx, params["wo"]) + params["bo"][0]


if __name__ == "__main__":
    B, S, H = 2, 256, 128
    NUM_HEADS = 4

    key = jax.random.PRNGKey(0)
    k_x, k_p = jax.random.split(key)

    hidden_states = jax.random.normal(k_x, (B, S, H), dtype=jnp.float32)
    params = init_params(k_p, H)

    # Deterministic 2D padding mask: last 3 key positions of batch 1 masked.
    attn_mask = jnp.ones((B, S), dtype=jnp.float32).at[1, S - 3:].set(0.0)

    ref = _reference(hidden_states, params, attn_mask, NUM_HEADS)

    # f32 compute path (f32 exp, exact reciprocal): tight algorithmic check.
    # q_block_target=128 -> 2 query tiles, exercising the prologue/tile split.
    out_f32 = multi_head_attention(hidden_states, params, attn_mask,
                                   num_heads=NUM_HEADS,
                                   compute_dtype=jnp.float32,
                                   q_block_target=128)
    out_f32 = jax.block_until_ready(out_f32)
    assert out_f32.shape == (B, S, H)
    assert jnp.allclose(out_f32, ref, atol=2e-3, rtol=2e-3), "f32 path mismatch"

    # Default bf16 compute path (bf16 MXU + bf16 exp on the EUP): looser check.
    out_bf16 = multi_head_attention(hidden_states, params, attn_mask,
                                    num_heads=NUM_HEADS,
                                    q_block_target=128)
    out_bf16 = jax.block_until_ready(out_bf16)
    assert out_bf16.shape == (B, S, H)
    assert jnp.allclose(out_bf16, ref, atol=2e-2, rtol=2e-2), "bf16 path mismatch"

    print("KERNEL_OK")
</pallas_src>

<mosaic_0001>
module attributes {stable_mosaic.version = 11 : i64} {
  func.func @_mha_kernel(%arg0: i32, %arg1: i32, %arg2: memref<1x256x128xf32, #tpu.memory_space<vmem>>, %arg3: memref<1x1x256xf32, #tpu.memory_space<vmem>>, %arg4: memref<128x384xf32, #tpu.memory_space<vmem>>, %arg5: memref<1x384xf32, #tpu.memory_space<vmem>>, %arg6: memref<128x128xf32, #tpu.memory_space<vmem>>, %arg7: memref<1x128xf32, #tpu.memory_space<vmem>>, %arg8: memref<1x128x128xf32, #tpu.memory_space<vmem>>, %arg9: memref<128x256xf32, #tpu.memory_space<vmem>>, %arg10: memref<256x128xf32, #tpu.memory_space<vmem>>, %arg11: memref<128x128xf32, #tpu.memory_space<vmem>>) attributes {dimension_semantics = [#tpu.dimension_semantics<parallel>, #tpu.dimension_semantics<arbitrary>], iteration_bounds = array<i64: 2, 2>, scalar_prefetch = 0 : i64, scratch_operands = 3 : i64, tpu.core_type = #tpu.core_type<tc>, window_params = [{transform_indices = @transform_0, window_bounds = array<i64: 1, 256, 128>}, {transform_indices = @transform_1, window_bounds = array<i64: 1, 1, 256>}, {pipeline_mode = #tpu.pipeline_mode<synchronous>, transform_indices = @transform_2, window_bounds = array<i64: 128, 384>}, {pipeline_mode = #tpu.pipeline_mode<synchronous>, transform_indices = @transform_3, window_bounds = array<i64: 1, 384>}, {pipeline_mode = #tpu.pipeline_mode<synchronous>, transform_indices = @transform_4, window_bounds = array<i64: 128, 128>}, {pipeline_mode = #tpu.pipeline_mode<synchronous>, transform_indices = @transform_5, window_bounds = array<i64: 1, 128>}, {transform_indices = @transform_6, window_bounds = array<i64: 1, 128, 128>}]} {
    %c0_i32 = arith.constant 0 : i32
    %0 = arith.cmpi eq, %arg1, %c0_i32 : i32
    %1 = arith.extui %0 : i1 to i32
    %c0_i32_0 = arith.constant 0 : i32
    %2 = arith.cmpi ne, %1, %c0_i32_0 : i32
    scf.if %2 {
      %c0_60 = arith.constant 0 : index
      %c0_61 = arith.constant 0 : index
      %c0_62 = arith.constant 0 : index
      %102 = vector.load %arg2[%c0_60, %c0_61, %c0_62] : memref<1x256x128xf32, #tpu.memory_space<vmem>>, vector<1x256x128xf32>
      %103 = vector.shape_cast %102 : vector<1x256x128xf32> to vector<256x128xf32>
      %c0_63 = arith.constant 0 : index
      %c128 = arith.constant 128 : index
      %104 = vector.load %arg4[%c0_63, %c128] : memref<128x384xf32, #tpu.memory_space<vmem>>, vector<128x256xf32>
      %cst_64 = arith.constant dense<0.000000e+00> : vector<256x256xf32>
      %105 = tpu.matmul %103, %104, %cst_64 {dimension_numbers = #tpu.dot_dimension_numbers<[1], [0], [0], [1], [0, 0, 1, 1], [], []>} : vector<256x128xf32>, vector<128x256xf32>, vector<256x256xf32> -> vector<256x256xf32>
      %c0_65 = arith.constant 0 : index
      %c128_66 = arith.constant 128 : index
      %106 = vector.load %arg5[%c0_65, %c128_66] : memref<1x384xf32, #tpu.memory_space<vmem>>, vector<1x256xf32>
      %107 = vector.broadcast %106 : vector<1x256xf32> to vector<256x256xf32>
      %108 = arith.addf %105, %107 : vector<256x256xf32>
      %109 = vector.extract_strided_slice %108 {offsets = [0, 0], sizes = [256, 128], strides = [1, 1]} : vector<256x256xf32> to vector<256x128xf32>
      %110 = tpu.transpose %109, [1, 0] : vector<256x128xf32> -> vector<128x256xf32>
      %c0_67 = arith.constant 0 : index
      %c0_68 = arith.constant 0 : index
      %111 = vector.load %arg9[%c0_67, %c0_68] : memref<128x256xf32, #tpu.memory_space<vmem>>, vector<128x256xf32>
      tpu.vector_store %arg9[%c0_67, %c0_68], %110 {strides = array<i32>} : memref<128x256xf32, #tpu.memory_space<vmem>>, vector<128x256xf32>,
      %112 = vector.extract_strided_slice %108 {offsets = [0, 128], sizes = [256, 128], strides = [1, 1]} : vector<256x256xf32> to vector<256x128xf32>
      %c0_69 = arith.constant 0 : index
      %c0_70 = arith.constant 0 : index
      %113 = vector.load %arg10[%c0_69, %c0_70] : memref<256x128xf32, #tpu.memory_space<vmem>>, vector<256x128xf32>
      tpu.vector_store %arg10[%c0_69, %c0_70], %112 {strides = array<i32>} : memref<256x128xf32, #tpu.memory_space<vmem>>, vector<256x128xf32>,
    } else {
    }
    %c128_i32 = arith.constant 128 : i32
    %3 = arith.muli %arg1, %c128_i32 : i32
    %4 = tpu.assume_multiple %3, 128 : i32
    %c0 = arith.constant 0 : index
    %5 = arith.index_cast %4 : i32 to index
    %c0_1 = arith.constant 0 : index
    %6 = vector.load %arg2[%c0, %5, %c0_1] : memref<1x256x128xf32, #tpu.memory_space<vmem>>, vector<1x128x128xf32>
    %7 = vector.shape_cast %6 : vector<1x128x128xf32> to vector<128x128xf32>
    %c0_2 = arith.constant 0 : index
    %c0_3 = arith.constant 0 : index
    %8 = vector.load %arg4[%c0_2, %c0_3] : memref<128x384xf32, #tpu.memory_space<vmem>>, vector<128x128xf32>
    %cst = arith.constant dense<0.000000e+00> : vector<128x128xf32>
    %9 = tpu.matmul %7, %8, %cst {dimension_numbers = #tpu.dot_dimension_numbers<[1], [0], [0], [1], [0, 0, 1, 1], [], []>} : vector<128x128xf32>, vector<128x128xf32>, vector<128x128xf32> -> vector<128x128xf32>
    %c0_4 = arith.constant 0 : index
    %c0_5 = arith.constant 0 : index
    %10 = vector.load %arg5[%c0_4, %c0_5] : memref<1x384xf32, #tpu.memory_space<vmem>>, vector<1x128xf32>
    %11 = vector.broadcast %10 : vector<1x128xf32> to vector<128x128xf32>
    %12 = arith.addf %9, %11 : vector<128x128xf32>
    %cst_6 = arith.constant 3.200000e+01 : f32
    %13 = math.sqrt %cst_6 : f32
    %cst_7 = arith.constant 1.000000e+00 : f32
    %14 = arith.divf %cst_7, %13 : f32
    %15 = vector.broadcast %14 : f32 to vector<128x128xf32>
    %16 = arith.mulf %12, %15 : vector<128x128xf32>
    %c0_8 = arith.constant 0 : index
    %c0_9 = arith.constant 0 : index
    %c0_10 = arith.constant 0 : index
    %17 = vector.load %arg3[%c0_8, %c0_9, %c0_10] : memref<1x1x256xf32, #tpu.memory_space<vmem>>, vector<1x1x256xf32>
    %18 = vector.shape_cast %17 : vector<1x1x256xf32> to vector<1x256xf32>
    %cst_11 = arith.constant 1.000000e+00 : f32
    %19 = vector.broadcast %cst_11 : f32 to vector<1x256xf32>
    %20 = arith.subf %19, %18 : vector<1x256xf32>
    %cst_12 = arith.constant -1.000000e+04 : f32
    %21 = vector.broadcast %cst_12 : f32 to vector<1x256xf32>
    %22 = arith.mulf %20, %21 : vector<1x256xf32>
    %23 = vector.shape_cast %22 : vector<1x256xf32> to vector<1x256xf32>
    %24 = vector.broadcast %23 : vector<1x256xf32> to vector<128x256xf32>
    %25 = vector.extract_strided_slice %16 {offsets = [0, 0], sizes = [128, 32], strides = [1, 1]} : vector<128x128xf32> to vector<128x32xf32>
    %c0_13 = arith.constant 0 : index
    %c0_14 = arith.constant 0 : index
    %26 = vector.load %arg9[%c0_13, %c0_14] : memref<128x256xf32, #tpu.memory_space<vmem>>, vector<32x256xf32>
    %cst_15 = arith.constant dense<0.000000e+00> : vector<128x256xf32>
    %27 = tpu.matmul %25, %26, %cst_15 {dimension_numbers = #tpu.dot_dimension_numbers<[1], [0], [0], [1], [0, 0, 1, 1], [], []>} : vector<128x32xf32>, vector<32x256xf32>, vector<128x256xf32> -> vector<128x256xf32>
    %28 = arith.addf %27, %24 : vector<128x256xf32>
    %cst_16 = arith.constant dense<0xFF800000> : vector<128xf32>
    %29 = vector.multi_reduction <maximumf>, %28, %cst_16 [1] : vector<128x256xf32> to vector<128xf32>
    %30 = vector.shape_cast %29 : vector<128xf32> to vector<128x1xf32>
    %31 = vector.broadcast %30 : vector<128x1xf32> to vector<128x256xf32>
    %32 = arith.subf %28, %31 : vector<128x256xf32>
    %33 = math.exp %32 : vector<128x256xf32>
    %cst_17 = arith.constant dense<0.000000e+00> : vector<128xf32>
    %34 = vector.multi_reduction <add>, %33, %cst_17 [1] : vector<128x256xf32> to vector<128xf32>
    %35 = vector.shape_cast %34 : vector<128xf32> to vector<128x1xf32>
    %c0_18 = arith.constant 0 : index
    %c0_19 = arith.constant 0 : index
    %36 = vector.load %arg10[%c0_18, %c0_19] : memref<256x128xf32, #tpu.memory_space<vmem>>, vector<256x32xf32>
    %cst_20 = arith.constant dense<0.000000e+00> : vector<128x32xf32>
    %37 = tpu.matmul %33, %36, %cst_20 {dimension_numbers = #tpu.dot_dimension_numbers<[1], [0], [0], [1], [0, 0, 1, 1], [], []>} : vector<128x256xf32>, vector<256x32xf32>, vector<128x32xf32> -> vector<128x32xf32>
    %38 = tpu.reciprocal %35 : vector<128x1xf32> -> vector<128x1xf32>
    %39 = vector.broadcast %38 : vector<128x1xf32> to vector<128x32xf32>
    %40 = arith.mulf %37, %39 : vector<128x32xf32>
    %c0_21 = arith.constant 0 : index
    %c0_22 = arith.constant 0 : index
    %41 = vector.load %arg11[%c0_21, %c0_22] : memref<128x128xf32, #tpu.memory_space<vmem>>, vector<128x32xf32>
    tpu.vector_store %arg11[%c0_21, %c0_22], %40 {strides = array<i32>} : memref<128x128xf32, #tpu.memory_space<vmem>>, vector<128x32xf32>,
    %42 = vector.extract_strided_slice %16 {offsets = [0, 32], sizes = [128, 32], strides = [1, 1]} : vector<128x128xf32> to vector<128x32xf32>
    %c32 = arith.constant 32 : index
    %c0_23 = arith.constant 0 : index
    %43 = vector.load %arg9[%c32, %c0_23] : memref<128x256xf32, #tpu.memory_space<vmem>>, vector<32x256xf32>
    %cst_24 = arith.constant dense<0.000000e+00> : vector<128x256xf32>
    %44 = tpu.matmul %42, %43, %cst_24 {dimension_numbers = #tpu.dot_dimension_numbers<[1], [0], [0], [1], [0, 0, 1, 1], [], []>} : vector<128x32xf32>, vector<32x256xf32>, vector<128x256xf32> -> vector<128x256xf32>
    %45 = arith.addf %44, %24 : vector<128x256xf32>
    %cst_25 = arith.constant dense<0xFF800000> : vector<128xf32>
    %46 = vector.multi_reduction <maximumf>, %45, %cst_25 [1] : vector<128x256xf32> to vector<128xf32>
    %47 = vector.shape_cast %46 : vector<128xf32> to vector<128x1xf32>
    %48 = vector.broadcast %47 : vector<128x1xf32> to vector<128x256xf32>
    %49 = arith.subf %45, %48 : vector<128x256xf32>
    %50 = math.exp %49 : vector<128x256xf32>
    %cst_26 = arith.constant dense<0.000000e+00> : vector<128xf32>
    %51 = vector.multi_reduction <add>, %50, %cst_26 [1] : vector<128x256xf32> to vector<128xf32>
    %52 = vector.shape_cast %51 : vector<128xf32> to vector<128x1xf32>
    %c0_27 = arith.constant 0 : index
    %c32_28 = arith.constant 32 : index
    %53 = vector.load %arg10[%c0_27, %c32_28] : memref<256x128xf32, #tpu.memory_space<vmem>>, vector<256x32xf32>
    %cst_29 = arith.constant dense<0.000000e+00> : vector<128x32xf32>
    %54 = tpu.matmul %50, %53, %cst_29 {dimension_numbers = #tpu.dot_dimension_numbers<[1], [0], [0], [1], [0, 0, 1, 1], [], []>} : vector<128x256xf32>, vector<256x32xf32>, vector<128x32xf32> -> vector<128x32xf32>
    %55 = tpu.reciprocal %52 : vector<128x1xf32> -> vector<128x1xf32>
    %56 = vector.broadcast %55 : vector<128x1xf32> to vector<128x32xf32>
    %57 = arith.mulf %54, %56 : vector<128x32xf32>
    %c0_30 = arith.constant 0 : index
    %c32_31 = arith.constant 32 : index
    %58 = vector.load %arg11[%c0_30, %c32_31] : memref<128x128xf32, #tpu.memory_space<vmem>>, vector<128x32xf32>
    tpu.vector_store %arg11[%c0_30, %c32_31], %57 {strides = array<i32>} : memref<128x128xf32, #tpu.memory_space<vmem>>, vector<128x32xf32>,
    %59 = vector.extract_strided_slice %16 {offsets = [0, 64], sizes = [128, 32], strides = [1, 1]} : vector<128x128xf32> to vector<128x32xf32>
    %c64 = arith.constant 64 : index
    %c0_32 = arith.constant 0 : index
    %60 = vector.load %arg9[%c64, %c0_32] : memref<128x256xf32, #tpu.memory_space<vmem>>, vector<32x256xf32>
    %cst_33 = arith.constant dense<0.000000e+00> : vector<128x256xf32>
    %61 = tpu.matmul %59, %60, %cst_33 {dimension_numbers = #tpu.dot_dimension_numbers<[1], [0], [0], [1], [0, 0, 1, 1], [], []>} : vector<128x32xf32>, vector<32x256xf32>, vector<128x256xf32> -> vector<128x256xf32>
    %62 = arith.addf %61, %24 : vector<128x256xf32>
    %cst_34 = arith.constant dense<0xFF800000> : vector<128xf32>
    %63 = vector.multi_reduction <maximumf>, %62, %cst_34 [1] : vector<128x256xf32> to vector<128xf32>
    %64 = vector.shape_cast %63 : vector<128xf32> to vector<128x1xf32>
    %65 = vector.broadcast %64 : vector<128x1xf32> to vector<128x256xf32>
    %66 = arith.subf %62, %65 : vector<128x256xf32>
    %67 = math.exp %66 : vector<128x256xf32>
    %cst_35 = arith.constant dense<0.000000e+00> : vector<128xf32>
    %68 = vector.multi_reduction <add>, %67, %cst_35 [1] : vector<128x256xf32> to vector<128xf32>
    %69 = vector.shape_cast %68 : vector<128xf32> to vector<128x1xf32>
    %c0_36 = arith.constant 0 : index
    %c64_37 = arith.constant 64 : index
    %70 = vector.load %arg10[%c0_36, %c64_37] : memref<256x128xf32, #tpu.memory_space<vmem>>, vector<256x32xf32>
    %cst_38 = arith.constant dense<0.000000e+00> : vector<128x32xf32>
    %71 = tpu.matmul %67, %70, %cst_38 {dimension_numbers = #tpu.dot_dimension_numbers<[1], [0], [0], [1], [0, 0, 1, 1], [], []>} : vector<128x256xf32>, vector<256x32xf32>, vector<128x32xf32> -> vector<128x32xf32>
    %72 = tpu.reciprocal %69 : vector<128x1xf32> -> vector<128x1xf32>
    %73 = vector.broadcast %72 : vector<128x1xf32> to vector<128x32xf32>
    %74 = arith.mulf %71, %73 : vector<128x32xf32>
    %c0_39 = arith.constant 0 : index
    %c64_40 = arith.constant 64 : index
    %75 = vector.load %arg11[%c0_39, %c64_40] : memref<128x128xf32, #tpu.memory_space<vmem>>, vector<128x32xf32>
    tpu.vector_store %arg11[%c0_39, %c64_40], %74 {strides = array<i32>} : memref<128x128xf32, #tpu.memory_space<vmem>>, vector<128x32xf32>,
    %76 = vector.extract_strided_slice %16 {offsets = [0, 96], sizes = [128, 32], strides = [1, 1]} : vector<128x128xf32> to vector<128x32xf32>
    %c96 = arith.constant 96 : index
    %c0_41 = arith.constant 0 : index
    %77 = vector.load %arg9[%c96, %c0_41] : memref<128x256xf32, #tpu.memory_space<vmem>>, vector<32x256xf32>
    %cst_42 = arith.constant dense<0.000000e+00> : vector<128x256xf32>
    %78 = tpu.matmul %76, %77, %cst_42 {dimension_numbers = #tpu.dot_dimension_numbers<[1], [0], [0], [1], [0, 0, 1, 1], [], []>} : vector<128x32xf32>, vector<32x256xf32>, vector<128x256xf32> -> vector<128x256xf32>
    %79 = arith.addf %78, %24 : vector<128x256xf32>
    %cst_43 = arith.constant dense<0xFF800000> : vector<128xf32>
    %80 = vector.multi_reduction <maximumf>, %79, %cst_43 [1] : vector<128x256xf32> to vector<128xf32>
    %81 = vector.shape_cast %80 : vector<128xf32> to vector<128x1xf32>
    %82 = vector.broadcast %81 : vector<128x1xf32> to vector<128x256xf32>
    %83 = arith.subf %79, %82 : vector<128x256xf32>
    %84 = math.exp %83 : vector<128x256xf32>
    %cst_44 = arith.constant dense<0.000000e+00> : vector<128xf32>
    %85 = vector.multi_reduction <add>, %84, %cst_44 [1] : vector<128x256xf32> to vector<128xf32>
    %86 = vector.shape_cast %85 : vector<128xf32> to vector<128x1xf32>
    %c0_45 = arith.constant 0 : index
    %c96_46 = arith.constant 96 : index
    %87 = vector.load %arg10[%c0_45, %c96_46] : memref<256x128xf32, #tpu.memory_space<vmem>>, vector<256x32xf32>
    %cst_47 = arith.constant dense<0.000000e+00> : vector<128x32xf32>
    %88 = tpu.matmul %84, %87, %cst_47 {dimension_numbers = #tpu.dot_dimension_numbers<[1], [0], [0], [1], [0, 0, 1, 1], [], []>} : vector<128x256xf32>, vector<256x32xf32>, vector<128x32xf32> -> vector<128x32xf32>
    %89 = tpu.reciprocal %86 : vector<128x1xf32> -> vector<128x1xf32>
    %90 = vector.broadcast %89 : vector<128x1xf32> to vector<128x32xf32>
    %91 = arith.mulf %88, %90 : vector<128x32xf32>
    %c0_48 = arith.constant 0 : index
    %c96_49 = arith.constant 96 : index
    %92 = vector.load %arg11[%c0_48, %c96_49] : memref<128x128xf32, #tpu.memory_space<vmem>>, vector<128x32xf32>
    tpu.vector_store %arg11[%c0_48, %c96_49], %91 {strides = array<i32>} : memref<128x128xf32, #tpu.memory_space<vmem>>, vector<128x32xf32>,
    %c0_50 = arith.constant 0 : index
    %c0_51 = arith.constant 0 : index
    %93 = vector.load %arg11[%c0_50, %c0_51] : memref<128x128xf32, #tpu.memory_space<vmem>>, vector<128x128xf32>
    %c0_52 = arith.constant 0 : index
    %c0_53 = arith.constant 0 : index
    %94 = vector.load %arg6[%c0_52, %c0_53] : memref<128x128xf32, #tpu.memory_space<vmem>>, vector<128x128xf32>
    %cst_54 = arith.constant dense<0.000000e+00> : vector<128x128xf32>
    %95 = tpu.matmul %93, %94, %cst_54 {dimension_numbers = #tpu.dot_dimension_numbers<[1], [0], [0], [1], [0, 0, 1, 1], [], []>} : vector<128x128xf32>, vector<128x128xf32>, vector<128x128xf32> -> vector<128x128xf32>
    %c0_55 = arith.constant 0 : index
    %c0_56 = arith.constant 0 : index
    %96 = vector.load %arg7[%c0_55, %c0_56] : memref<1x128xf32, #tpu.memory_space<vmem>>, vector<1x128xf32>
    %97 = vector.broadcast %96 : vector<1x128xf32> to vector<128x128xf32>
    %98 = arith.addf %95, %97 : vector<128x128xf32>
    %c0_57 = arith.constant 0 : index
    %c0_58 = arith.constant 0 : index
    %c0_59 = arith.constant 0 : index
    %99 = vector.load %arg8[%c0_57, %c0_58, %c0_59] : memref<1x128x128xf32, #tpu.memory_space<vmem>>, vector<1x128x128xf32>
    %100 = vector.shape_cast %99 : vector<1x128x128xf32> to vector<128x128xf32>
    %101 = vector.shape_cast %98 : vector<128x128xf32> to vector<1x128x128xf32>
    tpu.vector_store %arg8[%c0_57, %c0_58, %c0_59], %101 {strides = array<i32>} : memref<1x128x128xf32, #tpu.memory_space<vmem>>, vector<1x128x128xf32>,
    return
  }
  func.func @transform_0(%arg0: i32, %arg1: i32) -> (i32, i32, i32) {
    %c0_i32 = arith.constant 0 : i32
    %c0_i32_0 = arith.constant 0 : i32
    %c0_i32_1 = arith.constant 0 : i32
    return %arg0, %c0_i32, %c0_i32_0 : i32, i32, i32
  }
  func.func @transform_1(%arg0: i32, %arg1: i32) -> (i32, i32, i32) {
    %c0_i32 = arith.constant 0 : i32
    %c0_i32_0 = arith.constant 0 : i32
    %c0_i32_1 = arith.constant 0 : i32
    return %arg0, %c0_i32, %c0_i32_0 : i32, i32, i32
  }
  func.func @transform_2(%arg0: i32, %arg1: i32) -> (i32, i32) {
    %c0_i32 = arith.constant 0 : i32
    %c0_i32_0 = arith.constant 0 : i32
    %c0_i32_1 = arith.constant 0 : i32
    return %c0_i32, %c0_i32_0 : i32, i32
  }
  func.func @transform_3(%arg0: i32, %arg1: i32) -> (i32, i32) {
    %c0_i32 = arith.constant 0 : i32
    %c0_i32_0 = arith.constant 0 : i32
    %c0_i32_1 = arith.constant 0 : i32
    return %c0_i32, %c0_i32_0 : i32, i32
  }
  func.func @transform_4(%arg0: i32, %arg1: i32) -> (i32, i32) {
    %c0_i32 = arith.constant 0 : i32
    %c0_i32_0 = arith.constant 0 : i32
    %c0_i32_1 = arith.constant 0 : i32
    return %c0_i32, %c0_i32_0 : i32, i32
  }
  func.func @transform_5(%arg0: i32, %arg1: i32) -> (i32, i32) {
    %c0_i32 = arith.constant 0 : i32
    %c0_i32_0 = arith.constant 0 : i32
    %c0_i32_1 = arith.constant 0 : i32
    return %c0_i32, %c0_i32_0 : i32, i32
  }
  func.func @transform_6(%arg0: i32, %arg1: i32) -> (i32, i32, i32) {
    %c0_i32 = arith.constant 0 : i32
    %c0_i32_0 = arith.constant 0 : i32
    return %arg0, %arg1, %c0_i32 : i32, i32, i32
  }
}

</mosaic_0001>

<bundles_post_ra>
// kernel: tpu_custom_call.1
= control target key start
LH: loop header
LB: loop body
LE: loop exit
PB: predicated region body
PF: predicated region fallthrough
CT: control target
= control target key end

     0   :  { %s8904_s0 = inlined_call_operand.hbm [shape: f32[2,256,128], index: 0, kind: input, shape index: {}]   ;;  %s8905_s1 = inlined_call_operand.hbm [shape: f32[2,1,256], index: 1, kind: input, shape index: {}]   ;;  %s8906_s2 = inlined_call_operand.hbm [shape: f32[128,384], index: 2, kind: input, shape index: {}]   ;;  %s8907_s3 = inlined_call_operand.vmem [shape: f32[1,384], index: 3, kind: input, shape index: {}]   ;;  %s8908_s4 = inlined_call_operand.hbm [shape: f32[128,128], index: 4, kind: input, shape index: {}]   ;;  %s8909_s5 = inlined_call_operand.vmem [shape: f32[1,128], index: 5, kind: input, shape index: {}]   ;;  %s8910_s6 = inlined_call_operand.hbm [shape: f32[2,256,128], index: 6, kind: output, shape index: {}]  }
   0x1   :  { %9028 = sst [smem:[#allocation151_spill]] %s8904_s0 }
   0x2   :  { %9029 = sst [smem:[#allocation152_spill]] %s8906_s2 }
   0x3   :  { %9030 = sst [smem:[#allocation153_spill]] %s8908_s4 }
   0x4   :  { %9031 = sst [smem:[#allocation154_spill]] %s8909_s5 }
   0x5   :  { %9032 = sst [smem:[#allocation155_spill]] %s8910_s6 }
   0x6   :  { %11 = vsyncpa [#allocation6], 0 }
   0x7   :  { %13 = vsyncpa [#allocation6 + $0x1], 0 }
   0x8   :  { %14 = vsyncpa [#allocation9], 0 }
   0x9   :  { %16 = vsyncpa [#allocation9 + $0x1], 0 }
   0xa   :  { %17 = vsyncpa [#allocation12], 0 }
   0xb   :  { %18 = vsyncpa [#allocation7], 0 }
   0xc   :  { %20 = vsyncpa [#allocation7 + $0x1], 0  ;;  %s6022_s21 = smov 0   ;;  %s6024_s22 = smov 0  }
   0xd   :  { %s6026_s23 = smov 0   ;;  %s6028_s24 = smov 0  }
   0xe   :  { %s6030_s25 = smov 0   ;;  %s6032_s26 = smov 0  }
   0xf   :  { %s6034_s27 = smov 0   ;;  %s6036_s28 = smov 0  }
  0x10   :  { %s6038_s29 = smov 0   ;;  %s6040_s30 = smov 0  }
  0x11   :  { %s6042_s7 = smov 0  }
  0x12 LB: > { %9033 = sst [smem:[#allocation19_spill]] %s5929_s21  ;;  %s6076_s8 = sadd.s32 4294967295, %s5969_s7   ;;  %s5969_s7 = sphi %s6042_s7, %s26_s7   ;;  %s5965_s30 = sphi %s6040_s30, %s9474_s30   ;;  %s5961_s29 = sphi %s6038_s29, %s9465_s29   ;;  %s5957_s28 = sphi %s6036_s28, %s9473_s28   ;;  %s5953_s27 = sphi %s6034_s27, %s9464_s27   ;;  %s5949_s26 = sphi %s6032_s26, %s9472_s26   ;;  %s5945_s25 = sphi %s6030_s25, %s9471_s25   ;;  %s5941_s24 = sphi %s6028_s24, %s9470_s24   ;;  %s5937_s23 = sphi %s6026_s23, %s9469_s23   ;;  %s5933_s22 = sphi %s6024_s22, %s9468_s22   ;;  %s5929_s21 = sphi %s6022_s21, %s9467_s21  }
  0x13   : > { %9034 = sst [smem:[#allocation20_spill]] %s5949_s26  ;;  %s4545_s9 = sadd.s32 4294967294, %s5969_s7  }
  0x14   : > { %9035 = sst [smem:[#allocation21_spill]] %s5957_s28  ;;  %p58_p0 = scmp.ne.s32.totalorder %s5945_s25, %s5941_s24 }
  0x15   : > { %9036 = sst [smem:[#allocation22_spill]] %s5961_s29  ;;  %p8911_p1 = scmp.eq.s32.totalorder %s6076_s8, 0 }
  0x16   : > { %p193_p2 = scmp.ne.s32.totalorder %s5937_s23, %s5933_s22  ;;  %p194_p4 = scmp.eq.s32.totalorder %s6076_s8, 3 }
  0x17   : > { %p6086_p3 = por %p8911_p1, %p58_p0  ;;  %p199_p5 = scmp.ne.s32.totalorder %s5933_s22, %s5929_s21 }
  0x18   : > { %p200_p6 = scmp.eq.s32.totalorder %s4545_s9, 3  ;;  %p6093_p7 = por %p194_p4, %p193_p2 }
  0x19   : > { %p4546_p8 = scmp.ge.s32.totalorder %s5969_s7, 1  ;;  %p207_p10 = scmp.lt.s32.totalorder %s5969_s7, 5 }
  0x1a   : > { %s9038_s12 = scalar_select %p6093_p7, 1, 0 }
  0x1b   : > { %p6098_p9 = por %p200_p6, %p199_p5  ;;  %p6103_p11 = pnand %p4546_p8, %p207_p10 }
  0x1c   : > { %9039 = sst [smem:[#allocation23_spill]] %s9038_s12  ;;  %s5971_s15 = smov [#allocation10]  }
  0x1d   : > { %s9040_s13 = scalar_select %p6098_p9, 1, 0 }
  0x1e   : > { %s219_s16 = sshll.u32 %s5971_s15, 4  ;;  %p5212_p12 = pneg %p6103_p11  ;;  %s220_s16 = int_to_ptr.vmem [resolvable:$true] %s219_s16 }
  0x1f   : > { %9041 = sst [smem:[#allocation24_spill]] %s9040_s13  ;;  %s5972_s18 = smov [#allocation11]  }
  0x20   : > { %p6111_p13 = pnand %p5212_p12, %p8911_p1  ;;  %s235_s19 = sshll.u32 %s5972_s18, 4  ;;  %s236_s19 = int_to_ptr.vmem [resolvable:$true] %s235_s19 }
  0x21   : > { %s5740_s20 = scalar_lea.vmem %s220_s16, 6144  ;;  %p5748_p6 = scmp.lt.s32.totalorder %s220_s16, %s220_s16 }
  0x22   : > { %p5731_p0 = pneg %p6111_p13  ;;  %p5741_p2 = scmp.ne.s32.totalorder %s220_s16, %s5740_s20 }
  0x23   : > { %p5749_p8 = scmp.lt.s32.totalorder %s5740_s20, %s5740_s20 }
  0x24   : > { %p5743_p4 = pnand %p5741_p2, %p5731_p0 }
  0x25   : > { %p5750_p10 = por %p5749_p8, %p5748_p6 }
  0x26   : > { %p5744_p5 = pneg %p5743_p4 }
  0x28   : > { %p5751_p12 = pnand %p5750_p10, %p5744_p5 }
  0x2a   : > { %5754 = shalt.err (!%p5751_p12)
}
  0x2b   : > { %s5973_s24 = smov 384   ;;  %s5974_s9 = smov 24  }
  0x2c   : > { %s9044_s2 = sld [smem:[#allocation152_spill]]  ;;  %s5766_s10 = scalar_lea.vmem %s236_s19, 2048 }
  0x2d   : > { %p5767_p1 = scmp.ne.s32.totalorder %s236_s19, %s5766_s10  ;;  %p5774_p9 = scmp.lt.s32.totalorder %s236_s19, %s236_s19 }
  0x2e   : > { %p5775_p7 = scmp.lt.s32.totalorder %s5766_s10, %s5766_s10 }
  0x2f   : > { %p5769_p2 = pnand %p5767_p1, %p5731_p0 }
  0x30   : > { %p5776_p6 = por %p5775_p7, %p5774_p9 }
  0x31   : > { %p5770_p4 = pneg %p5769_p2 }
  0x32   : > { %5215 = dma.hbm_to_vmem [thread:$0]  (!%p6111_p13), %s9044_s2, 6144, %s220_s16, [#allocation9], %s5973_s24, %s5973_s24, %s5974_s9  }
  0x33   : > { %p5777_p5 = pnand %p5776_p6, %p5770_p4 }
  0x35   : > { %5780 = shalt.err (!%p5777_p5)
}
  0x36   : > { %s8913_s20 = smov 128   ;;  %s8914_s16 = smov 8  }
  0x37   : > { %s9045_s4 = sld [smem:[#allocation153_spill]]  ;;  %s35_s9 = sadd.s32 1, %s5961_s29 }
  0x38   : > { %s38_s15 = sadd.s32 1, %s5965_s30  ;;  %p36_p1 = scmp.ge.s32.totalorder %s35_s9, 2 }
  0x39   : > { %s45_s18 = sadd.s32 1, %s5949_s26  ;;  %p52_p7 = scmp.ne.s32.totalorder %s5949_s26, %s5945_s25 }
  0x3a   : > { %p53_p9 = scmp.eq.s32.totalorder %s5969_s7, 0  ;;  %s9476_s9 = smov (%p36_p1, %s35_s9), 0 }
  0x3b   : > { %9046 = sst [smem:[#allocation25_spill]] %s9476_s9  ;;  %s9478_s15 = smov (!%p36_p1, %s38_s15), %s5965_s30 }
  0x3c   : > { %p6145_p0 = por %p53_p9, %p52_p7  ;;  %s179_s10 = ssub.s32 %s5961_s29, %s9476_s9 }
  0x3d   : > { %5218 = dma.hbm_to_vmem [thread:$0]  (!%p6111_p13), %s9045_s4, 2048, %s236_s19, [#allocation12], %s8913_s20, %s8913_s20, %s8914_s16  }
  0x3e   : > { %p40_p13 = scmp.ge.s32.totalorder %s9478_s15, 2  ;;  %p5232_p8 = scmp.lt.s32.totalorder %s5969_s7, 4 }
  0x3f   : > { %s6153_s19 = sand.u32 1, %s5949_s26   ;;  %s4636_s24 = sshll.u32 %s5965_s30, 12 }
  0x40   : > { %s9480_s15 = smov (%p40_p13, %s9478_s15), 0  ;;  %s4550_s20 = sshll.u32 %s6153_s19, 8 }
  0x41   : > { %9048 = sst [smem:[#allocation26_spill]] %s9480_s15  ;;  %s42_s16 = ssub.s32 %s5965_s30, %s9480_s15 }
  0x42   : > { %p43_p10 = scmp.eq.s32.totalorder %s42_s16, 0  ;;  %s180_s2 = sor.u32 %s179_s10, %s42_s16 }
  0x43   : > { %p181_p12 = scmp.eq.s32.totalorder %s180_s2, 0  ;;  %s9049_s0 = sld [smem:[#allocation151_spill]] }
  0x44   : > { %s6165_s13 = scalar_select %p43_p10, %s5949_s26, %s45_s18  }
  0x45   : > { %s9051_s21 = sadd.s32 1, %s5937_s23  ;;  %s256_s12 = scalar_lea.vmem [#allocation5], %s4550_s20 }
  0x46   : > { %9050 = sst [smem:[#allocation27_spill]] %s6165_s13  ;;  %s263_s28 = sshll.u32 %s256_s12, 4  ;;  %s264_s28 = int_to_ptr.vmem [resolvable:$true] %s263_s28 }
  0x47   : > { %s6170_s6 = scalar_select %p181_p12, %s5937_s23, %s9051_s21  }
  0x48   : > { %p6176_p2 = pnand %p5232_p8, %p6145_p0  ;;  %s273_s2 = sand.u32 1, %s5969_s7  }
  0x49   : > { %s262_s29 = scalar_lea.hbm %s9049_s0, %s4636_s24  ;;  %s253_s16 = scalar_lea.sflag [#allocation6], %s6153_s19 }
  0x4a   : > { %p5783_p4 = pneg %p6176_p2  ;;  %s5794_s4 = scalar_lea.vmem %s264_s28, 4096 }
  0x4b   : > { %p5795_p6 = scmp.ne.s32.totalorder %s264_s28, %s5794_s4  ;;  %s5977_s21 = smov [#allocation5]  }
  0x4c   : > { %s5799_s12 = sshll.u32 %s5977_s21, 4  ;;  %s5800_s12 = int_to_ptr.vmem [resolvable:$false] %s5799_s12 }
  0x4d   : > { %p5797_p5 = pnand %p5795_p6, %p5783_p4  ;;  %s5801_s20 = scalar_lea.vmem %s5800_s12, 8192 }
  0x4e   : > { %p5802_p7 = scmp.lt.s32.totalorder %s264_s28, %s5800_s12  ;;  %p5803_p9 = scmp.lt.s32.totalorder %s5801_s20, %s5794_s4 }
  0x4f   : > { %p5798_p1 = pneg %p5797_p5 }
  0x50   : > { %p5804_p0 = por %p5803_p9, %p5802_p7 }
  0x52   : > { %p5805_p13 = pnand %p5804_p0, %p5798_p1 }
  0x54   : > { %5808 = shalt.err (!%p5805_p13)
}
  0x55   : > { %s9053_s9 = smov 8   ;;  %s9054_s18 = smov 128  }
  0x56   : > { %5222 = dma.hbm_to_vmem [thread:$0]  (!%p6176_p2), %s262_s29, 4096, %s264_s28, %s253_s16, %s9054_s18, %s9054_s18, %s9053_s9  }
  0x57   : > { %s4553_s17 = sshll.u32 %s6153_s19, 1  ;;  %s4637_s10 = sshll.u32 %s5965_s30, 5 }
  0x58   : > { %s283_s0 = scalar_lea.hbm %s8905_s1, %s4637_s10  ;;  %s277_s12 = scalar_lea.vmem [#allocation8], %s4553_s17 }
  0x59   : > { %s285_s4 = sshll.u32 %s277_s12, 4  ;;  %s274_s20 = scalar_lea.sflag [#allocation9], %s273_s2  ;;  %s286_s4 = int_to_ptr.vmem [resolvable:$true] %s285_s4 }
  0x5a   : > { %s5822_s15 = scalar_lea.vmem %s286_s4, 32  ;;  %s5978_s13 = smov [#allocation8]  }
  0x5b   : > { %p5823_p8 = scmp.ne.s32.totalorder %s286_s4, %s5822_s15  ;;  %s5827_s26 = sshll.u32 %s5978_s13, 4  ;;  %s5828_s26 = int_to_ptr.vmem [resolvable:$false] %s5827_s26 }
  0x5c   : > { %s5829_s28 = scalar_lea.vmem %s5828_s26, 64  ;;  %p5830_p6 = scmp.lt.s32.totalorder %s286_s4, %s5828_s26 }
  0x5d   : > { %p5825_p10 = pnand %p5823_p8, %p5783_p4  ;;  %p5831_p5 = scmp.lt.s32.totalorder %s5829_s28, %s5822_s15 }
  0x5f   : > { %p5826_p12 = pneg %p5825_p10  ;;  %p5832_p1 = por %p5831_p5, %p5830_p6 }
  0x61   : > { %p5833_p7 = pnand %p5832_p1, %p5826_p12 }
  0x63   : > { %5836 = shalt.err (!%p5833_p7)
}
  0x64   : > { %5225 = dma.hbm_to_vmem [thread:$0]  (!%p6176_p2), %s283_s0, 32, %s286_s4, %s274_s20  }
  0x65   : > { %294 = sbr.rel (%p6103_p11) target bundleno = 2348 (0x92c), region = 44 }
  0x6a   : > { %s296_s29 = sand.u32 1, %s5945_s25  }
  0x6b   : > { %s4557_s19 = sshll.u32 %s296_s29, 8  ;;  %s297_s2 = scalar_lea.sflag [#allocation6], %s296_s29 }
  0x6c   : > { %s6205_s16 = scalar_lea.vmem [#allocation5], %s4557_s19 }
  0x6d   : > { %5908 = dma.done.wait (%p6086_p3), %s297_s2, 4096  }
  0x6e   : > { %5910 = vsyncadd (%p6086_p3), %s297_s2, 4294963200  ;;  %s305_s26 = sand.u32 1, %s6076_s8   ;;  %s4558_s5 = sshll.u32 %s296_s29, 1 }
  0x6f   : > { %s306_s0 = scalar_lea.sflag [#allocation9], %s305_s26  ;;  %s6212_s13 = scalar_lea.vmem [#allocation8], %s4558_s5 }
  0x70   : > { %5912 = dma.done.wait (%p6086_p3), %s306_s0, 32  }
  0x71   : > { %5914 = vsyncadd (%p6086_p3), %s306_s0, 4294967264  ;;  %p9055_p11 = scmp.eq.s32.totalorder %s6076_s8, 0 }
  0x73   : > { %5916 = dma.done.wait (%p9055_p11), [#allocation9], 6144   ;;  %p9056_p2 = pmov %p9055_p11 }
  0x75   : > { %5918 = vsyncadd (%p9056_p2), [#allocation9], 4294961152  ;;  %p9057_p4 = pmov %p9056_p2 }
  0x76   : > { %p9058_p9 = pmov %p9056_p2 }
  0x77   : > { %5920 = dma.done.wait (%p9057_p4), [#allocation12], 2048  }
  0x78   : > { %5922 = vsyncadd (%p9058_p9), [#allocation12], 4294965248  ;;  %s348_s14 = sand.u32 1, %s5933_s22   ;;  %p4562_p3 = scmp.ne.s32.totalorder %s5953_s27, 0 }
  0x79   : > { %s4561_s15 = sshll.u32 %s348_s14, 7 }
  0x7a   : > { %s6229_s9 = scalar_lea.vmem [#allocation13], %s4561_s15  ;;  %355 = sbr.rel (%p4562_p3) target bundleno = 542 (0x21e), region = 64 }
  0x7f   : > { %v419_v0 = vld [vmem:[#allocation10 + $0x178] sm:$0xff]  ;;  %v418_v1 = vld [vmem:[#allocation10 + $0x170] sm:$0xff]  ;;  %v417_v2 = vld [vmem:[#allocation10 + $0x160] sm:$0xff]  ;;  %v5979_v34 = vmov 0.0  }
  0x80   : > { %432 = vmatprep.subr.mxu0 %v419_v0  ;;  %5134 = vmatprep.subr.mxu1 %v419_v0  ;;  %v416_v3 = vld [vmem:[#allocation10 + $0x158] sm:$0xff]  ;;  %v415_v4 = vld [vmem:[#allocation10 + $0x148] sm:$0xff]  ;;  %v414_v5 = vld [vmem:[#allocation10 + $0x140] sm:$0xff] }
  0x81   : > { %433 = vmatpush1.msra.mxu0 %v418_v1  ;;  %5150 = vmatpush1.msra.mxu1 %v418_v1  ;;  %v413_v6 = vld [vmem:[#allocation10 + $0x130] sm:$0xff]  ;;  %v412_v7 = vld [vmem:[#allocation10 + $0x128] sm:$0xff]  ;;  %v411_v8 = vld [vmem:[#allocation10 + $0x118] sm:$0xff]  ;;  %v422_v1 = vlaneseq }
  0x82   : > { %434 = vmatprep.subr.mxu0 %v417_v2  ;;  %5135 = vmatprep.subr.mxu1 %v417_v2  ;;  %v410_v9 = vld [vmem:[#allocation10 + $0x110] sm:$0xff]  ;;  %v409_v10 = vld [vmem:[#allocation10 + $0x100] sm:$0xff]  ;;  %v408_v11 = vld [vmem:[#allocation10 + $0xf8] sm:$0xff] }
  0x83   : > { %435 = vmatpush1.msra.mxu0 %v416_v3  ;;  %5151 = vmatpush1.msra.mxu1 %v416_v3  ;;  %v407_v12 = vld [vmem:[#allocation10 + $0xe8] sm:$0xff]  ;;  %v406_v13 = vld [vmem:[#allocation10 + $0xe0] sm:$0xff]  ;;  %v405_v14 = vld [vmem:[#allocation10 + $0xd0] sm:$0xff]  ;;  %v423_v2 = vshrl.u32 %v422_v1, 7 }
  0x84   : > { %436 = vmatprep.subr.mxu0 %v415_v4  ;;  %5136 = vmatprep.subr.mxu1 %v415_v4  ;;  %v404_v15 = vld [vmem:[#allocation10 + $0xc8] sm:$0xff]  ;;  %v403_v16 = vld [vmem:[#allocation10 + $0xb8] sm:$0xff]  ;;  %v402_v17 = vld [vmem:[#allocation10 + $0xb0] sm:$0xff] }
  0x85   : > { %437 = vmatpush1.msra.mxu0 %v414_v5  ;;  %5152 = vmatpush1.msra.mxu1 %v414_v5  ;;  %v401_v18 = vld [vmem:[#allocation10 + $0xa0] sm:$0xff]  ;;  %v400_v19 = vld [vmem:[#allocation10 + $0x98] sm:$0xff]  ;;  %v399_v20 = vld [vmem:[#allocation10 + $0x88] sm:$0xff]  ;;  %v424_v3 = vsub.s32 0, %v423_v2  ;;  %v428_v5 = vsub.s32 1, %v423_v2 }
  0x86   : > { %438 = vmatprep.subr.mxu0 %v413_v6  ;;  %5137 = vmatprep.subr.mxu1 %v413_v6  ;;  %v398_v21 = vld [vmem:[#allocation10 + $0x80] sm:$0xff]  ;;  %v397_v22 = vld [vmem:[#allocation10 + $0x70] sm:$0xff]  ;;  %v396_v23 = vld [vmem:[#allocation10 + $0x68] sm:$0xff] }
  0x87   : > { %439 = vmatpush1.msra.mxu0 %v412_v7  ;;  %5153 = vmatpush1.msra.mxu1 %v412_v7  ;;  %v395_v24 = vld [vmem:[#allocation10 + $0x58] sm:$0xff]  ;;  %v394_v25 = vld [vmem:[#allocation10 + $0x50] sm:$0xff]  ;;  %v393_v26 = vld [vmem:[#allocation10 + $0x40] sm:$0xff] }
  0x88   : > { %440 = vmatprep.subr.mxu0 %v411_v8  ;;  %5138 = vmatprep.subr.mxu1 %v411_v8  ;;  %v392_v27 = vld [vmem:[#allocation10 + $0x38] sm:$0xff]  ;;  %v391_v28 = vld [vmem:[#allocation10 + $0x28] sm:$0xff]  ;;  %v390_v29 = vld [vmem:[#allocation10 + $0x20] sm:$0xff] }
  0x89   : > { %441 = vmatpush1.msra.mxu0 %v410_v9  ;;  %5154 = vmatpush1.msra.mxu1 %v410_v9  ;;  %v389_v30 = vld [vmem:[#allocation10 + $0x10] sm:$0xff]  ;;  %v388_v31 = vld [vmem:[#allocation10 + $0x8] sm:$0xff]  ;;  %v356_v32 = vld [vmem:[%s6205_s16] sm:$0xff] }
  0x8a   : > { %442 = vmatprep.subr.mxu0 %v409_v10  ;;  %5139 = vmatprep.subr.mxu1 %v409_v10  ;;  %v372_v33 = vld [vmem:[%s6205_s16 + $0x80] sm:$0xff]  ;;  %v357_v35 = vld [vmem:[%s6205_s16 + $0x8] sm:$0xff]  ;;  %v358_v37 = vld [vmem:[%s6205_s16 + $0x10] sm:$0xff] }
  0x8b   : > { %443 = vmatpush1.msra.mxu0 %v408_v11  ;;  %5155 = vmatpush1.msra.mxu1 %v408_v11  ;;  %v373_v36 = vld [vmem:[%s6205_s16 + $0x88] sm:$0xff]  ;;  %v374_v38 = vld [vmem:[%s6205_s16 + $0x90] sm:$0xff]  ;;  %v359_v39 = vld [vmem:[%s6205_s16 + $0x18] sm:$0xff] }
  0x8c   : > { %444 = vmatprep.subr.mxu0 %v407_v12  ;;  %5140 = vmatprep.subr.mxu1 %v407_v12  ;;  %v375_v40 = vld [vmem:[%s6205_s16 + $0x98] sm:$0xff]  ;;  %v360_v41 = vld [vmem:[%s6205_s16 + $0x20] sm:$0xff]  ;;  %v361_v43 = vld [vmem:[%s6205_s16 + $0x28] sm:$0xff] }
  0x8d   : > { %445 = vmatpush1.msra.mxu0 %v406_v13  ;;  %5156 = vmatpush1.msra.mxu1 %v406_v13  ;;  %v376_v42 = vld [vmem:[%s6205_s16 + $0xa0] sm:$0xff]  ;;  %v377_v44 = vld [vmem:[%s6205_s16 + $0xa8] sm:$0xff]  ;;  %v362_v45 = vld [vmem:[%s6205_s16 + $0x30] sm:$0xff] }
  0x8e   : > { %446 = vmatprep.subr.mxu0 %v405_v14  ;;  %5141 = vmatprep.subr.mxu1 %v405_v14  ;;  %v378_v46 = vld [vmem:[%s6205_s16 + $0xb0] sm:$0xff]  ;;  %v363_v47 = vld [vmem:[%s6205_s16 + $0x38] sm:$0xff]  ;;  %v364_v49 = vld [vmem:[%s6205_s16 + $0x40] sm:$0xff] }
  0x8f   : > { %447 = vmatpush1.msra.mxu0 %v404_v15  ;;  %5157 = vmatpush1.msra.mxu1 %v404_v15  ;;  %v379_v48 = vld [vmem:[%s6205_s16 + $0xb8] sm:$0xff]  ;;  %v380_v50 = vld [vmem:[%s6205_s16 + $0xc0] sm:$0xff]  ;;  %v365_v51 = vld [vmem:[%s6205_s16 + $0x48] sm:$0xff] }
  0x90   : > { %448 = vmatprep.subr.mxu0 %v403_v16  ;;  %5142 = vmatprep.subr.mxu1 %v403_v16  ;;  %v381_v52 = vld [vmem:[%s6205_s16 + $0xc8] sm:$0xff]  ;;  %v366_v53 = vld [vmem:[%s6205_s16 + $0x50] sm:$0xff]  ;;  %v367_v55 = vld [vmem:[%s6205_s16 + $0x58] sm:$0xff] }
  0x91   : > { %449 = vmatpush1.msra.mxu0 %v402_v17  ;;  %5158 = vmatpush1.msra.mxu1 %v402_v17  ;;  %v382_v54 = vld [vmem:[%s6205_s16 + $0xd0] sm:$0xff]  ;;  %v383_v56 = vld [vmem:[%s6205_s16 + $0xd8] sm:$0xff]  ;;  %v368_v57 = vld [vmem:[%s6205_s16 + $0x60] sm:$0xff] }
  0x92   : > { %450 = vmatprep.subr.mxu0 %v401_v18  ;;  %5143 = vmatprep.subr.mxu1 %v401_v18  ;;  %v384_v58 = vld [vmem:[%s6205_s16 + $0xe0] sm:$0xff]  ;;  %v369_v59 = vld [vmem:[%s6205_s16 + $0x68] sm:$0xff]  ;;  %v370_v61 = vld [vmem:[%s6205_s16 + $0x70] sm:$0xff] }
  0x93   : > { %451 = vmatpush1.msra.mxu0 %v400_v19  ;;  %5159 = vmatpush1.msra.mxu1 %v400_v19  ;;  %v385_v60 = vld [vmem:[%s6205_s16 + $0xe8] sm:$0xff]  ;;  %v386_v62 = vld [vmem:[%s6205_s16 + $0xf0] sm:$0xff]  ;;  %v371_v63 = vld [vmem:[%s6205_s16 + $0x78] sm:$0xff] }
  0x94   : > { %452 = vmatprep.subr.mxu0 %v399_v20  ;;  %5144 = vmatprep.subr.mxu1 %v399_v20  ;;  %v387_v0 = vld [vmem:[%s6205_s16 + $0xf8] sm:$0xff]  ;;  %v420_v4 = vld [vmem:[%s8907_s3 + $0x1] sm:$0x3] }
  0x95   : > { %453 = vmatpush1.msra.mxu0 %v398_v21  ;;  %5160 = vmatpush1.msra.mxu1 %v398_v21  ;;  %v6299_v6 = vrot.slane %v420_v4, %v424_v3  ;;  %v6301_v7 = vrot.slane %v420_v4, %v428_v5 }
  0x96   : > { %454 = vmatprep.subr.mxu0 %v397_v22  ;;  %5145 = vmatprep.subr.mxu1 %v397_v22 }
  0x97   : > { %455 = vmatpush1.msra.mxu0 %v396_v23  ;;  %5161 = vmatpush1.msra.mxu1 %v396_v23 }
  0x98   : > { %456 = vmatprep.subr.mxu0 %v395_v24  ;;  %5146 = vmatprep.subr.mxu1 %v395_v24 }
  0x99   : > { %457 = vmatpush1.msra.mxu0 %v394_v25  ;;  %5162 = vmatpush1.msra.mxu1 %v394_v25 }
  0x9a   : > { %458 = vmatprep.subr.mxu0 %v393_v26  ;;  %5147 = vmatprep.subr.mxu1 %v393_v26 }
  0x9b   : > { %459 = vmatpush1.msra.mxu0 %v392_v27  ;;  %5163 = vmatpush1.msra.mxu1 %v392_v27 }
  0x9c   : > { %460 = vmatprep.subr.mxu0 %v391_v28  ;;  %5148 = vmatprep.subr.mxu1 %v391_v28 }
  0x9d   : > { %461 = vmatpush1.msra.mxu0 %v390_v29  ;;  %5164 = vmatpush1.msra.mxu1 %v390_v29 }
  0x9e   : > { %462 = vmatprep.subr.mxu0 %v389_v30  ;;  %5149 = vmatprep.subr.mxu1 %v389_v30 }
  0x9f   : > { %463 = vmatpush1.msra.mxu0 %v388_v31  ;;  %5165 = vmatpush1.msra.mxu1 %v388_v31 }
  0xa0   : > { %496 = vmatprep.mubr.f32.mxu0 %v5979_v34  ;;  %592 = vmatprep.mubr.f32.mxu1 %v5979_v34 }
  0xa1   : > { %497 = vmatmul.mubr.f32.vlgmr.msra.gmra.mxu0 %v356_v32  ;;  %593 = vmatmul.mubr.f32.vlgmr.msra.gmra.mxu1 %v372_v33 }
  0xa2   : > { %502 = vmatprep.mubr.f32.mxu0 %v5979_v34  ;;  %598 = vmatprep.mubr.f32.mxu1 %v5979_v34 }
  0xa5   : > { %503 = vmatmul.mubr.f32.gmra.mxu0 %v357_v35  ;;  %599 = vmatmul.mubr.f32.gmra.mxu1 %v373_v36 }
  0xa6   : > { %508 = vmatprep.mubr.f32.mxu0 %v5979_v34  ;;  %604 = vmatprep.mubr.f32.mxu1 %v5979_v34 }
  0xa9   : > { %509 = vmatmul.mubr.f32.gmra.mxu0 %v358_v37  ;;  %605 = vmatmul.mubr.f32.gmra.mxu1 %v374_v38 }
  0xaa   : > { %514 = vmatprep.mubr.f32.mxu0 %v5979_v34  ;;  %610 = vmatprep.mubr.f32.mxu1 %v5979_v34 }
  0xad   : > { %515 = vmatmul.mubr.f32.gmra.mxu0 %v359_v39  ;;  %611 = vmatmul.mubr.f32.gmra.mxu1 %v375_v40 }
  0xae   : > { %520 = vmatprep.mubr.f32.mxu0 %v5979_v34  ;;  %616 = vmatprep.mubr.f32.mxu1 %v5979_v34 }
  0xb1   : > { %521 = vmatmul.mubr.f32.gmra.mxu0 %v360_v41  ;;  %617 = vmatmul.mubr.f32.gmra.mxu1 %v376_v42 }
  0xb2   : > { %526 = vmatprep.mubr.f32.mxu0 %v5979_v34  ;;  %622 = vmatprep.mubr.f32.mxu1 %v5979_v34 }
  0xb5   : > { %527 = vmatmul.mubr.f32.gmra.mxu0 %v361_v43  ;;  %623 = vmatmul.mubr.f32.gmra.mxu1 %v377_v44 }
  0xb6   : > { %532 = vmatprep.mubr.f32.mxu0 %v5979_v34  ;;  %628 = vmatprep.mubr.f32.mxu1 %v5979_v34 }
  0xb9   : > { %533 = vmatmul.mubr.f32.gmra.mxu0 %v362_v45  ;;  %629 = vmatmul.mubr.f32.gmra.mxu1 %v378_v46 }
  0xba   : > { %538 = vmatprep.mubr.f32.mxu0 %v5979_v34  ;;  %634 = vmatprep.mubr.f32.mxu1 %v5979_v34 }
  0xbd   : > { %539 = vmatmul.mubr.f32.gmra.mxu0 %v363_v47  ;;  %635 = vmatmul.mubr.f32.gmra.mxu1 %v379_v48 }
  0xbe   : > { %544 = vmatprep.mubr.f32.mxu0 %v5979_v34  ;;  %640 = vmatprep.mubr.f32.mxu1 %v5979_v34 }
  0xc1   : > { %545 = vmatmul.mubr.f32.gmra.mxu0 %v364_v49  ;;  %641 = vmatmul.mubr.f32.gmra.mxu1 %v380_v50 }
  0xc2   : > { %550 = vmatprep.mubr.f32.mxu0 %v5979_v34  ;;  %646 = vmatprep.mubr.f32.mxu1 %v5979_v34 }
  0xc5   : > { %551 = vmatmul.mubr.f32.gmra.mxu0 %v365_v51  ;;  %647 = vmatmul.mubr.f32.gmra.mxu1 %v381_v52 }
  0xc6   : > { %556 = vmatprep.mubr.f32.mxu0 %v5979_v34  ;;  %652 = vmatprep.mubr.f32.mxu1 %v5979_v34 }
  0xc9   : > { %557 = vmatmul.mubr.f32.gmra.mxu0 %v366_v53  ;;  %653 = vmatmul.mubr.f32.gmra.mxu1 %v382_v54 }
  0xca   : > { %562 = vmatprep.mubr.f32.mxu0 %v5979_v34  ;;  %658 = vmatprep.mubr.f32.mxu1 %v5979_v34 }
  0xcd   : > { %563 = vmatmul.mubr.f32.gmra.mxu0 %v367_v55  ;;  %659 = vmatmul.mubr.f32.gmra.mxu1 %v383_v56 }
  0xce   : > { %568 = vmatprep.mubr.f32.mxu0 %v5979_v34  ;;  %664 = vmatprep.mubr.f32.mxu1 %v5979_v34 }
  0xd1   : > { %569 = vmatmul.mubr.f32.gmra.mxu0 %v368_v57  ;;  %665 = vmatmul.mubr.f32.gmra.mxu1 %v384_v58 }
  0xd2   : > { %574 = vmatprep.mubr.f32.mxu0 %v5979_v34  ;;  %670 = vmatprep.mubr.f32.mxu1 %v5979_v34 }
  0xd5   : > { %575 = vmatmul.mubr.f32.gmra.mxu0 %v369_v59  ;;  %671 = vmatmul.mubr.f32.gmra.mxu1 %v385_v60 }
  0xd6   : > { %580 = vmatprep.mubr.f32.mxu0 %v5979_v34  ;;  %676 = vmatprep.mubr.f32.mxu1 %v5979_v34 }
  0xd9   : > { %581 = vmatmul.mubr.f32.gmra.mxu0 %v370_v61  ;;  %677 = vmatmul.mubr.f32.gmra.mxu1 %v386_v62 }
  0xda   : > { %586 = vmatprep.mubr.f32.mxu0 %v5979_v34  ;;  %682 = vmatprep.mubr.f32.mxu1 %v5979_v34 }
  0xdd   : > { %587 = vmatmul.mubr.f32.gmra.mxu0 %v371_v63  ;;  %683 = vmatmul.mubr.f32.gmra.mxu1 %v387_v0 }
 0x161   : > { %v498_v8 = vpop.f32.mrf.mxu0  ;;  %v594_v9 = vpop.f32.mrf.mxu1 }
 0x162   : > { %v595_v10 = vadd.f32 %v594_v9, %v6299_v6  ;;  %v499_v11 = vadd.f32 %v498_v8, %v6299_v6 }
 0x163   : > { %v500_v12 = vpop.f32.mrf.mxu0  ;;  %v596_v13 = vpop.f32.mrf.mxu1 }
 0x164   : > { %v501_v14 = vadd.f32 %v500_v12, %v6301_v7  ;;  %v597_v15 = vadd.f32 %v596_v13, %v6301_v7  ;;  %721 = vxpose.xlu1.b32.start [1/16] %v595_v10, 128  ;;  %689 = vxpose.xlu0.b32.start [1/16] %v499_v11, 128 }
 0x165   : > { %v504_v16 = vpop.f32.mrf.mxu0  ;;  %v600_v17 = vpop.f32.mrf.mxu1 }
 0x166   : > { %785 = vst [vmem:[#allocation3 + $0x80] sm:$0xff] %v501_v14  ;;  %801 = vst [vmem:[#allocation3 + $0x10] sm:$0xff] %v597_v15  ;;  %v505_v18 = vadd.f32 %v504_v16, %v6299_v6  ;;  %v601_v19 = vadd.f32 %v600_v17, %v6299_v6 }
 0x167   : > { %v506_v20 = vpop.f32.mrf.mxu0  ;;  %v602_v21 = vpop.f32.mrf.mxu1 }
 0x168   : > { %v507_v22 = vadd.f32 %v506_v20, %v6301_v7  ;;  %v603_v23 = vadd.f32 %v602_v21, %v6301_v7  ;;  %722 = vxpose.xlu1.b32.cont [2/16] %v601_v19, 128  ;;  %690 = vxpose.xlu0.b32.cont [2/16] %v505_v18, 128 }
 0x169   : > { %v510_v24 = vpop.f32.mrf.mxu0  ;;  %v606_v25 = vpop.f32.mrf.mxu1 }
 0x16a   : > { %786 = vst [vmem:[#allocation3 + $0xc8] sm:$0xff] %v507_v22  ;;  %802 = vst [vmem:[#allocation3 + $0x70] sm:$0xff] %v603_v23  ;;  %v511_v26 = vadd.f32 %v510_v24, %v6299_v6  ;;  %v607_v27 = vadd.f32 %v606_v25, %v6299_v6 }
 0x16b   : > { %v512_v28 = vpop.f32.mrf.mxu0  ;;  %v608_v29 = vpop.f32.mrf.mxu1 }
 0x16c   : > { %v513_v30 = vadd.f32 %v512_v28, %v6301_v7  ;;  %v609_v31 = vadd.f32 %v608_v29, %v6301_v7  ;;  %723 = vxpose.xlu1.b32.cont [3/16] %v607_v27, 128  ;;  %691 = vxpose.xlu0.b32.cont [3/16] %v511_v26, 128 }
 0x16d   : > { %v516_v32 = vpop.f32.mrf.mxu0  ;;  %v612_v33 = vpop.f32.mrf.mxu1 }
 0x16e   : > { %787 = vst [vmem:[#allocation3 + $0xe8] sm:$0xff] %v513_v30  ;;  %803 = vst [vmem:[#allocation3 + $0x50] sm:$0xff] %v609_v31  ;;  %v517_v34 = vadd.f32 %v516_v32, %v6299_v6  ;;  %v613_v35 = vadd.f32 %v612_v33, %v6299_v6 }
 0x16f   : > { %v518_v36 = vpop.f32.mrf.mxu0  ;;  %v614_v37 = vpop.f32.mrf.mxu1 }
 0x170   : > { %v519_v38 = vadd.f32 %v518_v36, %v6301_v7  ;;  %v615_v39 = vadd.f32 %v614_v37, %v6301_v7  ;;  %724 = vxpose.xlu1.b32.cont [4/16] %v613_v35, 128  ;;  %692 = vxpose.xlu0.b32.cont [4/16] %v517_v34, 128 }
 0x171   : > { %v522_v40 = vpop.f32.mrf.mxu0  ;;  %v618_v41 = vpop.f32.mrf.mxu1 }
 0x172   : > { %788 = vst [vmem:[#allocation3 + $0x78] sm:$0xff] %v519_v38  ;;  %804 = vst [vmem:[#allocation3 + $0xa0] sm:$0xff] %v615_v39  ;;  %v523_v42 = vadd.f32 %v522_v40, %v6299_v6  ;;  %v619_v43 = vadd.f32 %v618_v41, %v6299_v6 }
 0x173   : > { %v524_v44 = vpop.f32.mrf.mxu0  ;;  %v620_v45 = vpop.f32.mrf.mxu1 }
 0x174   : > { %v525_v46 = vadd.f32 %v524_v44, %v6301_v7  ;;  %v621_v47 = vadd.f32 %v620_v45, %v6301_v7  ;;  %725 = vxpose.xlu1.b32.cont [5/16] %v619_v43, 128  ;;  %693 = vxpose.xlu0.b32.cont [5/16] %v523_v42, 128 }
 0x175   : > { %v528_v48 = vpop.f32.mrf.mxu0  ;;  %v624_v49 = vpop.f32.mrf.mxu1 }
 0x176   : > { %789 = vst [vmem:[#allocation3 + $0x8] sm:$0xff] %v525_v46  ;;  %805 = vst [vmem:[#allocation3 + $0xd8] sm:$0xff] %v621_v47  ;;  %v529_v50 = vadd.f32 %v528_v48, %v6299_v6  ;;  %v625_v51 = vadd.f32 %v624_v49, %v6299_v6 }
 0x177   : > { %v530_v52 = vpop.f32.mrf.mxu0  ;;  %v626_v53 = vpop.f32.mrf.mxu1 }
 0x178   : > { %v531_v54 = vadd.f32 %v530_v52, %v6301_v7  ;;  %v627_v55 = vadd.f32 %v626_v53, %v6301_v7  ;;  %726 = vxpose.xlu1.b32.cont [6/16] %v625_v51, 128  ;;  %694 = vxpose.xlu0.b32.cont [6/16] %v529_v50, 128 }
 0x179   : > { %v534_v56 = vpop.f32.mrf.mxu0  ;;  %v630_v57 = vpop.f32.mrf.mxu1 }
 0x17a   : > { %790 = vst [vmem:[#allocation3 + $0x90] sm:$0xff] %v531_v54  ;;  %806 = vst [vmem:[#allocation3 + $0x30] sm:$0xff] %v627_v55  ;;  %v535_v58 = vadd.f32 %v534_v56, %v6299_v6  ;;  %v631_v59 = vadd.f32 %v630_v57, %v6299_v6 }
 0x17b   : > { %v536_v60 = vpop.f32.mrf.mxu0  ;;  %v632_v61 = vpop.f32.mrf.mxu1 }
 0x17c   : > { %v537_v62 = vadd.f32 %v536_v60, %v6301_v7  ;;  %v633_v63 = vadd.f32 %v632_v61, %v6301_v7  ;;  %727 = vxpose.xlu1.b32.cont [7/16] %v631_v59, 128  ;;  %695 = vxpose.xlu0.b32.cont [7/16] %v535_v58, 128 }
 0x17d   : > { %v540_v0 = vpop.f32.mrf.mxu0  ;;  %v636_v1 = vpop.f32.mrf.mxu1 }
 0x17e   : > { %791 = vst [vmem:[#allocation3 + $0x58] sm:$0xff] %v537_v62  ;;  %807 = vst [vmem:[#allocation3 + $0x20] sm:$0xff] %v633_v63  ;;  %v541_v2 = vadd.f32 %v540_v0, %v6299_v6  ;;  %v637_v3 = vadd.f32 %v636_v1, %v6299_v6 }
 0x17f   : > { %v542_v4 = vpop.f32.mrf.mxu0  ;;  %v638_v5 = vpop.f32.mrf.mxu1 }
 0x180   : > { %v543_v8 = vadd.f32 %v542_v4, %v6301_v7  ;;  %v639_v9 = vadd.f32 %v638_v5, %v6301_v7  ;;  %728 = vxpose.xlu1.b32.cont [8/16] %v637_v3, 128  ;;  %696 = vxpose.xlu0.b32.cont [8/16] %v541_v2, 128 }
 0x181   : > { %v546_v10 = vpop.f32.mrf.mxu0  ;;  %v642_v11 = vpop.f32.mrf.mxu1 }
 0x182   : > { %792 = vst [vmem:[#allocation3 + $0xa8] sm:$0xff] %v543_v8  ;;  %808 = vst [vmem:[#allocation3 + $0xf0] sm:$0xff] %v639_v9  ;;  %v547_v12 = vadd.f32 %v546_v10, %v6299_v6  ;;  %v643_v13 = vadd.f32 %v642_v11, %v6299_v6 }
 0x183   : > { %v548_v14 = vpop.f32.mrf.mxu0  ;;  %v644_v15 = vpop.f32.mrf.mxu1 }
 0x184   : > { %v549_v16 = vadd.f32 %v548_v14, %v6301_v7  ;;  %v645_v17 = vadd.f32 %v644_v15, %v6301_v7  ;;  %729 = vxpose.xlu1.b32.cont [9/16] %v643_v13, 128  ;;  %697 = vxpose.xlu0.b32.cont [9/16] %v547_v12, 128 }
 0x185   : > { %v552_v18 = vpop.f32.mrf.mxu0  ;;  %v648_v19 = vpop.f32.mrf.mxu1 }
 0x186   : > { %793 = vst [vmem:[#allocation3 + $0xd0] sm:$0xff] %v549_v16  ;;  %809 = vst [vmem:[#allocation3 + $0x88] sm:$0xff] %v645_v17  ;;  %v553_v20 = vadd.f32 %v552_v18, %v6299_v6  ;;  %v649_v21 = vadd.f32 %v648_v19, %v6299_v6 }
 0x187   : > { %v554_v22 = vpop.f32.mrf.mxu0  ;;  %v650_v23 = vpop.f32.mrf.mxu1 }
 0x188   : > { %v555_v24 = vadd.f32 %v554_v22, %v6301_v7  ;;  %v651_v25 = vadd.f32 %v650_v23, %v6301_v7  ;;  %730 = vxpose.xlu1.b32.cont [10/16] %v649_v21, 128  ;;  %698 = vxpose.xlu0.b32.cont [10/16] %v553_v20, 128 }
 0x189   : > { %v558_v26 = vpop.f32.mrf.mxu0  ;;  %v654_v27 = vpop.f32.mrf.mxu1 }
 0x18a   : > { %794 = vst [vmem:[#allocation3 + $0xb0] sm:$0xff] %v555_v24  ;;  %810 = vst [vmem:[#allocation3 + $0x48] sm:$0xff] %v651_v25  ;;  %v559_v28 = vadd.f32 %v558_v26, %v6299_v6  ;;  %v655_v29 = vadd.f32 %v654_v27, %v6299_v6 }
 0x18b   : > { %v560_v30 = vpop.f32.mrf.mxu0  ;;  %v656_v31 = vpop.f32.mrf.mxu1 }
 0x18c   : > { %v561_v32 = vadd.f32 %v560_v30, %v6301_v7  ;;  %v657_v33 = vadd.f32 %v656_v31, %v6301_v7  ;;  %731 = vxpose.xlu1.b32.cont [11/16] %v655_v29, 128  ;;  %699 = vxpose.xlu0.b32.cont [11/16] %v559_v28, 128 }
 0x18d   : > { %v564_v34 = vpop.f32.mrf.mxu0  ;;  %v660_v35 = vpop.f32.mrf.mxu1 }
 0x18e   : > { %795 = vst [vmem:[#allocation3 + $0x38] sm:$0xff] %v561_v32  ;;  %811 = vst [vmem:[#allocation3 + $0xf8] sm:$0xff] %v657_v33  ;;  %v565_v36 = vadd.f32 %v564_v34, %v6299_v6  ;;  %v661_v37 = vadd.f32 %v660_v35, %v6299_v6 }
 0x18f   : > { %v566_v38 = vpop.f32.mrf.mxu0  ;;  %v662_v39 = vpop.f32.mrf.mxu1 }
 0x190   : > { %v567_v40 = vadd.f32 %v566_v38, %v6301_v7  ;;  %v663_v41 = vadd.f32 %v662_v39, %v6301_v7  ;;  %732 = vxpose.xlu1.b32.cont [12/16] %v661_v37, 128  ;;  %700 = vxpose.xlu0.b32.cont [12/16] %v565_v36, 128 }
 0x191   : > { %v570_v42 = vpop.f32.mrf.mxu0  ;;  %v666_v43 = vpop.f32.mrf.mxu1 }
 0x192   : > { %796 = vst [vmem:[#allocation3 + $0x40] sm:$0xff] %v567_v40  ;;  %812 = vst [vmem:[#allocation3 + $0xc0] sm:$0xff] %v663_v41  ;;  %v571_v44 = vadd.f32 %v570_v42, %v6299_v6  ;;  %v667_v45 = vadd.f32 %v666_v43, %v6299_v6 }
 0x193   : > { %v572_v46 = vpop.f32.mrf.mxu0  ;;  %v668_v47 = vpop.f32.mrf.mxu1 }
 0x194   : > { %v573_v48 = vadd.f32 %v572_v46, %v6301_v7  ;;  %v669_v49 = vadd.f32 %v668_v47, %v6301_v7  ;;  %733 = vxpose.xlu1.b32.cont [13/16] %v667_v45, 128  ;;  %701 = vxpose.xlu0.b32.cont [13/16] %v571_v44, 128 }
 0x195   : > { %v576_v50 = vpop.f32.mrf.mxu0  ;;  %v672_v51 = vpop.f32.mrf.mxu1 }
 0x196   : > { %797 = vst [vmem:[#allocation3 + $0xe0] sm:$0xff] %v573_v48  ;;  %813 = vst [vmem:[#allocation3 + $0xb8] sm:$0xff] %v669_v49  ;;  %v577_v52 = vadd.f32 %v576_v50, %v6299_v6  ;;  %v673_v53 = vadd.f32 %v672_v51, %v6299_v6 }
 0x197   : > { %v578_v54 = vpop.f32.mrf.mxu0  ;;  %v674_v55 = vpop.f32.mrf.mxu1 }
 0x198   : > { %v579_v56 = vadd.f32 %v578_v54, %v6301_v7  ;;  %v675_v57 = vadd.f32 %v674_v55, %v6301_v7  ;;  %734 = vxpose.xlu1.b32.cont [14/16] %v673_v53, 128  ;;  %702 = vxpose.xlu0.b32.cont [14/16] %v577_v52, 128 }
 0x199   : > { %v582_v58 = vpop.f32.mrf.mxu0  ;;  %v678_v59 = vpop.f32.mrf.mxu1 }
 0x19a   : > { %798 = vst [vmem:[#allocation3 + $0x60] sm:$0xff] %v579_v56  ;;  %814 = vst [vmem:[#allocation3] sm:$0xff] %v675_v57  ;;  %v583_v60 = vadd.f32 %v582_v58, %v6299_v6  ;;  %v679_v61 = vadd.f32 %v678_v59, %v6299_v6 }
 0x19b   : > { %v584_v62 = vpop.f32.mrf.mxu0  ;;  %v680_v63 = vpop.f32.mrf.mxu1 }
 0x19c   : > { %v585_v0 = vadd.f32 %v584_v62, %v6301_v7  ;;  %v681_v1 = vadd.f32 %v680_v63, %v6301_v7  ;;  %735 = vxpose.xlu1.b32.cont [15/16] %v679_v61, 128  ;;  %703 = vxpose.xlu0.b32.cont [15/16] %v583_v60, 128 }
 0x19d   : > { %v588_v2 = vpop.f32.mrf.mxu0  ;;  %v684_v3 = vpop.f32.mrf.mxu1 }
 0x19e   : > { %799 = vst [vmem:[#allocation3 + $0x18] sm:$0xff] %v585_v0  ;;  %815 = vst [vmem:[#allocation3 + $0x28] sm:$0xff] %v681_v1  ;;  %v589_v4 = vadd.f32 %v588_v2, %v6299_v6  ;;  %v685_v5 = vadd.f32 %v684_v3, %v6299_v6 }
 0x19f   : > { %v590_v8 = vpop.f32.mrf.mxu0  ;;  %v686_v9 = vpop.f32.mrf.mxu1 }
 0x1a0   : > { %v591_v10 = vadd.f32 %v590_v8, %v6301_v7  ;;  %v687_v11 = vadd.f32 %v686_v9, %v6301_v7  ;;  %736 = vxpose.xlu1.b32.end [16/16] %v685_v5, 128  ;;  %704 = vxpose.xlu0.b32.end [16/16] %v589_v4, 128 }
 0x1a2   : > { %800 = vst [vmem:[#allocation3 + $0x68] sm:$0xff] %v591_v10  ;;  %816 = vst [vmem:[#allocation3 + $0x98] sm:$0xff] %v687_v11 }
 0x1e0   : > { %v737_v12 = vpop.trf.xlu1  ;;  %v705_v13 = vpop.trf.xlu0 }
 0x1e1   : > { %754 = vst [vmem:[#allocation2] sm:$0xff] %v737_v12  ;;  %753 = vst [vmem:[#allocation2 + $0xb0] sm:$0xff] %v705_v13 }
 0x1e4   : > { %v738_v14 = vpop.trf.xlu1  ;;  %v706_v15 = vpop.trf.xlu0 }
 0x1e5   : > { %756 = vst [vmem:[#allocation2 + $0x18] sm:$0xff] %v738_v14  ;;  %755 = vst [vmem:[#allocation2 + $0xd8] sm:$0xff] %v706_v15 }
 0x1e8   : > { %v739_v16 = vpop.trf.xlu1  ;;  %v707_v6 = vpop.trf.xlu0 }
 0x1e9   : > { %758 = vst [vmem:[#allocation2 + $0x68] sm:$0xff] %v739_v16  ;;  %757 = vst [vmem:[#allocation2 + $0x50] sm:$0xff] %v707_v6 }
 0x1ec   : > { %v740_v17 = vpop.trf.xlu1  ;;  %v708_v18 = vpop.trf.xlu0 }
 0x1ed   : > { %760 = vst [vmem:[#allocation2 + $0x48] sm:$0xff] %v740_v17  ;;  %759 = vst [vmem:[#allocation2 + $0x30] sm:$0xff] %v708_v18 }
 0x1f0   : > { %v741_v7 = vpop.trf.xlu1  ;;  %v709_v19 = vpop.trf.xlu0 }
 0x1f1   : > { %762 = vst [vmem:[#allocation2 + $0x88] sm:$0xff] %v741_v7  ;;  %761 = vst [vmem:[#allocation2 + $0x80] sm:$0xff] %v709_v19 }
 0x1f4   : > { %v742_v20 = vpop.trf.xlu1  ;;  %v710_v21 = vpop.trf.xlu0 }
 0x1f5   : > { %764 = vst [vmem:[#allocation2 + $0xb8] sm:$0xff] %v742_v20  ;;  %763 = vst [vmem:[#allocation2 + $0xe8] sm:$0xff] %v710_v21 }
 0x1f8   : > { %v743_v22 = vpop.trf.xlu1  ;;  %v711_v23 = vpop.trf.xlu0 }
 0x1f9   : > { %766 = vst [vmem:[#allocation2 + $0xf0] sm:$0xff] %v743_v22  ;;  %765 = vst [vmem:[#allocation2 + $0x60] sm:$0xff] %v711_v23 }
 0x1fc   : > { %v744_v24 = vpop.trf.xlu1  ;;  %v712_v25 = vpop.trf.xlu0 }
 0x1fd   : > { %768 = vst [vmem:[#allocation2 + $0x78] sm:$0xff] %v744_v24  ;;  %767 = vst [vmem:[#allocation2 + $0x8] sm:$0xff] %v712_v25 }
 0x200   : > { %v745_v26 = vpop.trf.xlu1  ;;  %v713_v27 = vpop.trf.xlu0 }
 0x201   : > { %770 = vst [vmem:[#allocation2 + $0x58] sm:$0xff] %v745_v26  ;;  %769 = vst [vmem:[#allocation2 + $0x38] sm:$0xff] %v713_v27 }
 0x204   : > { %v746_v28 = vpop.trf.xlu1  ;;  %v714_v29 = vpop.trf.xlu0 }
 0x205   : > { %772 = vst [vmem:[#allocation2 + $0xc8] sm:$0xff] %v746_v28  ;;  %771 = vst [vmem:[#allocation2 + $0x40] sm:$0xff] %v714_v29 }
 0x208   : > { %v747_v30 = vpop.trf.xlu1  ;;  %v715_v31 = vpop.trf.xlu0 }
 0x209   : > { %774 = vst [vmem:[#allocation2 + $0x90] sm:$0xff] %v747_v30  ;;  %773 = vst [vmem:[#allocation2 + $0xe0] sm:$0xff] %v715_v31 }
 0x20c   : > { %v748_v32 = vpop.trf.xlu1  ;;  %v716_v33 = vpop.trf.xlu0 }
 0x20d   : > { %776 = vst [vmem:[#allocation2 + $0xc0] sm:$0xff] %v748_v32  ;;  %775 = vst [vmem:[#allocation2 + $0x70] sm:$0xff] %v716_v33 }
 0x210   : > { %v749_v34 = vpop.trf.xlu1  ;;  %v717_v35 = vpop.trf.xlu0 }
 0x211   : > { %778 = vst [vmem:[#allocation2 + $0xd0] sm:$0xff] %v749_v34  ;;  %777 = vst [vmem:[#allocation2 + $0xa8] sm:$0xff] %v717_v35 }
 0x214   : > { %v750_v36 = vpop.trf.xlu1  ;;  %v718_v37 = vpop.trf.xlu0 }
 0x215   : > { %780 = vst [vmem:[#allocation2 + $0x28] sm:$0xff] %v750_v36  ;;  %779 = vst [vmem:[#allocation2 + $0x10] sm:$0xff] %v718_v37 }
 0x218   : > { %v751_v38 = vpop.trf.xlu1  ;;  %v719_v39 = vpop.trf.xlu0 }
 0x219   : > { %782 = vst [vmem:[#allocation2 + $0xf8] sm:$0xff] %v751_v38  ;;  %781 = vst [vmem:[#allocation2 + $0xa0] sm:$0xff] %v719_v39 }
 0x21c   : > { %v752_v40 = vpop.trf.xlu1  ;;  %v720_v41 = vpop.trf.xlu0 }
 0x21d   : > { %784 = vst [vmem:[#allocation2 + $0x98] sm:$0xff] %v752_v40  ;;  %783 = vst [vmem:[#allocation2 + $0x20] sm:$0xff] %v720_v41 }
 0x21e PF: > { %v850_v42 = vld [vmem:[#allocation10 + $0x168] sm:$0xff]  ;;  %v849_v43 = vld [vmem:[#allocation10 + $0x150] sm:$0xff]  ;;  %s4563_s18 = sshll.u32 %s5953_s27, 7  ;;  %v848_v44 = vld [vmem:[#allocation10 + $0x138] sm:$0xff]  ;;  %v8924_v7 = vmov 0.0   ;;  %vm1041_vm0 = vcmask 261120  }
 0x21f   : > { %5022 = vmatprep.subr.mxu0 %v850_v42  ;;  %s6369_s17 = scalar_lea.vmem %s6205_s16, %s4563_s18 [#allocation5]  ;;  %v847_v45 = vld [vmem:[#allocation10 + $0x120] sm:$0xff]  ;;  %v846_v47 = vld [vmem:[#allocation10 + $0x108] sm:$0xff]  ;;  %v845_v48 = vld [vmem:[#allocation10 + $0xf0] sm:$0xff]  ;;  %1154 = vmatprep.mubr.f32.mxu1 %v8924_v7  ;;  %s5981_s21 = smov 96   ;;  %vm2494_vm1 = vcmask 523520   ;;  %vm3337_vm2 = vcmask 785920  }
 0x220   : > { %5023 = vmatpush3.msra.mxu0 %v850_v42  ;;  %v819_v46 = vld [vmem:[%s6369_s17] sm:$0xff]  ;;  %v1040_v50 = vld [vmem:[#allocation2 + $0x48] sm:$0xff]  ;;  %v841_v53 = vld [vmem:[#allocation10 + $0x90] sm:$0xff]  ;;  %s5982_s12 = smov 64   ;;  %s5983_s4 = smov 32   ;;  %vm4180_vm3 = vcmask 1048320  }
 0x221   : > { %5024 = vmatprep.subr.mxu0 %v849_v43  ;;  %5054 = vmatprep.mubr.f32.mxu0 %v819_v46  ;;  %v844_v49 = vld [vmem:[#allocation10 + $0xd8] sm:$0xff]  ;;  %v843_v51 = vld [vmem:[#allocation10 + $0xc0] sm:$0xff]  ;;  %v842_v52 = vld [vmem:[#allocation10 + $0xa8] sm:$0xff]  ;;  %s9454_s29 = sld [smem:[#allocation154_spill]]  ;;  %s4631_s2 = sshll.u32 %s5953_s27, 4 }
 0x222   : > { %5025 = vmatpush3.msra.mxu0 %v849_v43  ;;  %1114 = vmatprep.subr.mxu1 %v1040_v50  ;;  %v840_v54 = vld [vmem:[#allocation10 + $0x78] sm:$0xff]  ;;  %v839_v55 = vld [vmem:[#allocation10 + $0x60] sm:$0xff]  ;;  %v838_v56 = vld [vmem:[#allocation10 + $0x48] sm:$0xff]  ;;  %s9455_s19 = sld [smem:[#allocation21_spill]]  ;;  %s8844_s27 = scalar_lea.sflag [#allocation7], %s348_s14 }
 0x223   : > { %5026 = vmatprep.subr.mxu0 %v848_v44  ;;  %v837_v57 = vld [vmem:[#allocation10 + $0x30] sm:$0xff]  ;;  %v836_v58 = vld [vmem:[#allocation10 + $0x18] sm:$0xff]  ;;  %v835_v59 = vld [vmem:[#allocation10] sm:$0xff]  ;;  %s9456_s26 = sld [smem:[#allocation23_spill]]  ;;  %s5984_s10 = smov [#allocation13]  }
 0x224   : > { %5027 = vmatpush3.msra.mxu0 %v848_v44  ;;  %v820_v60 = vld [vmem:[%s6369_s17 + $0x8] sm:$0xff]  ;;  %v821_v61 = vld [vmem:[%s6369_s17 + $0x10] sm:$0xff]  ;;  %v822_v62 = vld [vmem:[%s6369_s17 + $0x18] sm:$0xff]  ;;  %s9457_s11 = sld [smem:[#allocation155_spill]]  ;;  %s5841_s24 = sshll.u32 %s5984_s10, 4  ;;  %s5842_s24 = int_to_ptr.vmem [resolvable:$false] %s5841_s24 }
 0x225   : > { %5028 = vmatprep.subr.mxu0 %v847_v45  ;;  %v823_v63 = vld [vmem:[%s6369_s17 + $0x20] sm:$0xff]  ;;  %v824_v0 = vld [vmem:[%s6369_s17 + $0x28] sm:$0xff]  ;;  %v825_v1 = vld [vmem:[%s6369_s17 + $0x30] sm:$0xff] }
 0x226   : > { %5029 = vmatpush3.msra.mxu0 %v847_v45  ;;  %v826_v2 = vld [vmem:[%s6369_s17 + $0x38] sm:$0xff]  ;;  %v827_v3 = vld [vmem:[%s6369_s17 + $0x40] sm:$0xff]  ;;  %v828_v4 = vld [vmem:[%s6369_s17 + $0x48] sm:$0xff] }
 0x227   : > { %5030 = vmatprep.subr.mxu0 %v846_v47  ;;  %v829_v5 = vld [vmem:[%s6369_s17 + $0x50] sm:$0xff]  ;;  %v830_v8 = vld [vmem:[%s6369_s17 + $0x58] sm:$0xff]  ;;  %v831_v9 = vld [vmem:[%s6369_s17 + $0x60] sm:$0xff] }
 0x228   : > { %5031 = vmatpush3.msra.mxu0 %v846_v47  ;;  %v832_v10 = vld [vmem:[%s6369_s17 + $0x68] sm:$0xff]  ;;  %v833_v11 = vld [vmem:[%s6369_s17 + $0x70] sm:$0xff]  ;;  %v834_v12 = vld [vmem:[%s6369_s17 + $0x78] sm:$0xff]  ;;  %s4632_s16 = sshll.u32 %s9455_s19, 5 }
 0x229   : > { %5032 = vmatprep.subr.mxu0 %v845_v48  ;;  %v1039_v13 = vld [vmem:[#allocation2 + $0x30] sm:$0xff]  ;;  %v1038_v14 = vld [vmem:[#allocation2 + $0x68] sm:$0xff]  ;;  %v1036_v16 = vld [vmem:[#allocation2 + $0x18] sm:$0xff]  ;;  %s4410_s5 = sadd.s32 %s4632_s16, %s4631_s2  ;;  %p9458_p13 = scmp.ne.s32.totalorder %s9456_s26, 0 }
 0x22a   : > { %5033 = vmatpush3.msra.mxu0 %v845_v48  ;;  %1115 = vmatpush1.msra.mxu1 %v1039_v13  ;;  %v1037_v15 = vld [vmem:[#allocation2 + $0x50] sm:$0xff]  ;;  %v1035_v6 = vld [vmem:[#allocation2 + $0xd8] sm:$0xff]  ;;  %v1034_v17 = vld [vmem:[#allocation2] sm:$0xff]  ;;  %s4633_s0 = sshll.u32 %s4410_s5, 7 }
 0x22b   : > { %5034 = vmatprep.subr.mxu0 %v844_v49  ;;  %1116 = vmatprep.subr.mxu1 %v1038_v14  ;;  %v1033_v18 = vld [vmem:[#allocation2 + $0xb0] sm:$0xff]  ;;  %v6391_v19 = vld [vmem:[%s8907_s3] ss:$0 sm:$0xff]  ;;  %v6510_v13 = vld [vmem:[#allocation3 + $0x98] sm:$0xff]  ;;  %s8836_s18 = scalar_lea.hbm %s9457_s11, %s4633_s0 }
 0x22c   : > { %5035 = vmatpush3.msra.mxu0 %v844_v49  ;;  %1117 = vmatpush1.msra.mxu1 %v1037_v15  ;;  %v6512_v14 = vld [vmem:[#allocation3 + $0x68] sm:$0xff] }
 0x22d   : > { %5036 = vmatprep.subr.mxu0 %v843_v51  ;;  %1118 = vmatprep.subr.mxu1 %v1036_v16  ;;  %v6514_v15 = vld [vmem:[#allocation3 + $0x28] sm:$0xff]  ;;  %v6517_v16 = vld [vmem:[#allocation3 + $0x18] sm:$0xff] }
 0x22e   : > { %5037 = vmatpush3.msra.mxu0 %v843_v51  ;;  %1119 = vmatpush1.msra.mxu1 %v1035_v6 }
 0x22f   : > { %5038 = vmatprep.subr.mxu0 %v842_v52  ;;  %1120 = vmatprep.subr.mxu1 %v1034_v17  ;;  %v6523_v17 = vld [vmem:[#allocation3] sm:$0xff] }
 0x230   : > { %5039 = vmatpush3.msra.mxu0 %v842_v52  ;;  %1121 = vmatpush1.msra.mxu1 %v1033_v18  ;;  %v6527_v18 = vld [vmem:[#allocation3 + $0x60] sm:$0xff] }
 0x231   : > { %5040 = vmatprep.subr.mxu0 %v841_v53  ;;  %5166 = vmatprep.subr.mxu1 %v6510_v13 }
 0x232   : > { %5041 = vmatpush3.msra.mxu0 %v841_v53 }
 0x233   : > { %5042 = vmatprep.subr.mxu0 %v840_v54 }
 0x234   : > { %5043 = vmatpush3.msra.mxu0 %v840_v54 }
 0x235   : > { %5044 = vmatprep.subr.mxu0 %v839_v55 }
 0x236   : > { %5045 = vmatpush3.msra.mxu0 %v839_v55 }
 0x237   : > { %5046 = vmatprep.subr.mxu0 %v838_v56 }
 0x238   : > { %5047 = vmatpush3.msra.mxu0 %v838_v56 }
 0x239   : > { %5048 = vmatprep.subr.mxu0 %v837_v57 }
 0x23a   : > { %5049 = vmatpush3.msra.mxu0 %v837_v57 }
 0x23b   : > { %5050 = vmatprep.subr.mxu0 %v836_v58 }
 0x23c   : > { %5051 = vmatpush3.msra.mxu0 %v836_v58 }
 0x23d   : > { %5052 = vmatprep.subr.mxu0 %v835_v59 }
 0x23e   : > { %5053 = vmatpush3.msra.mxu0 %v835_v59 }
 0x23f   : > { %5055 = vmatmul.mubr.f32.vlgmr.msra.gmra.mxu0 %v820_v60  ;;  %4670 = vmatprep.subr.mxu0 %v6510_v13 }
 0x240   : > { %5057 = vmatprep.mubr.f32.mxu0 %v821_v61  ;;  %4671 = vmatpush3.msra.mxu0 %v6512_v14 }
 0x241   : > { %4672 = vmatprep.subr.mxu0 %v6514_v15 }
 0x242   : > { %4673 = vmatpush3.msra.mxu0 %v6517_v16 }
 0x243   : > { %5058 = vmatmul.mubr.f32.gmra.mxu0 %v822_v62  ;;  %4674 = vmatprep.subr.mxu0 %v6523_v17 }
 0x244   : > { %5060 = vmatprep.mubr.f32.mxu0 %v823_v63  ;;  %4675 = vmatpush3.msra.mxu0 %v6527_v18 }
 0x247   : > { %5061 = vmatmul.mubr.f32.gmra.mxu0 %v824_v0 }
 0x248   : > { %5063 = vmatprep.mubr.f32.mxu0 %v825_v1 }
 0x24b   : > { %5064 = vmatmul.mubr.f32.gmra.mxu0 %v826_v2 }
 0x24c   : > { %5066 = vmatprep.mubr.f32.mxu0 %v827_v3 }
 0x24f   : > { %5067 = vmatmul.mubr.f32.gmra.mxu0 %v828_v4 }
 0x250   : > { %5069 = vmatprep.mubr.f32.mxu0 %v829_v5 }
 0x253   : > { %5070 = vmatmul.mubr.f32.gmra.mxu0 %v830_v8 }
 0x254   : > { %5072 = vmatprep.mubr.f32.mxu0 %v831_v9 }
 0x257   : > { %5073 = vmatmul.mubr.f32.gmra.mxu0 %v832_v10 }
 0x258   : > { %5075 = vmatprep.mubr.f32.mxu0 %v833_v11 }
 0x25b   : > { %5076 = vmatmul.mubr.f32.gmra.mxu0 %v834_v12 }
 0x2ff   : > { %v5056_v20 = vpop.f32.mrf.mxu0 }
 0x300   : > { %v930_v21 = vadd.f32 %v5056_v20, %v6391_v19  ;;  %v6533_v20 = vld [vmem:[#allocation3 + $0xb8] sm:$0xff] }
 0x301   : > { %v924_v22 = vpop.f32.mrf.mxu0  ;;  %4676 = vmatprep.subr.mxu0 %v6533_v20 }
 0x302   : > { %v1004_v23 = vmul.f32 0.17677669, %v930_v21  ;;  %v925_v24 = vadd.f32 %v6391_v19, %v924_v22  ;;  %v6537_v21 = vld [vmem:[#allocation3 + $0xe0] sm:$0xff] }
 0x303   : > { %v5059_v25 = vpop.f32.mrf.mxu0  ;;  %4677 = vmatpush3.msra.mxu0 %v6537_v21 }
 0x304   : > { %v1003_v26 = vmul.f32 0.17677669, %v925_v24  ;;  %1678 = vrot.lane.b32.xlu0 %v1004_v23, %s5981_s21  ;;  %v940_v30 = vadd.f32 %v5059_v25, %v6391_v19  ;;  %v6547_v24 = vld [vmem:[#allocation3 + $0x40] sm:$0xff] }
 0x305   : > { %v934_v27 = vpop.f32.mrf.mxu0 }
 0x306   : > { %1676 = vrot.lane.b32.xlu1 %v1003_v26, %s5981_s21  ;;  %4565 = vmatmul.mubr.msk.f32.vlgmr.msra.gmra.mxu1 %vm1041_vm0, %v1003_v26  ;;  %v935_v28 = vadd.f32 %v6391_v19, %v934_v27  ;;  %v1006_v33 = vmul.f32 0.17677669, %v940_v30  ;;  %v6557_v27 = vld [vmem:[#allocation3 + $0x38] sm:$0xff]  ;;  %v6567_v30 = vld [vmem:[#allocation3 + $0xb0] sm:$0xff] }
 0x307   : > { %1160 = vmatprep.mubr.f32.mxu1 %v8924_v7  ;;  %v5062_v29 = vpop.f32.mrf.mxu0  ;;  %5182 = vmatpush3.msra.mxu1 %v6512_v14 }
 0x308   : > { %2521 = vrot.lane.b32.xlu0 %v1004_v23, %s5982_s12  ;;  %v1005_v31 = vmul.f32 0.17677669, %v935_v28  ;;  %v950_v36 = vadd.f32 %v5062_v29, %v6391_v19  ;;  %5167 = vmatprep.subr.mxu1 %v6514_v15  ;;  %v6563_v29 = vld [vmem:[#allocation3 + $0x48] sm:$0xff] }
 0x309   : > { %v944_v32 = vpop.f32.mrf.mxu0  ;;  %5183 = vmatpush3.msra.mxu1 %v6517_v16 }
 0x30a   : > { %2519 = vrot.lane.b32.xlu1 %v1003_v26, %s5982_s12  ;;  %4566 = vmatmul.mubr.msk.f32.gmra.mxu1 %vm1041_vm0, %v1004_v23  ;;  %v945_v34 = vadd.f32 %v6391_v19, %v944_v32  ;;  %v1008_v39 = vmul.f32 0.17677669, %v950_v36  ;;  %v6573_v32 = vld [vmem:[#allocation3 + $0x88] sm:$0xff] }
 0x30b   : > { %1166 = vmatprep.mubr.f32.mxu1 %v8924_v7  ;;  %v5065_v35 = vpop.f32.mrf.mxu0  ;;  %5168 = vmatprep.subr.mxu1 %v6523_v17  ;;  %v6587_v36 = vld [vmem:[#allocation3 + $0xa8] sm:$0xff] }
 0x30c   : > { %3364 = vrot.lane.b32.xlu0 %v1004_v23, %s5983_s4  ;;  %v1007_v37 = vmul.f32 0.17677669, %v945_v34  ;;  %v960_v42 = vadd.f32 %v5065_v35, %v6391_v19  ;;  %5184 = vmatpush3.msra.mxu1 %v6527_v18  ;;  %v6543_v23 = vld [vmem:[#allocation3 + $0xc0] sm:$0xff]  ;;  %v6583_v35 = vld [vmem:[#allocation3 + $0xf0] sm:$0xff] }
 0x30d   : > { %v954_v38 = vpop.f32.mrf.mxu0  ;;  %5169 = vmatprep.subr.mxu1 %v6533_v20  ;;  %4678 = vmatprep.subr.mxu0 %v6543_v23  ;;  %9059 = vst [vmem:[#allocation28_spill] sm:$0xff] %v6583_v35 }
 0x30e   : > { %3362 = vrot.lane.b32.xlu1 %v1003_v26, %s5983_s4  ;;  %4567 = vmatmul.mubr.msk.f32.gmra.mxu1 %vm1041_vm0, %v1005_v31  ;;  %v955_v40 = vadd.f32 %v6391_v19, %v954_v38  ;;  %v1010_v45 = vmul.f32 0.17677669, %v960_v42  ;;  %v6553_v26 = vld [vmem:[#allocation3 + $0xf8] sm:$0xff]  ;;  %v6593_v38 = vld [vmem:[#allocation3 + $0x20] sm:$0xff]  ;;  %v6607_v42 = vld [vmem:[#allocation3 + $0x90] sm:$0xff] }
 0x30f   : > { %1172 = vmatprep.mubr.f32.mxu1 %v8924_v7  ;;  %v5068_v41 = vpop.f32.mrf.mxu0  ;;  %5185 = vmatpush3.msra.mxu1 %v6537_v21  ;;  %9060 = vst [vmem:[#allocation29_spill] sm:$0xff] %v6607_v42 }
 0x310   : > { %2525 = vrot.lane.b32.xlu0 %v1006_v33, %s5982_s12  ;;  %v1009_v43 = vmul.f32 0.17677669, %v955_v40  ;;  %v970_v48 = vadd.f32 %v5068_v41, %v6391_v19  ;;  %5170 = vmatprep.subr.mxu1 %v6543_v23  ;;  %v6603_v41 = vld [vmem:[#allocation3 + $0x30] sm:$0xff] }
 0x311   : > { %v964_v44 = vpop.f32.mrf.mxu0  ;;  %5186 = vmatpush3.msra.mxu1 %v6547_v24  ;;  %4679 = vmatpush3.msra.mxu0 %v6547_v24 }
 0x312   : > { %1682 = vrot.lane.b32.xlu1 %v1006_v33, %s5981_s21  ;;  %4568 = vmatmul.mubr.msk.f32.gmra.mxu1 %vm1041_vm0, %v1006_v33  ;;  %v965_v46 = vadd.f32 %v6391_v19, %v964_v44  ;;  %v1012_v51 = vmul.f32 0.17677669, %v970_v48  ;;  %v6613_v44 = vld [vmem:[#allocation3 + $0xd8] sm:$0xff] }
 0x313   : > { %1178 = vmatprep.mubr.f32.mxu1 %v8924_v7  ;;  %v5071_v47 = vpop.f32.mrf.mxu0  ;;  %5171 = vmatprep.subr.mxu1 %v6553_v26  ;;  %9061 = vst [vmem:[#allocation30_spill] sm:$0xff] %v6613_v44 }
 0x314   : > { %3368 = vrot.lane.b32.xlu0 %v1006_v33, %s5983_s4  ;;  %v1011_v49 = vmul.f32 0.17677669, %v965_v46  ;;  %v980_v54 = vadd.f32 %v5071_v47, %v6391_v19  ;;  %4680 = vmatprep.subr.mxu0 %v6553_v26  ;;  %v6577_v33 = vld [vmem:[#allocation3 + $0xd0] sm:$0xff] }
 0x315   : > { %v974_v50 = vpop.f32.mrf.mxu0  ;;  %5187 = vmatpush3.msra.mxu1 %v6557_v27  ;;  %4681 = vmatpush3.msra.mxu0 %v6557_v27 }
 0x316   : > { %1680 = vrot.lane.b32.xlu1 %v1005_v31, %s5981_s21  ;;  %4569 = vmatmul.mubr.msk.f32.gmra.mxu1 %vm1041_vm0, %v1007_v37  ;;  %v975_v52 = vadd.f32 %v6391_v19, %v974_v50  ;;  %v1014_v57 = vmul.f32 0.17677669, %v980_v54  ;;  %v1023_v50 = vlaneseq }
 0x317   : > { %1184 = vmatprep.mubr.f32.mxu1 %v8924_v7  ;;  %v5074_v53 = vpop.f32.mrf.mxu0  ;;  %5172 = vmatprep.subr.mxu1 %v6563_v29 }
 0x318   : > { %1686 = vrot.lane.b32.xlu0 %v1008_v39, %s5981_s21  ;;  %v1013_v55 = vmul.f32 0.17677669, %v975_v52  ;;  %v990_v60 = vadd.f32 %v5074_v53, %v6391_v19  ;;  %4682 = vmatprep.subr.mxu0 %v6563_v29 }
 0x319   : > { %v984_v56 = vpop.f32.mrf.mxu0  ;;  %5188 = vmatpush3.msra.mxu1 %v6567_v30  ;;  %4683 = vmatpush3.msra.mxu0 %v6567_v30 }
 0x31a   : > { %2523 = vrot.lane.b32.xlu1 %v1005_v31, %s5982_s12  ;;  %4570 = vmatmul.mubr.msk.f32.gmra.mxu1 %vm1041_vm0, %v1008_v39  ;;  %v985_v58 = vadd.f32 %v6391_v19, %v984_v56  ;;  %v1016_v63 = vmul.f32 0.17677669, %v990_v60 }
 0x31b   : > { %1190 = vmatprep.mubr.f32.mxu1 %v8924_v7  ;;  %v5077_v59 = vpop.f32.mrf.mxu0  ;;  %5173 = vmatprep.subr.mxu1 %v6573_v32 }
 0x31c   : > { %2529 = vrot.lane.b32.xlu0 %v1008_v39, %s5982_s12  ;;  %v1015_v61 = vmul.f32 0.17677669, %v985_v58  ;;  %v1000_v1 = vadd.f32 %v5077_v59, %v6391_v19  ;;  %4684 = vmatprep.subr.mxu0 %v6573_v32 }
 0x31d   : > { %v994_v62 = vpop.f32.mrf.mxu0  ;;  %5189 = vmatpush3.msra.mxu1 %v6577_v33  ;;  %4685 = vmatpush3.msra.mxu0 %v6577_v33 }
 0x31e   : > { %3366 = vrot.lane.b32.xlu1 %v1005_v31, %s5983_s4  ;;  %4571 = vmatmul.mubr.msk.f32.gmra.mxu1 %vm1041_vm0, %v1009_v43  ;;  %v995_v0 = vadd.f32 %v6391_v19, %v994_v62  ;;  %v6472_v3 = vmul.f32 0.17677669, %v1000_v1 }
 0x31f   : > { %1196 = vmatprep.mubr.f32.mxu1 %v8924_v7  ;;  %5174 = vmatprep.subr.mxu1 %v6583_v35 }
 0x320   : > { %3372 = vrot.lane.b32.xlu0 %v1008_v39, %s5983_s4  ;;  %v6465_v2 = vmul.f32 0.17677669, %v995_v0  ;;  %v6597_v39 = vld [vmem:[#allocation3 + $0x58] sm:$0xff]  ;;  %4686 = vmatprep.subr.mxu0 %v6583_v35 }
 0x321   : > { %5190 = vmatpush3.msra.mxu1 %v6587_v36  ;;  %4687 = vmatpush3.msra.mxu0 %v6587_v36 }
 0x322   : > { %1684 = vrot.lane.b32.xlu1 %v1007_v37, %s5981_s21  ;;  %4572 = vmatmul.mubr.msk.f32.gmra.mxu1 %vm1041_vm0, %v1010_v45 }
 0x323   : > { %1202 = vmatprep.mubr.f32.mxu1 %v8924_v7  ;;  %5175 = vmatprep.subr.mxu1 %v6593_v38 }
 0x324   : > { %1690 = vrot.lane.b32.xlu0 %v1010_v45, %s5981_s21  ;;  %4688 = vmatprep.subr.mxu0 %v6593_v38 }
 0x325   : > { %5191 = vmatpush3.msra.mxu1 %v6597_v39  ;;  %4689 = vmatpush3.msra.mxu0 %v6597_v39 }
 0x326   : > { %2527 = vrot.lane.b32.xlu1 %v1007_v37, %s5982_s12  ;;  %4573 = vmatmul.mubr.msk.f32.gmra.mxu1 %vm1041_vm0, %v1011_v49 }
 0x327   : > { %1208 = vmatprep.mubr.f32.mxu1 %v8924_v7  ;;  %5176 = vmatprep.subr.mxu1 %v6603_v41 }
 0x328   : > { %2533 = vrot.lane.b32.xlu0 %v1010_v45, %s5982_s12  ;;  %4690 = vmatprep.subr.mxu0 %v6603_v41 }
 0x329   : > { %5192 = vmatpush3.msra.mxu1 %v6607_v42  ;;  %4691 = vmatpush3.msra.mxu0 %v6607_v42 }
 0x32a   : > { %3370 = vrot.lane.b32.xlu1 %v1007_v37, %s5983_s4  ;;  %4574 = vmatmul.mubr.msk.f32.gmra.mxu1 %vm1041_vm0, %v1012_v51 }
 0x32b   : > { %1214 = vmatprep.mubr.f32.mxu1 %v8924_v7  ;;  %5177 = vmatprep.subr.mxu1 %v6613_v44 }
 0x32c   : > { %3376 = vrot.lane.b32.xlu0 %v1010_v45, %s5983_s4  ;;  %v6617_v45 = vld [vmem:[#allocation3 + $0x8] sm:$0xff]  ;;  %4692 = vmatprep.subr.mxu0 %v6613_v44 }
 0x32d   : > { %9062 = vst [vmem:[#allocation31_spill] sm:$0xff] %v6617_v45  ;;  %5193 = vmatpush3.msra.mxu1 %v6617_v45  ;;  %4693 = vmatpush3.msra.mxu0 %v6617_v45 }
 0x32e   : > { %1688 = vrot.lane.b32.xlu1 %v1009_v43, %s5981_s21  ;;  %4575 = vmatmul.mubr.msk.f32.gmra.mxu1 %vm1041_vm0, %v1013_v55 }
 0x32f   : > { %1220 = vmatprep.mubr.f32.mxu1 %v8924_v7 }
 0x330   : > { %1694 = vrot.lane.b32.xlu0 %v1012_v51, %s5981_s21 }
 0x332   : > { %2531 = vrot.lane.b32.xlu1 %v1009_v43, %s5982_s12  ;;  %4576 = vmatmul.mubr.msk.f32.gmra.mxu1 %vm1041_vm0, %v1014_v57 }
 0x333   : > { %1226 = vmatprep.mubr.f32.mxu1 %v8924_v7 }
 0x334   : > { %2537 = vrot.lane.b32.xlu0 %v1012_v51, %s5982_s12 }
 0x336   : > { %3374 = vrot.lane.b32.xlu1 %v1009_v43, %s5983_s4  ;;  %4577 = vmatmul.mubr.msk.f32.gmra.mxu1 %vm1041_vm0, %v1015_v61 }
 0x337   : > { %1232 = vmatprep.mubr.f32.mxu1 %v8924_v7 }
 0x338   : > { %3380 = vrot.lane.b32.xlu0 %v1012_v51, %s5983_s4  ;;  %v1019_v51 = vld [vmem:[%s6212_s13] sm:$0x3]  ;;  %s4413_s13 = sshll.u32 %s6229_s9, 4  ;;  %s8838_s13 = int_to_ptr.vmem [resolvable:$true] %s4413_s13 }
 0x339   : > { %v1020_v54 = vsub.f32 1.0, %v1019_v51  ;;  %s5837_s17 = scalar_lea.vmem %s8838_s13, 2048  ;;  %p5844_p12 = scmp.lt.s32.totalorder %s8838_s13, %s5842_s24 }
 0x33a   : > { %1692 = vrot.lane.b32.xlu1 %v1011_v49, %s5981_s21  ;;  %4578 = vmatmul.mubr.msk.f32.gmra.mxu1 %vm1041_vm0, %v1016_v63  ;;  %p5838_p0 = scmp.ne.s32.totalorder %s8838_s13, %s5837_s17 }
 0x33b   : > { %1238 = vmatprep.mubr.f32.mxu1 %v8924_v7  ;;  %v1021_v58 = vmul.f32 -10000.0, %v1020_v54 }
 0x33c   : > { %1698 = vrot.lane.b32.xlu0 %v1014_v57, %s5981_s21  ;;  %p5839_p8 = pnand %p5838_p0, %p9458_p13 }
 0x33e   : > { %2535 = vrot.lane.b32.xlu1 %v1011_v49, %s5982_s12  ;;  %4579 = vmatmul.mubr.msk.f32.gmra.mxu1 %vm1041_vm0, %v6465_v2  ;;  %p5840_p10 = pneg %p5839_p8 }
 0x33f   : > { %1244 = vmatprep.mubr.f32.mxu1 %v8924_v7 }
 0x340   : > { %2541 = vrot.lane.b32.xlu0 %v1014_v57, %s5982_s12 }
 0x342   : > { %3378 = vrot.lane.b32.xlu1 %v1011_v49, %s5983_s4  ;;  %4580 = vmatmul.mubr.msk.f32.gmra.mxu1 %vm1041_vm0, %v6472_v3 }
 0x344   : > { %3384 = vrot.lane.b32.xlu0 %v1014_v57, %s5983_s4 }
 0x346   : > { %1696 = vrot.lane.b32.xlu1 %v1013_v55, %s5981_s21 }
 0x348   : > { %1702 = vrot.lane.b32.xlu0 %v1016_v63, %s5981_s21 }
 0x34a   : > { %2539 = vrot.lane.b32.xlu1 %v1013_v55, %s5982_s12 }
 0x34c   : > { %2545 = vrot.lane.b32.xlu0 %v1016_v63, %s5982_s12 }
 0x34e   : > { %3382 = vrot.lane.b32.xlu1 %v1013_v55, %s5983_s4  ;;  %v1024_v55 = vshrl.u32 %v1023_v50, 7 }
 0x350   : > { %3388 = vrot.lane.b32.xlu0 %v1016_v63, %s5983_s4  ;;  %v1025_v59 = vsub.s32 0, %v1024_v55  ;;  %v1029_v60 = vsub.s32 1, %v1024_v55 }
 0x352   : > { %1700 = vrot.lane.b32.xlu1 %v1015_v61, %s5981_s21  ;;  %v6645_v63 = vrot.slane %v1021_v58, %v1025_v59  ;;  %v6647_v0 = vrot.slane %v1021_v58, %v1029_v60 }
 0x354   : > { %1706 = vrot.lane.b32.xlu0 %v6472_v3, %s5981_s21  ;;  %9063 = vst [vmem:[#allocation32_spill] sm:$0xff] %v6645_v63  ;;  %9064 = vst [vmem:[#allocation33_spill] sm:$0xff] %v6647_v0 }
 0x356   : > { %2543 = vrot.lane.b32.xlu1 %v1015_v61, %s5982_s12 }
 0x358   : > { %2549 = vrot.lane.b32.xlu0 %v6472_v3, %s5982_s12 }
 0x35a   : > { %3386 = vrot.lane.b32.xlu1 %v1015_v61, %s5983_s4 }
 0x35e   : > { %1704 = vrot.lane.b32.xlu1 %v6465_v2, %s5981_s21 }
 0x362   : > { %2547 = vrot.lane.b32.xlu1 %v6465_v2, %s5982_s12 }
 0x3c6   : > { %v6496_v4 = vpop.f32.mrf.mxu1 }
 0x3c8   : > { %v6498_v5 = vpop.f32.mrf.mxu1 }
 0x3ca   : > { %v6500_v8 = vpop.f32.mrf.mxu1 }
 0x3cc   : > { %v6502_v9 = vpop.f32.mrf.mxu1 }
 0x3ce   : > { %v6504_v10 = vpop.f32.mrf.mxu1 }
 0x3d0   : > { %v6506_v11 = vpop.f32.mrf.mxu1 }
 0x3d2   : > { %v6508_v12 = vpop.f32.mrf.mxu1 }
 0x3d4   : > { %v6520_v6 = vpop.f32.mrf.mxu1 }
 0x3d6   : > { %v6530_v19 = vpop.f32.mrf.mxu1 }
 0x3d8   : > { %v6540_v22 = vpop.f32.mrf.mxu1 }
 0x3da   : > { %v6550_v25 = vpop.f32.mrf.mxu1 }
 0x3dc   : > { %v6560_v28 = vpop.f32.mrf.mxu1 }
 0x3de   : > { %v6570_v31 = vpop.f32.mrf.mxu1 }
 0x3e0   : > { %v6580_v34 = vpop.f32.mrf.mxu1 }
 0x3e2   : > { %v6590_v37 = vpop.f32.mrf.mxu1 }
 0x3e4   : > { %v6600_v40 = vpop.f32.mrf.mxu1 }
 0x3e6   : > { %v6610_v43 = vpop.f32.mrf.mxu1 }
 0x3e8   : > { %v6620_v46 = vpop.f32.mrf.mxu1 }
 0x3ea   : > { %v6626_v47 = vpop.f32.mrf.mxu1 }
 0x3ec   : > { %v6630_v48 = vpop.f32.mrf.mxu1 }
 0x3ee   : > { %v6632_v49 = vpop.f32.mrf.mxu1 }
 0x3f0   : > { %v6635_v52 = vpop.f32.mrf.mxu1 }
 0x3f2   : > { %v6637_v53 = vpop.f32.mrf.mxu1 }
 0x3f4   : > { %v6639_v56 = vpop.f32.mrf.mxu1 }
 0x3f6   : > { %v6641_v57 = vpop.f32.mrf.mxu1 }
 0x3f8   : > { %v6643_v61 = vpop.f32.mrf.mxu1 }
 0x3fa   : > { %v1234_v62 = vpop.f32.mrf.mxu1 }
 0x3fb   : > { %v6650_v7 = vadd.f32 %v1234_v62, %v6645_v63  ;;  %v6665_v62 = vpop.permute.xlu1 %1676 }
 0x3fc   : > { %v1236_v1 = vpop.f32.mrf.mxu1  ;;  %9066 = vst [vmem:[#allocation35_spill] sm:$0xff] %v6665_v62  ;;  %v6683_v62 = vld [vmem:[#allocation3 + $0xa0] sm:$0xff] }
 0x3fd   : > { %v6653_v50 = vadd.f32 %v1236_v1, %v6647_v0  ;;  %9071 = vst [vmem:[#allocation40_spill] sm:$0xff] %v6683_v62  ;;  %5178 = vmatprep.subr.mxu1 %v6683_v62  ;;  %4694 = vmatprep.subr.mxu0 %v6683_v62 }
 0x3fe   : > { %v1240_v51 = vpop.f32.mrf.mxu1 }
 0x3ff   : > { %v1290_v54 = vmax.f32 %v6650_v7, %v6653_v50  ;;  %v6658_v55 = vadd.f32 %v1240_v51, %v6645_v63 }
 0x400   : > { %v1242_v44 = vpop.f32.mrf.mxu1 }
 0x401   : > { %v6661_v59 = vadd.f32 %v1242_v44, %v6647_v0  ;;  %1291 = vmax.xlane.f32.xlu0 %v1290_v54  ;;  %v6675_v44 = vpop.permute.xlu0 %1678  ;;  %v6677_v54 = vpop.permute.xlu1 %2519 }
 0x402   : > { %v1246_v58 = vpop.f32.mrf.mxu1  ;;  %9067 = vst [vmem:[#allocation36_spill] sm:$0xff] %v6675_v44  ;;  %9068 = vst [vmem:[#allocation37_spill] sm:$0xff] %v6677_v54  ;;  %v6705_v54 = vld [vmem:[#allocation3 + $0xc8] sm:$0xff]  ;;  %v6707_v44 = vld [vmem:[#allocation3 + $0x10] sm:$0xff] }
 0x403   : > { %9065 = vst [vmem:[#allocation34_spill] sm:$0xff] %v6661_v59  ;;  %v1293_v60 = vmax.f32 %v6658_v55, %v6661_v59  ;;  %v6668_v45 = vadd.f32 %v1246_v58, %v6645_v63  ;;  %v6685_v58 = vld [vmem:[#allocation3 + $0x78] sm:$0xff]  ;;  %9078 = vst [vmem:[#allocation47_spill] sm:$0xff] %v6705_v54 }
 0x404   : > { %v1248_v1 = vpop.f32.mrf.mxu1  ;;  %9072 = vst [vmem:[#allocation41_spill] sm:$0xff] %v6685_v58  ;;  %5194 = vmatpush3.msra.mxu1 %v6685_v58  ;;  %4695 = vmatpush3.msra.mxu0 %v6685_v58  ;;  %9079 = vst [vmem:[#allocation48_spill] sm:$0xff] %v6707_v44 }
 0x405   : > { %v6671_v35 = vadd.f32 %v1248_v1, %v6647_v0  ;;  %1294 = vmax.xlane.f32.xlu0 %v1293_v60  ;;  %v6679_v42 = vpop.permute.xlu0 %2521  ;;  %v6681_v59 = vpop.permute.xlu1 %3362  ;;  %v6693_v1 = vld [vmem:[#allocation3 + $0x50] sm:$0xff] }
 0x406   : > { %9069 = vst [vmem:[#allocation38_spill] sm:$0xff] %v6679_v42  ;;  %9070 = vst [vmem:[#allocation39_spill] sm:$0xff] %v6681_v59  ;;  %5179 = vmatprep.subr.mxu1 %v6693_v1  ;;  %4696 = vmatprep.subr.mxu0 %v6693_v1  ;;  %v6703_v42 = vld [vmem:[#allocation3 + $0x70] sm:$0xff] }
 0x407   : > { %v1296_v51 = vmax.f32 %v6668_v45, %v6671_v35  ;;  %9074 = vst [vmem:[#allocation43_spill] sm:$0xff] %v6693_v1  ;;  %9077 = vst [vmem:[#allocation46_spill] sm:$0xff] %v6703_v42 }
 0x409   : > { %1297 = vmax.xlane.f32.xlu1 %v1296_v51  ;;  %v6691_v60 = vpop.permute.xlu0 %3364  ;;  %v6695_v51 = vld [vmem:[#allocation3 + $0xe8] sm:$0xff]  ;;  %v6699_v59 = vpop.permute.xlu1 %1682 }
 0x40a   : > { %9073 = vst [vmem:[#allocation42_spill] sm:$0xff] %v6691_v60  ;;  %9075 = vst [vmem:[#allocation44_spill] sm:$0xff] %v6695_v51  ;;  %5195 = vmatpush3.msra.mxu1 %v6695_v51  ;;  %4697 = vmatpush3.msra.mxu0 %v6695_v51  ;;  %v6710_v60 = vld [vmem:[#allocation3 + $0x80] sm:$0xff] }
 0x40b   : > { %9076 = vst [vmem:[#allocation45_spill] sm:$0xff] %v6699_v59  ;;  %5180 = vmatprep.subr.mxu1 %v6703_v42  ;;  %9080 = vst [vmem:[#allocation49_spill] sm:$0xff] %v6710_v60  ;;  %4698 = vmatprep.subr.mxu0 %v6703_v42  ;;  %v1675_v42 = vld [vmem:[#allocation2 + $0x78] sm:$0xff] }
 0x40c   : > { %5196 = vmatpush3.msra.mxu1 %v6705_v54  ;;  %4699 = vmatpush3.msra.mxu0 %v6705_v54 }
 0x40d   : > { %v6713_v58 = vpop.permute.xlu0 %2525  ;;  %5181 = vmatprep.subr.mxu1 %v6707_v44  ;;  %v6721_v59 = vpop.permute.xlu1 %1680  ;;  %4700 = vmatprep.subr.mxu0 %v6707_v44 }
 0x40e   : > { %9081 = vst [vmem:[#allocation50_spill] sm:$0xff] %v6713_v58  ;;  %9082 = vst [vmem:[#allocation51_spill] sm:$0xff] %v6721_v59  ;;  %5197 = vmatpush3.msra.mxu1 %v6710_v60  ;;  %4701 = vmatpush3.msra.mxu0 %v6710_v60  ;;  %v6745_v60 = vadd.f32 %v6502_v9, %v6647_v0  ;;  %v6767_v9 = vadd.f32 %v6496_v4, %v6645_v63 }
 0x40f   : > { %1764 = vmatprep.subr.mxu1 %v1675_v42  ;;  %v6749_v42 = vadd.f32 %v6500_v8, %v6645_v63  ;;  %v6771_v8 = vadd.f32 %v6504_v10, %v6645_v63  ;;  %v6789_v10 = vadd.f32 %v6508_v12, %v6645_v63 }
 0x411   : > { %v6729_v58 = vpop.permute.xlu1 %2523 }
 0x412   : > { %9084 = vst [vmem:[#allocation53_spill] sm:$0xff] %v6729_v58 }
 0x41a   : > { %3390 = vrot.lane.b32.xlu1 %v6465_v2, %s5983_s4  ;;  %v6727_v2 = vpop.permute.xlu0 %3368 }
 0x41b   : > { %3392 = vrot.lane.b32.xlu0 %v6472_v3, %s5983_s4  ;;  %9083 = vst [vmem:[#allocation52_spill] sm:$0xff] %v6727_v2  ;;  %v6733_v3 = vpop.permute.xlu1 %3366 }
 0x41c   : > { %9085 = vst [vmem:[#allocation54_spill] sm:$0xff] %v6733_v3  ;;  %v6755_v3 = vadd.f32 %v6498_v5, %v6647_v0  ;;  %v6775_v5 = vadd.f32 %v6520_v6, %v6647_v0  ;;  %v6793_v6 = vadd.f32 %v6530_v19, %v6645_v63  ;;  %v6811_v19 = vadd.f32 %v6550_v25, %v6645_v63 }
 0x41e   : > { %v6731_v51 = vpop.permute.xlu0 %1686  ;;  %9089 = vst [vmem:[#allocation58_spill] sm:$0xff] %v6755_v3  ;;  %v1251_v4 = vmax.f32 %v6767_v9, %v6755_v3  ;;  %v6803_v3 = vadd.f32 %v6580_v34, %v6647_v0  ;;  %v1260_v12 = vmax.f32 %v6789_v10, %v6775_v5  ;;  %v6821_v34 = vadd.f32 %v6600_v40, %v6647_v0 }
 0x41f   : > { %v6737_v59 = vpop.permute.xlu1 %1684  ;;  %v6839_v40 = vadd.f32 %v6610_v43, %v6645_v63  ;;  %v6857_v43 = vadd.f32 %v6626_v47, %v6645_v63 }
 0x422   : > { %v6735_v1 = vpop.permute.xlu0 %2529 }
 0x423   : > { %9086 = vst [vmem:[#allocation55_spill] sm:$0xff] %v6735_v1  ;;  %v6741_v54 = vpop.permute.xlu1 %2527  ;;  %v6759_v1 = vadd.f32 %v6506_v11, %v6647_v0  ;;  %v6779_v11 = vadd.f32 %v6540_v22, %v6647_v0 }
 0x424   : > { %9088 = vst [vmem:[#allocation57_spill] sm:$0xff] %v6741_v54 }
 0x425   : > { %9091 = vst [vmem:[#allocation60_spill] sm:$0xff] %v6779_v11 }
 0x426   : > { %v6739_v62 = vpop.permute.xlu0 %3372 }
 0x427   : > { %9087 = vst [vmem:[#allocation56_spill] sm:$0xff] %v6739_v62  ;;  %v1254_v62 = vmax.f32 %v6749_v42, %v6745_v60  ;;  %v6763_v54 = vpop.permute.xlu1 %3370 }
 0x428   : > { %9090 = vst [vmem:[#allocation59_spill] sm:$0xff] %v6763_v54  ;;  %v1257_v54 = vmax.f32 %v6771_v8, %v6759_v1 }
 0x42a   : > { %v6751_v2 = vpop.permute.xlu0 %1690 }
 0x42b   : > { %v6795_v22 = vpop.permute.xlu1 %1688 }
 0x42e   : > { %v6785_v58 = vpop.permute.xlu0 %2533 }
 0x42f   : > { %9092 = vst [vmem:[#allocation61_spill] sm:$0xff] %v6785_v58  ;;  %v1263_v58 = vmax.f32 %v6793_v6, %v6779_v11 }
 0x43a   : > { %1255 = vmax.xlane.f32.xlu0 %v1254_v62  ;;  %v6799_v62 = vadd.f32 %v6560_v28, %v6647_v0  ;;  %v6817_v28 = vpop.permute.xlu0 %3376 }
 0x43b   : > { %9093 = vst [vmem:[#allocation62_spill] sm:$0xff] %v6817_v28 }
 0x43c   : > { %v1266_v25 = vmax.f32 %v6811_v19, %v6799_v62 }
 0x43e   : > { %1258 = vmax.xlane.f32.xlu0 %v1257_v54  ;;  %1252 = vmax.xlane.f32.xlu1 %v1251_v4  ;;  %v6815_v54 = vadd.f32 %v6570_v31, %v6645_v63  ;;  %v6825_v4 = vadd.f32 %v6620_v46, %v6647_v0  ;;  %v6831_v31 = vpop.permute.xlu1 %2531  ;;  %v6843_v46 = vadd.f32 %v6630_v48, %v6647_v0 }
 0x43f   : > { %9095 = vst [vmem:[#allocation64_spill] sm:$0xff] %v6831_v31  ;;  %v6853_v31 = vpop.permute.xlu0 %1694  ;;  %v6861_v48 = vadd.f32 %v6632_v49, %v6645_v63  ;;  %v6879_v49 = vadd.f32 %v6637_v53, %v6645_v63 }
 0x440   : > { %9094 = vst [vmem:[#allocation63_spill] sm:$0xff] %v6825_v4  ;;  %v1269_v11 = vmax.f32 %v6815_v54, %v6803_v3  ;;  %v1278_v47 = vmax.f32 %v6857_v43, %v6843_v46 }
 0x441   : > { %9097 = vst [vmem:[#allocation66_spill] sm:$0xff] %v6861_v48  ;;  %9101 = vst [vmem:[#allocation70_spill] sm:$0xff] %v6879_v49 }
 0x442   : > { %1261 = vmax.xlane.f32.xlu0 %v1260_v12  ;;  %1264 = vmax.xlane.f32.xlu1 %v1263_v58  ;;  %v6835_v58 = vadd.f32 %v6590_v37, %v6645_v63  ;;  %v6847_v12 = vadd.f32 %v6635_v52, %v6647_v0  ;;  %v1275_v37 = vmax.f32 %v6839_v40, %v6825_v4  ;;  %v6863_v52 = vpop.permute.xlu1 %3374 }
 0x443   : > { %9098 = vst [vmem:[#allocation67_spill] sm:$0xff] %v6863_v52 }
 0x444   : > { %9096 = vst [vmem:[#allocation65_spill] sm:$0xff] %v6847_v12  ;;  %v1272_v28 = vmax.f32 %v6835_v58, %v6821_v34  ;;  %v1281_v4 = vmax.f32 %v6861_v48, %v6847_v12 }
 0x446   : > { %1267 = vmax.xlane.f32.xlu0 %v1266_v25  ;;  %1270 = vmax.xlane.f32.xlu1 %v1269_v11  ;;  %v6867_v11 = vadd.f32 %v6639_v56, %v6647_v0  ;;  %v6871_v25 = vadd.f32 %v6643_v61, %v6647_v0  ;;  %v6885_v56 = vpop.permute.xlu0 %2537  ;;  %v6891_v0 = vpop.permute.xlu1 %1692 }
 0x447   : > { %9103 = vst [vmem:[#allocation72_spill] sm:$0xff] %v6885_v56 }
 0x448   : > { %9099 = vst [vmem:[#allocation68_spill] sm:$0xff] %v6867_v11  ;;  %9100 = vst [vmem:[#allocation69_spill] sm:$0xff] %v6871_v25  ;;  %v1284_v61 = vmax.f32 %v6879_v49, %v6867_v11  ;;  %v9122_v49 = vld [vmem:[#allocation34_spill] sm:$0xff] }
 0x44a   : > { %1273 = vmax.xlane.f32.xlu0 %v1272_v28  ;;  %1276 = vmax.xlane.f32.xlu1 %v1275_v37  ;;  %v6883_v28 = vadd.f32 %v6641_v57, %v6645_v63  ;;  %v6893_v53 = vpop.permute.xlu0 %3380  ;;  %v6895_v52 = vpop.permute.xlu1 %2535 }
 0x44b   : > { %9104 = vst [vmem:[#allocation73_spill] sm:$0xff] %v6893_v53  ;;  %9105 = vst [vmem:[#allocation74_spill] sm:$0xff] %v6895_v52 }
 0x44c   : > { %9102 = vst [vmem:[#allocation71_spill] sm:$0xff] %v6883_v28  ;;  %v1287_v37 = vmax.f32 %v6883_v28, %v6871_v25 }
 0x44e   : > { %1279 = vmax.xlane.f32.xlu0 %v1278_v47  ;;  %1282 = vmax.xlane.f32.xlu1 %v1281_v4  ;;  %v6897_v57 = vpop.permute.xlu0 %1698  ;;  %v6899_v47 = vpop.permute.xlu1 %3378 }
 0x44f   : > { %9106 = vst [vmem:[#allocation75_spill] sm:$0xff] %v6899_v47 }
 0x452   : > { %1285 = vmax.xlane.f32.xlu0 %v1284_v61  ;;  %1288 = vmax.xlane.f32.xlu1 %v1287_v37  ;;  %v6901_v4 = vpop.permute.xlu0 %2541  ;;  %v6905_v63 = vpop.permute.xlu1 %1696 }
 0x453   : > { %9107 = vst [vmem:[#allocation76_spill] sm:$0xff] %v6901_v4 }
 0x456   : > { %v6909_v61 = vpop.permute.xlu0 %3384  ;;  %v6913_v37 = vpop.permute.xlu1 %2539 }
 0x457   : > { %9108 = vst [vmem:[#allocation77_spill] sm:$0xff] %v6909_v61  ;;  %9109 = vst [vmem:[#allocation78_spill] sm:$0xff] %v6913_v37 }
 0x45a   : > { %v6919_v53 = vpop.permute.xlu0 %1702  ;;  %v6923_v47 = vpop.permute.xlu1 %3382 }
 0x45b   : > { %9110 = vst [vmem:[#allocation79_spill] sm:$0xff] %v6919_v53  ;;  %9111 = vst [vmem:[#allocation80_spill] sm:$0xff] %v6923_v47  ;;  %v9120_v53 = vld [vmem:[#allocation29_spill] sm:$0xff] }
 0x45e   : > { %v6929_v61 = vpop.permute.xlu0 %2545  ;;  %v6933_v4 = vpop.permute.xlu1 %1700 }
 0x45f   : > { %9112 = vst [vmem:[#allocation81_spill] sm:$0xff] %v6929_v61  ;;  %9113 = vst [vmem:[#allocation82_spill] sm:$0xff] %v6933_v4 }
 0x462   : > { %v6939_v47 = vpop.permute.xlu0 %3388  ;;  %v6943_v37 = vpop.permute.xlu1 %2543 }
 0x463   : > { %2187 = vrot.lane.b32.xlu1 %v6512_v14, %s5981_s21  ;;  %9114 = vst [vmem:[#allocation83_spill] sm:$0xff] %v6939_v47  ;;  %9115 = vst [vmem:[#allocation84_spill] sm:$0xff] %v6943_v37 }
 0x466   : > { %v6949_v61 = vpop.permute.xlu0 %1706  ;;  %v6953_v56 = vpop.permute.xlu1 %3386 }
 0x467   : > { %2217 = vrot.lane.b32.xlu1 %v6514_v15, %s5981_s21  ;;  %9116 = vst [vmem:[#allocation85_spill] sm:$0xff] %v6949_v61  ;;  %9117 = vst [vmem:[#allocation86_spill] sm:$0xff] %v6953_v56 }
 0x468   : > { %2219 = vrot.lane.b32.xlu0 %v6510_v13, %s5981_s21 }
 0x46a   : > { %v6959_v47 = vpop.permute.xlu0 %2549  ;;  %v6963_v37 = vpop.permute.xlu1 %1704 }
 0x46b   : > { %2215 = vrot.lane.b32.xlu1 %v6523_v17, %s5981_s21  ;;  %9118 = vst [vmem:[#allocation87_spill] sm:$0xff] %v6959_v47  ;;  %9119 = vst [vmem:[#allocation88_spill] sm:$0xff] %v6963_v37 }
 0x46c   : > { %2185 = vrot.lane.b32.xlu0 %v6517_v16, %s5981_s21 }
 0x46e   : > { %v6973_v28 = vpop.permute.xlu1 %2547 }
 0x46f   : > { %2183 = vrot.lane.b32.xlu1 %v6527_v18, %s5981_s21  ;;  %9121 = vst [vmem:[#allocation29_spill] sm:$0xff] %v6973_v28  ;;  %v9132_v28 = vld [vmem:[#allocation49_spill] sm:$0xff] }
 0x470   : > { %2179 = vrot.lane.b32.xlu0 %v6547_v24, %s5981_s21 }
 0x473   : > { %2213 = vrot.lane.b32.xlu1 %v6533_v20, %s5981_s21 }
 0x474   : > { %2209 = vrot.lane.b32.xlu0 %v6553_v26, %s5981_s21 }
 0x477   : > { %2181 = vrot.lane.b32.xlu1 %v6537_v21, %s5981_s21 }
 0x478   : > { %2207 = vrot.lane.b32.xlu0 %v6563_v29, %s5981_s21 }
 0x47b   : > { %2211 = vrot.lane.b32.xlu1 %v6543_v23, %s5981_s21 }
 0x47c   : > { %2171 = vrot.lane.b32.xlu0 %v6587_v36, %s5981_s21 }
 0x47f   : > { %2177 = vrot.lane.b32.xlu1 %v6557_v27, %s5981_s21 }
 0x480   : > { %2201 = vrot.lane.b32.xlu0 %v6593_v38, %s5981_s21 }
 0x483   : > { %2175 = vrot.lane.b32.xlu1 %v6567_v30, %s5981_s21 }
 0x484   : > { %2169 = vrot.lane.b32.xlu0 %v6597_v39, %s5981_s21 }
 0x487   : > { %2205 = vrot.lane.b32.xlu1 %v6573_v32, %s5981_s21 }
 0x488   : > { %2199 = vrot.lane.b32.xlu0 %v6603_v41, %s5981_s21 }
 0x48a   : > { %v1292_v52 = vpop.xlane.xlu0 %1291 }
 0x48b   : > { %v1325_v61 = vsub.f32 %v6650_v7, %v1292_v52  ;;  %v1326_v56 = vsub.f32 %v6653_v50, %v1292_v52  ;;  %2173 = vrot.lane.b32.xlu1 %v6577_v33, %s5981_s21  ;;  %v9123_v7 = vld [vmem:[#allocation28_spill] sm:$0xff]  ;;  %v9124_v50 = vld [vmem:[#allocation31_spill] sm:$0xff] }
 0x48c   : > { %2167 = vrot.lane.b32.xlu0 %v9120_v53, %s5981_s21 }
 0x48d   : > { %v1383_v47 = vmul.f32 1.442695, %v1325_v61  ;;  %v1385_v25 = vmul.f32 1.442695, %v1326_v56 }
 0x48e   : > { %v1295_v11 = vpop.xlane.xlu0 %1294 }
 0x48f   : > { %5337 = vpow2.f32 %v1383_v47  ;;  %v1327_v37 = vsub.f32 %v6658_v55, %v1295_v11  ;;  %v1328_v4 = vsub.f32 %v9122_v49, %v1295_v11  ;;  %2203 = vrot.lane.b32.xlu1 %v9123_v7, %s5981_s21  ;;  %v9125_v47 = vld [vmem:[#allocation30_spill] sm:$0xff]  ;;  %v9126_v55 = vld [vmem:[#allocation40_spill] sm:$0xff]  ;;  %v9127_v49 = vld [vmem:[#allocation41_spill] sm:$0xff] }
 0x490   : > { %5339 = vpow2.f32 %v1385_v25  ;;  %2165 = vrot.lane.b32.xlu0 %v9124_v50, %s5981_s21 }
 0x491   : > { %v1387_v52 = vmul.f32 1.442695, %v1327_v37  ;;  %v1389_v12 = vmul.f32 1.442695, %v1328_v4  ;;  %v9128_v4 = vld [vmem:[#allocation47_spill] sm:$0xff]  ;;  %v1673_v37 = vld [vmem:[#allocation2 + $0xf0] sm:$0xff] }
 0x492   : > { %v1298_v48 = vpop.xlane.xlu1 %1297 }
 0x493   : > { %5341 = vpow2.f32 %v1387_v52  ;;  %v1329_v56 = vsub.f32 %v6668_v45, %v1298_v48  ;;  %v1330_v61 = vsub.f32 %v6671_v35, %v1298_v48  ;;  %2197 = vrot.lane.b32.xlu1 %v9125_v47, %s5981_s21  ;;  %v9129_v45 = vld [vmem:[#allocation43_spill] sm:$0xff]  ;;  %v1674_v48 = vld [vmem:[#allocation2 + $0x8] sm:$0xff] }
 0x494   : > { %5343 = vpow2.f32 %v1389_v12  ;;  %2195 = vrot.lane.b32.xlu0 %v9126_v55, %s5981_s21  ;;  %v1669_v55 = vld [vmem:[#allocation2 + $0x88] sm:$0xff] }
 0x495   : > { %v1391_v11 = vmul.f32 1.442695, %v1329_v56  ;;  %v1393_v25 = vmul.f32 1.442695, %v1330_v61  ;;  %v1672_v56 = vld [vmem:[#allocation2 + $0x60] sm:$0xff] }
 0x496   : > { %v9131_v61 = vld [vmem:[#allocation44_spill] sm:$0xff] }
 0x497   : > { %5345 = vpow2.f32 %v1391_v11  ;;  %2163 = vrot.lane.b32.xlu1 %v9127_v49, %s5981_s21 }
 0x498   : > { %5347 = vpow2.f32 %v1393_v25  ;;  %2159 = vrot.lane.b32.xlu0 %v9128_v4, %s5981_s21  ;;  %v1671_v25 = vld [vmem:[#allocation2 + $0xb8] sm:$0xff] }
 0x49b   : > { %2193 = vrot.lane.b32.xlu1 %v9129_v45, %s5981_s21 }
 0x49c   : > { %v5338_v35 = vpop.eup %5337  ;;  %2189 = vrot.lane.b32.xlu0 %v6707_v44, %s5981_s21  ;;  %v1670_v44 = vld [vmem:[#allocation2 + $0xe8] sm:$0xff] }
 0x49d   : > { %v5340_v12 = vpop.eup %5339 }
 0x49e   : > { %1604 = vmatprep.mubr.f32.mxu1 %v5340_v12  ;;  %v6995_v52 = vadd.f32 %v5340_v12, %v5338_v35 }
 0x49f   : > { %1605 = vmatmul.mubr.f32.vlgmr.msra.gmra.mxu1 %v5338_v35  ;;  %2161 = vrot.lane.b32.xlu1 %v9131_v61, %s5981_s21  ;;  %v1668_v35 = vld [vmem:[#allocation2 + $0x80] sm:$0xff] }
 0x4a0   : > { %9130 = vst [vmem:[#allocation34_spill] sm:$0xff] %v6995_v52  ;;  %v5342_v11 = vpop.eup %5341  ;;  %1765 = vmatpush1.msra.mxu1 %v1674_v48  ;;  %2157 = vrot.lane.b32.xlu0 %v9132_v28, %s5981_s21  ;;  %v2518_v52 = vld [vmem:[#allocation2 + $0xc0] sm:$0xff]  ;;  %v9134_v28 = vld [vmem:[#allocation46_spill] sm:$0xff] }
 0x4a1   : > { %v5344_v4 = vpop.eup %5343  ;;  %1766 = vmatprep.subr.mxu1 %v1673_v37 }
 0x4a2   : > { %1609 = vmatprep.mubr.f32.mxu1 %v5344_v4  ;;  %1767 = vmatpush1.msra.mxu1 %v1672_v56  ;;  %v7001_v50 = vadd.f32 %v5344_v4, %v5342_v11  ;;  %v9136_v4 = vmov 0.0   ;;  %v2515_v56 = vld [vmem:[#allocation2 + $0xe0] sm:$0xff] }
 0x4a3   : > { %1610 = vmatmul.mubr.f32.gmra.mxu1 %v5342_v11  ;;  %1768 = vmatprep.subr.mxu1 %v1671_v25  ;;  %v2514_v11 = vld [vmem:[#allocation2 + $0xc8] sm:$0xff]  ;;  %v2511_v25 = vld [vmem:[#allocation2 + $0x38] sm:$0xff] }
 0x4a4   : > { %9133 = vst [vmem:[#allocation28_spill] sm:$0xff] %v7001_v50  ;;  %v5346_v12 = vpop.eup %5345  ;;  %1769 = vmatpush1.msra.mxu1 %v1670_v44  ;;  %3030 = vrot.lane.b32.xlu0 %v6512_v14, %s5982_s12  ;;  %v2517_v44 = vld [vmem:[#allocation2 + $0x70] sm:$0xff] }
 0x4a5   : > { %v5348_v48 = vpop.eup %5347  ;;  %1770 = vmatprep.subr.mxu1 %v1669_v55  ;;  %2191 = vrot.lane.b32.xlu1 %v9134_v28, %s5981_s21  ;;  %v2516_v14 = vld [vmem:[#allocation2 + $0x90] sm:$0xff]  ;;  %v9137_v55 = vld [vmem:[#allocation35_spill] sm:$0xff] }
 0x4a6   : > { %1614 = vmatprep.mubr.f32.mxu1 %v5348_v48  ;;  %1771 = vmatpush1.msra.mxu1 %v1668_v35  ;;  %v7007_v37 = vadd.f32 %v5348_v48, %v5346_v12  ;;  %v3361_v35 = vld [vmem:[#allocation2 + $0x98] sm:$0xff] }
 0x4a7   : > { %1615 = vmatmul.mubr.f32.gmra.mxu1 %v5346_v12  ;;  %2607 = vmatprep.subr.mxu1 %v2518_v52  ;;  %v2513_v52 = vld [vmem:[#allocation2 + $0x40] sm:$0xff] }
 0x4a8   : > { %9135 = vst [vmem:[#allocation30_spill] sm:$0xff] %v7007_v37  ;;  %1804 = vmatprep.mubr.f32.mxu1 %v9136_v4  ;;  %3026 = vrot.lane.b32.xlu0 %v6527_v18, %s5982_s12  ;;  %v2512_v18 = vld [vmem:[#allocation2 + $0x58] sm:$0xff] }
 0x4a9   : > { %3062 = vrot.lane.b32.xlu1 %v6510_v13, %s5982_s12  ;;  %v9138_v13 = vld [vmem:[#allocation36_spill] sm:$0xff] }
 0x4ab   : > { %4581 = vmatmul.mubr.msk.f32.vlgmr.msra.gmra.mxu1 %vm1041_vm0, %v9137_v55 }
 0x4ac   : > { %2608 = vmatpush1.msra.mxu1 %v2517_v44  ;;  %1810 = vmatprep.mubr.f32.mxu1 %v9136_v4 }
 0x4ad   : > { %2609 = vmatprep.subr.mxu1 %v2516_v14  ;;  %3056 = vrot.lane.b32.xlu0 %v6533_v20, %s5982_s12  ;;  %v9139_v20 = vld [vmem:[#allocation51_spill] sm:$0xff] }
 0x4ae   : > { %2610 = vmatpush1.msra.mxu1 %v2515_v56  ;;  %3060 = vrot.lane.b32.xlu1 %v6514_v15, %s5982_s12  ;;  %v9140_v15 = vld [vmem:[#allocation45_spill] sm:$0xff] }
 0x4af   : > { %4582 = vmatmul.mubr.msk.f32.gmra.mxu1 %vm1041_vm0, %v9138_v13  ;;  %2611 = vmatprep.subr.mxu1 %v2514_v11 }
 0x4b0   : > { %1816 = vmatprep.mubr.f32.mxu1 %v9136_v4  ;;  %2612 = vmatpush1.msra.mxu1 %v2513_v52 }
 0x4b1   : > { %2613 = vmatprep.subr.mxu1 %v2512_v18  ;;  %3024 = vrot.lane.b32.xlu0 %v6537_v21, %s5982_s12 }
 0x4b2   : > { %2614 = vmatpush1.msra.mxu1 %v2511_v25  ;;  %3028 = vrot.lane.b32.xlu1 %v6517_v16, %s5982_s12  ;;  %v7049_v16 = vpop.permute.xlu0 %3392 }
 0x4b3   : > { %4583 = vmatmul.mubr.msk.f32.gmra.mxu1 %vm1041_vm0, %v9139_v20  ;;  %3450 = vmatprep.subr.mxu1 %v3361_v35 }
 0x4b4   : > { %1822 = vmatprep.mubr.f32.mxu1 %v9136_v4 }
 0x4b5   : > { %3054 = vrot.lane.b32.xlu0 %v6543_v23, %s5982_s12 }
 0x4b6   : > { %3058 = vrot.lane.b32.xlu1 %v6523_v17, %s5982_s12  ;;  %v7058_v17 = vpop.permute.xlu1 %3390 }
 0x4b7   : > { %4584 = vmatmul.mubr.msk.f32.gmra.mxu1 %vm1041_vm0, %v9140_v15 }
 0x4b8   : > { %1828 = vmatprep.mubr.f32.mxu1 %v9136_v4 }
 0x4b9   : > { %3052 = vrot.lane.b32.xlu0 %v6553_v26, %s5982_s12 }
 0x4ba   : > { %3022 = vrot.lane.b32.xlu1 %v6547_v24, %s5982_s12 }
 0x4bb   : > { %4585 = vmatmul.mubr.msk.f32.gmra.mxu1 %vm1041_vm0, %v6737_v59 }
 0x4bc   : > { %1834 = vmatprep.mubr.f32.mxu1 %v9136_v4 }
 0x4bd   : > { %3018 = vrot.lane.b32.xlu0 %v6567_v30, %s5982_s12 }
 0x4be   : > { %3020 = vrot.lane.b32.xlu1 %v6557_v27, %s5982_s12 }
 0x4bf   : > { %4586 = vmatmul.mubr.msk.f32.gmra.mxu1 %vm1041_vm0, %v6731_v51 }
 0x4c0   : > { %1840 = vmatprep.mubr.f32.mxu1 %v9136_v4 }
 0x4c1   : > { %3048 = vrot.lane.b32.xlu0 %v6573_v32, %s5982_s12 }
 0x4c2   : > { %3050 = vrot.lane.b32.xlu1 %v6563_v29, %s5982_s12 }
 0x4c3   : > { %4587 = vmatmul.mubr.msk.f32.gmra.mxu1 %vm1041_vm0, %v6795_v22  ;;  %v1256_v21 = vpop.xlane.xlu0 %1255 }
 0x4c4   : > { %v1301_v23 = vsub.f32 %v6749_v42, %v1256_v21  ;;  %v1302_v24 = vsub.f32 %v6745_v60, %v1256_v21  ;;  %1846 = vmatprep.mubr.f32.mxu1 %v9136_v4 }
 0x4c5   : > { %3016 = vrot.lane.b32.xlu0 %v6577_v33, %s5982_s12  ;;  %v9141_v33 = vld [vmem:[#allocation58_spill] sm:$0xff] }
 0x4c6   : > { %v1335_v26 = vmul.f32 1.442695, %v1301_v23  ;;  %v1337_v27 = vmul.f32 1.442695, %v1302_v24  ;;  %3014 = vrot.lane.b32.xlu1 %v6587_v36, %s5982_s12  ;;  %v9145_v24 = vld [vmem:[#allocation66_spill] sm:$0xff] }
 0x4c7   : > { %4588 = vmatmul.mubr.msk.f32.gmra.mxu1 %vm1041_vm0, %v6751_v2  ;;  %v1259_v29 = vpop.xlane.xlu0 %1258  ;;  %v1253_v30 = vpop.xlane.xlu1 %1252 }
 0x4c8   : > { %5349 = vpow2.f32 %v1335_v26  ;;  %v1303_v32 = vsub.f32 %v6771_v8, %v1259_v29  ;;  %v1304_v59 = vsub.f32 %v6759_v1, %v1259_v29  ;;  %v1299_v60 = vsub.f32 %v6767_v9, %v1253_v30  ;;  %1852 = vmatprep.mubr.f32.mxu1 %v9136_v4 }
 0x4c9   : > { %5351 = vpow2.f32 %v1337_v27  ;;  %v1300_v51 = vsub.f32 %v9141_v33, %v1253_v30  ;;  %3046 = vrot.lane.b32.xlu0 %v9123_v7, %s5982_s12  ;;  %v9142_v7 = vld [vmem:[#allocation60_spill] sm:$0xff]  ;;  %v9146_v27 = vld [vmem:[#allocation65_spill] sm:$0xff]  ;;  %v9148_v33 = vld [vmem:[#allocation82_spill] sm:$0xff] }
 0x4ca   : > { %v1339_v36 = vmul.f32 1.442695, %v1303_v32  ;;  %v1341_v42 = vmul.f32 1.442695, %v1304_v59  ;;  %v1331_v2 = vmul.f32 1.442695, %v1299_v60  ;;  %3044 = vrot.lane.b32.xlu1 %v6593_v38, %s5982_s12 }
 0x4cb   : > { %v1333_v22 = vmul.f32 1.442695, %v1300_v51  ;;  %4589 = vmatmul.mubr.msk.f32.gmra.mxu1 %vm1041_vm0, %v6891_v0  ;;  %v1262_v1 = vpop.xlane.xlu0 %1261  ;;  %v1265_v9 = vpop.xlane.xlu1 %1264 }
 0x4cc   : > { %5353 = vpow2.f32 %v1339_v36  ;;  %v1305_v8 = vsub.f32 %v6789_v10, %v1262_v1  ;;  %v1306_v12 = vsub.f32 %v6775_v5, %v1262_v1  ;;  %v1307_v48 = vsub.f32 %v6793_v6, %v1265_v9  ;;  %1858 = vmatprep.mubr.f32.mxu1 %v9136_v4 }
 0x4cd   : > { %5355 = vpow2.f32 %v1341_v42  ;;  %v1308_v44 = vsub.f32 %v9142_v7, %v1265_v9  ;;  %3012 = vrot.lane.b32.xlu0 %v6597_v39, %s5982_s12  ;;  %v9151_v9 = vld [vmem:[#allocation68_spill] sm:$0xff]  ;;  %v9153_v7 = vld [vmem:[#allocation69_spill] sm:$0xff] }
 0x4ce   : > { %5357 = vpow2.f32 %v1331_v2  ;;  %v1343_v38 = vmul.f32 1.442695, %v1305_v8  ;;  %v1345_v0 = vmul.f32 1.442695, %v1306_v12  ;;  %v1347_v14 = vmul.f32 1.442695, %v1307_v48  ;;  %3042 = vrot.lane.b32.xlu1 %v6603_v41, %s5982_s12 }
 0x4cf   : > { %5359 = vpow2.f32 %v1333_v22  ;;  %v1349_v10 = vmul.f32 1.442695, %v1308_v44  ;;  %4590 = vmatmul.mubr.msk.f32.gmra.mxu1 %vm1041_vm0, %v6853_v31  ;;  %v1268_v5 = vpop.xlane.xlu0 %1267  ;;  %v1271_v6 = vpop.xlane.xlu1 %1270  ;;  %v9150_v22 = vld [vmem:[#allocation70_spill] sm:$0xff]  ;;  %v9152_v12 = vld [vmem:[#allocation71_spill] sm:$0xff] }
 0x4d0   : > { %5361 = vpow2.f32 %v1343_v38  ;;  %v1309_v55 = vsub.f32 %v6811_v19, %v1268_v5  ;;  %v1310_v56 = vsub.f32 %v6799_v62, %v1268_v5  ;;  %v1311_v39 = vsub.f32 %v6815_v54, %v1271_v6  ;;  %1864 = vmatprep.mubr.f32.mxu1 %v9136_v4  ;;  %v9154_v38 = vld [vmem:[#allocation40_spill] sm:$0xff] }
 0x4d1   : > { %5363 = vpow2.f32 %v1345_v0  ;;  %v1312_v11 = vsub.f32 %v6803_v3, %v1271_v6  ;;  %3010 = vrot.lane.b32.xlu0 %v9120_v53, %s5982_s12 }
 0x4d2   : > { %5365 = vpow2.f32 %v1347_v14  ;;  %v1351_v41 = vmul.f32 1.442695, %v1309_v55  ;;  %v1353_v31 = vmul.f32 1.442695, %v1310_v56  ;;  %v1355_v52 = vmul.f32 1.442695, %v1311_v39  ;;  %3006 = vrot.lane.b32.xlu1 %v9127_v49, %s5982_s12 }
 0x4d3   : > { %5367 = vpow2.f32 %v1349_v10  ;;  %v1357_v19 = vmul.f32 1.442695, %v1312_v11  ;;  %4591 = vmatmul.mubr.msk.f32.gmra.mxu1 %vm1041_vm0, %v6905_v63  ;;  %v1274_v62 = vpop.xlane.xlu0 %1273  ;;  %v1277_v54 = vpop.xlane.xlu1 %1276  ;;  %v9143_v49 = vld [vmem:[#allocation63_spill] sm:$0xff] }
 0x4d4   : > { %5369 = vpow2.f32 %v1351_v41  ;;  %v1313_v3 = vsub.f32 %v6835_v58, %v1274_v62  ;;  %v1314_v18 = vsub.f32 %v6821_v34, %v1274_v62  ;;  %v1315_v53 = vsub.f32 %v6839_v40, %v1277_v54  ;;  %1870 = vmatprep.mubr.f32.mxu1 %v9136_v4  ;;  %v9156_v39 = vld [vmem:[#allocation79_spill] sm:$0xff] }
 0x4d5   : > { %v7108_v13 = vpop.eup %5349  ;;  %5371 = vpow2.f32 %v1353_v31  ;;  %v1316_v25 = vsub.f32 %v9143_v49, %v1277_v54  ;;  %3040 = vrot.lane.b32.xlu0 %v9125_v47, %s5982_s12 }
 0x4d6   : > { %v5352_v63 = vpop.eup %5351  ;;  %5373 = vpow2.f32 %v1355_v52  ;;  %v1359_v35 = vmul.f32 1.442695, %v1313_v3  ;;  %v1361_v20 = vmul.f32 1.442695, %v1314_v18  ;;  %v1363_v15 = vmul.f32 1.442695, %v1315_v53  ;;  %3036 = vrot.lane.b32.xlu1 %v9129_v45, %s5982_s12 }
 0x4d7   : > { %5375 = vpow2.f32 %v1357_v19  ;;  %v1365_v34 = vmul.f32 1.442695, %v1316_v25  ;;  %4592 = vmatmul.mubr.msk.f32.gmra.mxu1 %vm1041_vm0, %v6897_v57  ;;  %v1280_v58 = vpop.xlane.xlu0 %1279  ;;  %v1283_v40 = vpop.xlane.xlu1 %1282  ;;  %v7118_v21 = vadd.f32 %v5352_v63, %v7108_v13  ;;  %v9147_v57 = vld [vmem:[#allocation31_spill] sm:$0xff]  ;;  %v9161_v53 = vld [vmem:[#allocation88_spill] sm:$0xff] }
 0x4d8   : > { %5377 = vpow2.f32 %v1359_v35  ;;  %v1317_v47 = vsub.f32 %v6857_v43, %v1280_v58  ;;  %v1318_v23 = vsub.f32 %v6843_v46, %v1280_v58  ;;  %v1319_v26 = vsub.f32 %v9145_v24, %v1283_v40  ;;  %1876 = vmatprep.mubr.f32.mxu1 %v9136_v4  ;;  %v9160_v3 = vld [vmem:[#allocation47_spill] sm:$0xff]  ;;  %v9164_v58 = vld [vmem:[#allocation49_spill] sm:$0xff] }
 0x4d9   : > { %9144 = vst [vmem:[#allocation41_spill] sm:$0xff] %v7118_v21  ;;  %v7124_v45 = vpop.eup %5353  ;;  %5379 = vpow2.f32 %v1361_v20  ;;  %v1320_v29 = vsub.f32 %v9146_v27, %v1283_v40  ;;  %3008 = vrot.lane.b32.xlu0 %v9147_v57, %s5982_s12  ;;  %v5721_v20 = vld [vmem:[#allocation3 + $0x98] sm:$0xff]  ;;  %v5722_v57 = vld [vmem:[#allocation3 + $0x28] sm:$0xff] }
 0x4da   : > { %v5356_v30 = vpop.eup %5355  ;;  %5381 = vpow2.f32 %v1363_v15  ;;  %v1367_v32 = vmul.f32 1.442695, %v1317_v47  ;;  %v1369_v59 = vmul.f32 1.442695, %v1318_v23  ;;  %v1371_v60 = vmul.f32 1.442695, %v1319_v26  ;;  %3004 = vrot.lane.b32.xlu1 %v9131_v61, %s5982_s12 }
 0x4db   : > { %v5358_v46 = vpop.eup %5357  ;;  %5383 = vpow2.f32 %v1365_v34  ;;  %v1373_v43 = vmul.f32 1.442695, %v1320_v29  ;;  %4593 = vmatmul.mubr.msk.f32.gmra.mxu1 %vm1041_vm0, %v9148_v33  ;;  %v1286_v51 = vpop.xlane.xlu0 %1285  ;;  %v7134_v42 = vadd.f32 %v5356_v30, %v7124_v45  ;;  %v9165_v47 = vld [vmem:[#allocation85_spill] sm:$0xff]  ;;  %v3360_v29 = vld [vmem:[#allocation2 + $0x20] sm:$0xff] }
 0x4dc   : > { %v1289_v36 = vpop.xlane.xlu1 %1288  ;;  %v5360_v2 = vpop.eup %5359  ;;  %5385 = vpow2.f32 %v1367_v32  ;;  %v1321_v1 = vsub.f32 %v9150_v22, %v1286_v51  ;;  %v1322_v8 = vsub.f32 %v9151_v9, %v1286_v51  ;;  %1882 = vmatprep.mubr.f32.mxu1 %v9136_v4  ;;  %v3358_v33 = vld [vmem:[#allocation2 + $0xa0] sm:$0xff]  ;;  %v3357_v9 = vld [vmem:[#allocation2 + $0x28] sm:$0xff] }
 0x4dd   : > { %9149 = vst [vmem:[#allocation43_spill] sm:$0xff] %v7134_v42  ;;  %v1323_v48 = vsub.f32 %v9152_v12, %v1289_v36  ;;  %v7140_v61 = vpop.eup %5361  ;;  %5387 = vpow2.f32 %v1369_v59  ;;  %1539 = vmatprep.mubr.f32.mxu0 %v5360_v2  ;;  %v1324_v44 = vsub.f32 %v9153_v7, %v1289_v36  ;;  %3038 = vrot.lane.b32.xlu0 %v9154_v38, %s5982_s12  ;;  %v3359_v59 = vld [vmem:[#allocation2 + $0xf8] sm:$0xff] }
 0x4de   : > { %v7145_v0 = vadd.f32 %v5360_v2, %v5358_v46  ;;  %v5364_v14 = vpop.eup %5363  ;;  %5389 = vpow2.f32 %v1371_v60  ;;  %v1375_v10 = vmul.f32 1.442695, %v1321_v1  ;;  %v1377_v5 = vmul.f32 1.442695, %v1322_v8  ;;  %1540 = vmatmul.mubr.f32.vlgmr.msra.gmra.mxu0 %v5358_v46  ;;  %3034 = vrot.lane.b32.xlu1 %v9134_v28, %s5982_s12  ;;  %v9158_v28 = vld [vmem:[#allocation48_spill] sm:$0xff] }
 0x4df   : > { %v1379_v6 = vmul.f32 1.442695, %v1323_v48  ;;  %v7149_v55 = vpop.eup %5365  ;;  %5391 = vpow2.f32 %v1373_v43  ;;  %v1381_v56 = vmul.f32 1.442695, %v1324_v44  ;;  %1544 = vmatprep.mubr.f32.mxu0 %v5352_v63  ;;  %4594 = vmatmul.mubr.msk.f32.gmra.mxu1 %vm1041_vm0, %v9156_v39  ;;  %v2220_v41 = vpop.permute.xlu0 %2219  ;;  %v7154_v31 = vadd.f32 %v5364_v14, %v7140_v61  ;;  %v5723_v60 = vld [vmem:[#allocation3 + $0x68] sm:$0xff]  ;;  %v5724_v8 = vld [vmem:[#allocation3] sm:$0xff] }
 0x4e0   : > { %9155 = vst [vmem:[#allocation44_spill] sm:$0xff] %v7145_v0  ;;  %v2188_v11 = vpop.permute.xlu1 %2187  ;;  %v5368_v52 = vpop.eup %5367  ;;  %5393 = vpow2.f32 %v1375_v10  ;;  %1888 = vmatprep.mubr.f32.mxu1 %v9136_v4  ;;  %4750 = vmatprep.subr.mxu0 %v2220_v41  ;;  %v9168_v43 = vld [vmem:[#allocation37_spill] sm:$0xff]  ;;  %v9171_v44 = vld [vmem:[#allocation38_spill] sm:$0xff] }
 0x4e1   : > { %9157 = vst [vmem:[#allocation46_spill] sm:$0xff] %v7154_v31  ;;  %v7157_v19 = vpop.eup %5369  ;;  %5395 = vpow2.f32 %v1377_v5  ;;  %3032 = vrot.lane.b32.xlu0 %v9158_v28, %s5982_s12  ;;  %4751 = vmatpush3.msra.mxu0 %v2188_v11  ;;  %v7162_v62 = vadd.f32 %v5368_v52, %v7149_v55  ;;  %v9174_v11 = vld [vmem:[#allocation53_spill] sm:$0xff] }
 0x4e2   : > { %v5372_v54 = vpop.eup %5371  ;;  %5397 = vpow2.f32 %v1379_v6  ;;  %1545 = vmatmul.mubr.f32.gmra.mxu0 %v7108_v13  ;;  %3002 = vrot.lane.b32.xlu1 %v9160_v3, %s5982_s12 }
 0x4e3   : > { %9159 = vst [vmem:[#allocation35_spill] sm:$0xff] %v7162_v62  ;;  %v7167_v18 = vpop.eup %5373  ;;  %5399 = vpow2.f32 %v1381_v56  ;;  %1549 = vmatprep.mubr.f32.mxu0 %v5356_v30  ;;  %4595 = vmatmul.mubr.msk.f32.gmra.mxu1 %vm1041_vm0, %v9161_v53  ;;  %v2186_v25 = vpop.permute.xlu0 %2185  ;;  %v7172_v63 = vadd.f32 %v5372_v54, %v7157_v19  ;;  %v5725_v56 = vld [vmem:[#allocation3 + $0x60] sm:$0xff] }
 0x4e4   : > { %v2218_v49 = vpop.permute.xlu1 %2217  ;;  %v7174_v35 = vpop.eup %5375  ;;  %1894 = vmatprep.mubr.f32.mxu1 %v9136_v4 }
 0x4e5   : > { %9162 = vst [vmem:[#allocation36_spill] sm:$0xff] %v7172_v63  ;;  %4752 = vmatprep.subr.mxu0 %v2218_v49  ;;  %v7177_v13 = vpop.eup %5377  ;;  %3905 = vrot.lane.b32.xlu0 %v5721_v20, %s5983_s4  ;;  %v7182_v15 = vadd.f32 %v7174_v35, %v7167_v18  ;;  %v5727_v49 = vld [vmem:[#allocation3 + $0xe0] sm:$0xff] }
 0x4e6   : > { %4753 = vmatpush3.msra.mxu0 %v2186_v25  ;;  %v7184_v34 = vpop.eup %5379  ;;  %3000 = vrot.lane.b32.xlu1 %v9164_v58, %s5982_s12  ;;  %v9176_v25 = vld [vmem:[#allocation57_spill] sm:$0xff]  ;;  %v3789_v58 = vld [vmem:[#allocation3 + $0x38] sm:$0xff] }
 0x4e7   : > { %9163 = vst [vmem:[#allocation51_spill] sm:$0xff] %v7182_v15  ;;  %1550 = vmatmul.mubr.f32.gmra.mxu0 %v7124_v45  ;;  %v7189_v40 = vpop.eup %5381  ;;  %4596 = vmatmul.mubr.msk.f32.gmra.mxu1 %vm1041_vm0, %v9165_v47  ;;  %v7193_v24 = vpop.permute.xlu0 %2179  ;;  %v7197_v26 = vadd.f32 %v7184_v34, %v7177_v13  ;;  %v9177_v47 = vld [vmem:[#allocation55_spill] sm:$0xff] }
 0x4e8   : > { %1554 = vmatprep.mubr.f32.mxu0 %v5364_v14  ;;  %v2216_v23 = vpop.permute.xlu1 %2215  ;;  %v7199_v27 = vpop.eup %5383  ;;  %2647 = vmatprep.mubr.f32.mxu1 %v9136_v4  ;;  %v3355_v14 = vld [vmem:[#allocation2 + $0xd0] sm:$0xff] }
 0x4e9   : > { %9166 = vst [vmem:[#allocation45_spill] sm:$0xff] %v7197_v26  ;;  %4754 = vmatprep.subr.mxu0 %v2216_v23  ;;  %v7202_v45 = vpop.eup %5385  ;;  %3903 = vrot.lane.b32.xlu0 %v5722_v57, %s5983_s4  ;;  %v7207_v30 = vadd.f32 %v7199_v27, %v7189_v40 }
 0x4ea   : > { %v7209_v32 = vpop.eup %5387  ;;  %3873 = vrot.lane.b32.xlu1 %v5723_v60, %s5983_s4  ;;  %v9179_v60 = vld [vmem:[#allocation61_spill] sm:$0xff] }
 0x4eb   : > { %9167 = vst [vmem:[#allocation58_spill] sm:$0xff] %v7207_v30  ;;  %1555 = vmatmul.mubr.f32.gmra.mxu0 %v7140_v61  ;;  %v7213_v46 = vpop.eup %5389  ;;  %4597 = vmatmul.mubr.msk.f32.vlgmr.msra.gmra.mxu1 %vm1041_vm0, %v9168_v43  ;;  %v7217_v36 = vpop.permute.xlu0 %2209  ;;  %v7221_v2 = vadd.f32 %v7209_v32, %v7202_v45  ;;  %v3356_v61 = vld [vmem:[#allocation2 + $0x10] sm:$0xff] }
 0x4ec   : > { %1559 = vmatprep.mubr.f32.mxu0 %v5368_v52  ;;  %v2184_v51 = vpop.permute.xlu1 %2183  ;;  %v7223_v22 = vpop.eup %5391  ;;  %2653 = vmatprep.mubr.f32.mxu1 %v9136_v4  ;;  %v3793_v52 = vld [vmem:[#allocation3 + $0x18] sm:$0xff] }
 0x4ed   : > { %9169 = vst [vmem:[#allocation60_spill] sm:$0xff] %v7221_v2  ;;  %3451 = vmatpush1.msra.mxu1 %v3360_v29  ;;  %v7226_v1 = vpop.eup %5393  ;;  %3901 = vrot.lane.b32.xlu0 %v5724_v8, %s5983_s4  ;;  %v7231_v12 = vadd.f32 %v7223_v22, %v7213_v46  ;;  %v9178_v29 = vld [vmem:[#allocation64_spill] sm:$0xff] }
 0x4ee   : > { %3452 = vmatprep.subr.mxu1 %v3359_v59  ;;  %v7233_v48 = vpop.eup %5395  ;;  %4755 = vmatpush3.msra.mxu0 %v2184_v51  ;;  %v3786_v59 = vld [vmem:[#allocation3 + $0xa8] sm:$0xff]  ;;  %v9180_v51 = vld [vmem:[#allocation74_spill] sm:$0xff] }
 0x4ef   : > { %9170 = vst [vmem:[#allocation63_spill] sm:$0xff] %v7231_v12  ;;  %1560 = vmatmul.mubr.f32.gmra.mxu0 %v7149_v55  ;;  %3453 = vmatpush1.msra.mxu1 %v3358_v33  ;;  %v7236_v7 = vpop.eup %5397  ;;  %v2208_v10 = vpop.permute.xlu0 %2207  ;;  %v7242_v5 = vadd.f32 %v7233_v48, %v7226_v1  ;;  %v3354_v55 = vld [vmem:[#allocation2 + $0xa8] sm:$0xff] }
 0x4f0   : > { %1564 = vmatprep.mubr.f32.mxu0 %v5372_v54  ;;  %4598 = vmatmul.mubr.msk.f32.gmra.mxu1 %vm1041_vm0, %v9171_v44  ;;  %v2214_v38 = vpop.permute.xlu1 %2213  ;;  %v7244_v6 = vpop.eup %5399  ;;  %v5726_v54 = vld [vmem:[#allocation3 + $0xb8] sm:$0xff]  ;;  %v9181_v8 = vld [vmem:[#allocation72_spill] sm:$0xff] }
 0x4f1   : > { %9172 = vst [vmem:[#allocation66_spill] sm:$0xff] %v7242_v5  ;;  %2659 = vmatprep.mubr.f32.mxu1 %v9136_v4  ;;  %3454 = vmatprep.subr.mxu1 %v3357_v9  ;;  %v7250_v39 = vadd.f32 %v7244_v6, %v7236_v7  ;;  %v3785_v44 = vld [vmem:[#allocation3 + $0x58] sm:$0xff] }
 0x4f2   : > { %3455 = vmatpush1.msra.mxu1 %v3356_v61  ;;  %3869 = vrot.lane.b32.xlu0 %v5725_v56, %s5983_s4  ;;  %v3800_v61 = vld [vmem:[#allocation3 + $0x30] sm:$0xff]  ;;  %v3799_v56 = vld [vmem:[#allocation3 + $0xd8] sm:$0xff] }
 0x4f3   : > { %9173 = vst [vmem:[#allocation65_spill] sm:$0xff] %v7250_v39  ;;  %1565 = vmatmul.mubr.f32.gmra.mxu0 %v7157_v19  ;;  %3456 = vmatprep.subr.mxu1 %v3355_v14  ;;  %v7256_v28 = vpop.permute.xlu0 %2171  ;;  %v9175_v19 = vld [vmem:[#allocation50_spill] sm:$0xff] }
 0x4f4   : > { %1569 = vmatprep.mubr.f32.mxu0 %v7174_v35  ;;  %4599 = vmatmul.mubr.msk.f32.gmra.mxu1 %vm1041_vm0, %v9174_v11  ;;  %v2182_v41 = vpop.permute.xlu1 %2181 }
 0x4f5   : > { %2665 = vmatprep.mubr.f32.mxu1 %v9136_v4  ;;  %3457 = vmatpush1.msra.mxu1 %v3354_v55 }
 0x4f6   : > { %3899 = vrot.lane.b32.xlu0 %v5726_v54, %s5983_s4  ;;  %3871 = vrot.lane.b32.xlu1 %v3793_v52, %s5983_s4 }
 0x4f7   : > { %1570 = vmatmul.mubr.f32.gmra.mxu0 %v7167_v18  ;;  %v7265_v53 = vpop.permute.xlu0 %2201  ;;  %4756 = vmatprep.subr.mxu0 %v2214_v38  ;;  %v3790_v18 = vld [vmem:[#allocation3 + $0x40] sm:$0xff] }
 0x4f8   : > { %1574 = vmatprep.mubr.f32.mxu0 %v7184_v34  ;;  %4600 = vmatmul.mubr.msk.f32.gmra.mxu1 %vm1041_vm0, %v9175_v19  ;;  %v2212_v3 = vpop.permute.xlu1 %2211  ;;  %v5728_v34 = vld [vmem:[#allocation3 + $0xc0] sm:$0xff] }
 0x4f9   : > { %2671 = vmatprep.mubr.f32.mxu1 %v9136_v4  ;;  %4757 = vmatpush3.msra.mxu0 %v2182_v41  ;;  %v9184_v41 = vld [vmem:[#allocation84_spill] sm:$0xff] }
 0x4fa   : > { %3867 = vrot.lane.b32.xlu0 %v5727_v49, %s5983_s4  ;;  %4758 = vmatprep.subr.mxu0 %v2212_v3  ;;  %v9186_v3 = vld [vmem:[#allocation29_spill] sm:$0xff]  ;;  %v9187_v49 = vld [vmem:[#allocation87_spill] sm:$0xff] }
 0x4fb   : > { %1575 = vmatmul.mubr.f32.gmra.mxu0 %v7177_v13  ;;  %v2170_v20 = vpop.permute.xlu0 %2169  ;;  %3865 = vrot.lane.b32.xlu1 %v3790_v18, %s5983_s4  ;;  %v3805_v13 = vld [vmem:[#allocation3 + $0xf8] sm:$0xff] }
 0x4fc   : > { %1579 = vmatprep.mubr.f32.mxu0 %v7199_v27  ;;  %4601 = vmatmul.mubr.msk.f32.gmra.mxu1 %vm1041_vm0, %v9176_v25  ;;  %v2178_v35 = vpop.permute.xlu1 %2177  ;;  %v9188_v18 = vld [vmem:[#allocation39_spill] sm:$0xff]  ;;  %v9189_v25 = vld [vmem:[#allocation42_spill] sm:$0xff] }
 0x4fd   : > { %2677 = vmatprep.mubr.f32.mxu1 %v9136_v4  ;;  %4759 = vmatpush3.msra.mxu0 %v7193_v24  ;;  %v3804_v24 = vld [vmem:[#allocation3 + $0x48] sm:$0xff] }
 0x4fe   : > { %3897 = vrot.lane.b32.xlu0 %v5728_v34, %s5983_s4  ;;  %4760 = vmatprep.subr.mxu0 %v7217_v36  ;;  %v9192_v34 = vld [vmem:[#allocation59_spill] sm:$0xff] }
 0x4ff   : > { %1580 = vmatmul.mubr.f32.gmra.mxu0 %v7189_v40  ;;  %v2200_v27 = vpop.permute.xlu0 %2199  ;;  %3863 = vrot.lane.b32.xlu1 %v3789_v58, %s5983_s4  ;;  %v3788_v40 = vld [vmem:[#allocation3 + $0xb0] sm:$0xff]  ;;  %v9194_v58 = vld [vmem:[#allocation67_spill] sm:$0xff] }
 0x500   : > { %1584 = vmatprep.mubr.f32.mxu0 %v7209_v32  ;;  %4602 = vmatmul.mubr.msk.f32.gmra.mxu1 %vm1041_vm0, %v9177_v47  ;;  %v2176_v23 = vpop.permute.xlu1 %2175 }
 0x501   : > { %2683 = vmatprep.mubr.f32.mxu1 %v9136_v4  ;;  %4761 = vmatpush3.msra.mxu0 %v2178_v35  ;;  %v9190_v35 = vld [vmem:[#allocation54_spill] sm:$0xff] }
 0x502   : > { %3895 = vrot.lane.b32.xlu0 %v3805_v13, %s5983_s4  ;;  %4762 = vmatprep.subr.mxu0 %v2208_v10  ;;  %v3784_v10 = vld [vmem:[#allocation3 + $0x90] sm:$0xff]  ;;  %v9193_v13 = vld [vmem:[#allocation56_spill] sm:$0xff] }
 0x503   : > { %1585 = vmatmul.mubr.f32.gmra.mxu0 %v7202_v45  ;;  %v2168_v32 = vpop.permute.xlu0 %2167  ;;  %3893 = vrot.lane.b32.xlu1 %v3804_v24, %s5983_s4  ;;  %v3803_v45 = vld [vmem:[#allocation3 + $0x88] sm:$0xff] }
 0x504   : > { %1589 = vmatprep.mubr.f32.mxu0 %v7223_v22  ;;  %4603 = vmatmul.mubr.msk.f32.gmra.mxu1 %vm1041_vm0, %v9178_v29  ;;  %v2206_v57 = vpop.permute.xlu1 %2205  ;;  %v3801_v22 = vld [vmem:[#allocation3 + $0x20] sm:$0xff]  ;;  %v9197_v24 = vld [vmem:[#allocation73_spill] sm:$0xff] }
 0x505   : > { %2689 = vmatprep.mubr.f32.mxu1 %v9136_v4  ;;  %4763 = vmatpush3.msra.mxu0 %v2176_v23  ;;  %v9195_v23 = vld [vmem:[#allocation62_spill] sm:$0xff] }
 0x506   : > { %3861 = vrot.lane.b32.xlu0 %v3788_v40, %s5983_s4  ;;  %4764 = vmatprep.subr.mxu0 %v2206_v57  ;;  %v9198_v57 = vld [vmem:[#allocation80_spill] sm:$0xff] }
 0x507   : > { %1590 = vmatmul.mubr.f32.gmra.mxu0 %v7213_v46  ;;  %v2166_v33 = vpop.permute.xlu0 %2165  ;;  %3857 = vrot.lane.b32.xlu1 %v3786_v59, %s5983_s4  ;;  %v3787_v46 = vld [vmem:[#allocation3 + $0xd0] sm:$0xff] }
 0x508   : > { %1594 = vmatprep.mubr.f32.mxu0 %v7233_v48  ;;  %4604 = vmatmul.mubr.msk.f32.gmra.mxu1 %vm1041_vm0, %v9179_v60  ;;  %v2174_v43 = vpop.permute.xlu1 %2173  ;;  %v9200_v59 = vld [vmem:[#allocation86_spill] sm:$0xff] }
 0x509   : > { %2695 = vmatprep.mubr.f32.mxu1 %v9136_v4  ;;  %4765 = vmatpush3.msra.mxu0 %v2174_v43 }
 0x50a   : > { %3891 = vrot.lane.b32.xlu0 %v3803_v45, %s5983_s4 }
 0x50b   : > { %1595 = vmatmul.mubr.f32.gmra.mxu0 %v7226_v1  ;;  %v3802_v1 = vld [vmem:[#allocation3 + $0xf0] sm:$0xff]  ;;  %v2196_v9 = vpop.permute.xlu0 %2195  ;;  %3887 = vrot.lane.b32.xlu1 %v3801_v22, %s5983_s4 }
 0x50c   : > { %1599 = vmatprep.mubr.f32.mxu0 %v7244_v6  ;;  %4605 = vmatmul.mubr.msk.f32.gmra.mxu1 %vm1041_vm0, %v9180_v51  ;;  %v2204_v36 = vpop.permute.xlu1 %2203  ;;  %v9183_v6 = vld [vmem:[#allocation76_spill] sm:$0xff] }
 0x50d   : > { %2701 = vmatprep.mubr.f32.mxu1 %v9136_v4  ;;  %4766 = vmatprep.subr.mxu0 %v2204_v36 }
 0x50e   : > { %4767 = vmatpush3.msra.mxu0 %v7256_v28  ;;  %3859 = vrot.lane.b32.xlu0 %v3787_v46, %s5983_s4  ;;  %v9185_v28 = vld [vmem:[#allocation81_spill] sm:$0xff] }
 0x50f   : > { %1600 = vmatmul.mubr.f32.gmra.mxu0 %v7236_v7  ;;  %4768 = vmatprep.subr.mxu0 %v7265_v53  ;;  %v9182_v7 = vld [vmem:[#allocation78_spill] sm:$0xff]  ;;  %v2160_v14 = vpop.permute.xlu0 %2159 }
 0x510   : > { %4606 = vmatmul.mubr.msk.f32.gmra.mxu1 %vm1041_vm0, %v9181_v8  ;;  %v2198_v48 = vpop.permute.xlu1 %2197  ;;  %4769 = vmatpush3.msra.mxu0 %v2170_v20  ;;  %v9191_v20 = vld [vmem:[#allocation52_spill] sm:$0xff] }
 0x511   : > { %2707 = vmatprep.mubr.f32.mxu1 %v9136_v4  ;;  %4770 = vmatprep.subr.mxu0 %v2200_v27  ;;  %v9196_v27 = vld [vmem:[#allocation75_spill] sm:$0xff] }
 0x512   : > { %3889 = vrot.lane.b32.xlu0 %v3802_v1, %s5983_s4  ;;  %4771 = vmatpush3.msra.mxu0 %v2168_v32  ;;  %v9199_v32 = vld [vmem:[#allocation77_spill] sm:$0xff] }
 0x513   : > { %3885 = vrot.lane.b32.xlu1 %v3800_v61, %s5983_s4  ;;  %4772 = vmatprep.subr.mxu0 %v2198_v48  ;;  %v2190_v11 = vpop.permute.xlu0 %2189 }
 0x514   : > { %4607 = vmatmul.mubr.msk.f32.gmra.mxu1 %vm1041_vm0, %v9182_v7  ;;  %v2164_v38 = vpop.permute.xlu1 %2163  ;;  %4773 = vmatpush3.msra.mxu0 %v2166_v33  ;;  %v9202_v33 = vld [vmem:[#allocation83_spill] sm:$0xff] }
 0x515   : > { %2713 = vmatprep.mubr.f32.mxu1 %v9136_v4  ;;  %4774 = vmatprep.subr.mxu0 %v2196_v9 }
 0x516   : > { %3855 = vrot.lane.b32.xlu0 %v3785_v44, %s5983_s4  ;;  %4775 = vmatpush3.msra.mxu0 %v2164_v38  ;;  %v9208_v44 = vld [vmem:[#allocation32_spill] sm:$0xff] }
 0x517   : > { %v2158_v19 = vpop.permute.xlu0 %2157 }
 0x518   : > { %4608 = vmatmul.mubr.msk.f32.gmra.mxu1 %vm1041_vm0, %v9183_v6  ;;  %v2194_v55 = vpop.permute.xlu1 %2193 }
 0x519   : > { %2719 = vmatprep.mubr.f32.mxu1 %v9136_v4  ;;  %4776 = vmatprep.subr.mxu0 %v2194_v55 }
 0x51a   : > { %3853 = vrot.lane.b32.xlu0 %v3784_v10, %s5983_s4 }
 0x51b   : > { %v7356_v47 = vpop.permute.xlu0 %3030 }
 0x51c   : > { %4609 = vmatmul.mubr.msk.f32.gmra.mxu1 %vm1041_vm0, %v9184_v41  ;;  %v2162_v52 = vpop.permute.xlu1 %2161 }
 0x51d   : > { %2725 = vmatprep.mubr.f32.mxu1 %v9136_v4  ;;  %4777 = vmatpush3.msra.mxu0 %v2162_v52 }
 0x51e   : > { %3883 = vrot.lane.b32.xlu0 %v3799_v56, %s5983_s4 }
 0x51f   : > { %v7364_v40 = vpop.permute.xlu0 %3026 }
 0x520   : > { %4610 = vmatmul.mubr.msk.f32.gmra.mxu1 %vm1041_vm0, %v9185_v28  ;;  %v2192_v54 = vpop.permute.xlu1 %2191 }
 0x521   : > { %2731 = vmatprep.mubr.f32.mxu1 %v9136_v4  ;;  %4778 = vmatprep.subr.mxu0 %v2192_v54 }
 0x522   : > { %4779 = vmatpush3.msra.mxu0 %v2160_v14 }
 0x523   : > { %4780 = vmatprep.subr.mxu0 %v2190_v11  ;;  %v7369_v29 = vpop.permute.xlu0 %3056 }
 0x524   : > { %4611 = vmatmul.mubr.msk.f32.gmra.mxu1 %vm1041_vm0, %v9186_v3  ;;  %4781 = vmatpush3.msra.mxu0 %v2158_v19  ;;  %v3063_v53 = vpop.permute.xlu1 %3062 }
 0x525   : > { %2737 = vmatprep.mubr.f32.mxu1 %v9136_v4  ;;  %4830 = vmatprep.subr.mxu0 %v3063_v53 }
 0x527   : > { %v7377_v45 = vpop.permute.xlu0 %3024 }
 0x528   : > { %4612 = vmatmul.mubr.msk.f32.gmra.mxu1 %vm1041_vm0, %v9187_v49  ;;  %v7424_v11 = vpop.permute.xlu1 %3060 }
 0x529   : > { %3490 = vmatprep.mubr.f32.mxu1 %v9136_v4 }
 0x52b   : > { %v7382_v60 = vpop.permute.xlu0 %3054 }
 0x52c   : > { %4613 = vmatmul.mubr.msk.f32.vlgmr.msra.gmra.mxu1 %vm1041_vm0, %v9188_v18  ;;  %v7442_v18 = vpop.permute.xlu1 %3028 }
 0x52d   : > { %3496 = vmatprep.mubr.f32.mxu1 %v9136_v4 }
 0x52f   : > { %v7396_v36 = vpop.permute.xlu0 %3052 }
 0x530   : > { %4614 = vmatmul.mubr.msk.f32.gmra.mxu1 %vm1041_vm0, %v9189_v25 }
 0x531   : > { %3502 = vmatprep.mubr.f32.mxu1 %v9136_v4 }
 0x533   : > { %v7406_v8 = vpop.permute.xlu0 %3018 }
 0x534   : > { %4615 = vmatmul.mubr.msk.f32.gmra.mxu1 %vm1041_vm0, %v9190_v35 }
 0x535   : > { %3508 = vmatprep.mubr.f32.mxu1 %v9136_v4 }
 0x537   : > { %v7416_v10 = vpop.permute.xlu0 %3048 }
 0x538   : > { %4616 = vmatmul.mubr.msk.f32.gmra.mxu1 %vm1041_vm0, %v9191_v20 }
 0x539   : > { %3514 = vmatprep.mubr.f32.mxu1 %v9136_v4 }
 0x53b   : > { %v7434_v19 = vpop.permute.xlu0 %3016 }
 0x53c   : > { %4617 = vmatmul.mubr.msk.f32.gmra.mxu1 %vm1041_vm0, %v9192_v34 }
 0x53d   : > { %3520 = vmatprep.mubr.f32.mxu1 %v9136_v4 }
 0x53f   : > { %v7444_v35 = vpop.permute.xlu0 %3046 }
 0x540   : > { %4618 = vmatmul.mubr.msk.f32.gmra.mxu1 %vm1041_vm0, %v9193_v13 }
 0x541   : > { %3526 = vmatprep.mubr.f32.mxu1 %v9136_v4 }
 0x544   : > { %4619 = vmatmul.mubr.msk.f32.gmra.mxu1 %vm1041_vm0, %v9194_v58 }
 0x545   : > { %3532 = vmatprep.mubr.f32.mxu1 %v9136_v4 }
 0x548   : > { %4620 = vmatmul.mubr.msk.f32.gmra.mxu1 %vm1041_vm0, %v9195_v23  ;;  %v7452_v23 = vpop.permute.xlu1 %3058 }
 0x549   : > { %3538 = vmatprep.mubr.f32.mxu1 %v9136_v4 }
 0x54c   : > { %4621 = vmatmul.mubr.msk.f32.gmra.mxu1 %vm1041_vm0, %v9196_v27 }
 0x54d   : > { %3544 = vmatprep.mubr.f32.mxu1 %v9136_v4 }
 0x550   : > { %4622 = vmatmul.mubr.msk.f32.gmra.mxu1 %vm1041_vm0, %v9197_v24 }
 0x551   : > { %3550 = vmatprep.mubr.f32.mxu1 %v9136_v4 }
 0x554   : > { %4623 = vmatmul.mubr.msk.f32.gmra.mxu1 %vm1041_vm0, %v9198_v57 }
 0x555   : > { %3556 = vmatprep.mubr.f32.mxu1 %v9136_v4 }
 0x558   : > { %4624 = vmatmul.mubr.msk.f32.gmra.mxu1 %vm1041_vm0, %v9199_v32 }
 0x559   : > { %3562 = vmatprep.mubr.f32.mxu1 %v9136_v4 }
 0x55c   : > { %4625 = vmatmul.mubr.msk.f32.gmra.mxu1 %vm1041_vm0, %v9200_v59  ;;  %v7462_v59 = vpop.permute.xlu0 %3012 }
 0x55d   : > { %3568 = vmatprep.mubr.f32.mxu1 %v9136_v4 }
 0x55f   : > { %v7384_v43 = vpop.f32.mrf.mxu1 }
 0x560   : > { %9201 = vst [vmem:[#allocation31_spill] sm:$0xff] %v7384_v43  ;;  %4626 = vmatmul.mubr.msk.f32.gmra.mxu1 %vm1041_vm0, %v9202_v33 }
 0x561   : > { %3574 = vmatprep.mubr.f32.mxu1 %v9136_v4  ;;  %v7389_v46 = vpop.f32.mrf.mxu1 }
 0x562   : > { %9203 = vst [vmem:[#allocation82_spill] sm:$0xff] %v7389_v46 }
 0x563   : > { %v7391_v51 = vpop.f32.mrf.mxu1 }
 0x564   : > { %9204 = vst [vmem:[#allocation70_spill] sm:$0xff] %v7391_v51  ;;  %4627 = vmatmul.mubr.msk.f32.gmra.mxu1 %vm1041_vm0, %v7058_v17  ;;  %v9209_v17 = vld [vmem:[#allocation33_spill] sm:$0xff] }
 0x565   : > { %3580 = vmatprep.mubr.f32.mxu1 %v9136_v4  ;;  %v7398_v22 = vpop.f32.mrf.mxu1 }
 0x566   : > { %9205 = vst [vmem:[#allocation68_spill] sm:$0xff] %v7398_v22 }
 0x567   : > { %v7400_v1 = vpop.f32.mrf.mxu1 }
 0x568   : > { %9206 = vst [vmem:[#allocation71_spill] sm:$0xff] %v7400_v1  ;;  %4628 = vmatmul.mubr.msk.f32.gmra.mxu1 %vm1041_vm0, %v7049_v16 }
 0x569   : > { %v7404_v9 = vpop.f32.mrf.mxu1 }
 0x56a   : > { %9207 = vst [vmem:[#allocation69_spill] sm:$0xff] %v7404_v9 }
 0x56b   : > { %v1806_v48 = vpop.f32.mrf.mxu1 }
 0x56c   : > { %v7409_v7 = vadd.f32 %v1806_v48, %v9208_v44 }
 0x56d   : > { %v1808_v61 = vpop.f32.mrf.mxu1 }
 0x56e   : > { %v7412_v4 = vadd.f32 %v1808_v61, %v9209_v17 }
 0x56f   : > { %v1812_v38 = vpop.f32.mrf.mxu1 }
 0x570   : > { %v1901_v14 = vmax.f32 %v7409_v7, %v7412_v4  ;;  %v7419_v16 = vadd.f32 %v1812_v38, %v9208_v44  ;;  %v7470_v38 = vpop.permute.xlu1 %3022 }
 0x571   : > { %v1814_v6 = vpop.f32.mrf.mxu1 }
 0x572   : > { %v7422_v55 = vadd.f32 %v1814_v6, %v9209_v17  ;;  %1902 = vmax.xlane.f32.xlu1 %v1901_v14  ;;  %v7472_v6 = vpop.permute.xlu0 %3010 }
 0x573   : > { %v1818_v56 = vpop.f32.mrf.mxu1  ;;  %9214 = vst [vmem:[#allocation88_spill] sm:$0xff] %v7472_v6 }
 0x574   : > { %v1904_v41 = vmax.f32 %v7419_v16, %v7422_v55  ;;  %v7429_v28 = vadd.f32 %v1818_v56, %v9208_v44 }
 0x575   : > { %v1820_v52 = vpop.f32.mrf.mxu1 }
 0x576   : > { %v7432_v54 = vadd.f32 %v1820_v52, %v9209_v17  ;;  %1905 = vmax.xlane.f32.xlu0 %v1904_v41  ;;  %v3783_v41 = vld [vmem:[#allocation3 + $0x8] sm:$0xff] }
 0x577   : > { %v7436_v3 = vpop.f32.mrf.mxu1 }
 0x578   : > { %v1907_v53 = vmax.f32 %v7429_v28, %v7432_v54 }
 0x579   : > { %v7440_v49 = vpop.f32.mrf.mxu1 }
 0x57a   : > { %1908 = vmax.xlane.f32.xlu1 %v1907_v53 }
 0x57b   : > { %v1830_v25 = vpop.f32.mrf.mxu1 }
 0x57c   : > { %v7447_v34 = vadd.f32 %v1830_v25, %v9208_v44 }
 0x57d   : > { %v1832_v20 = vpop.f32.mrf.mxu1 }
 0x57e   : > { %9210 = vst [vmem:[#allocation40_spill] sm:$0xff] %v7447_v34  ;;  %v7450_v13 = vadd.f32 %v1832_v20, %v9209_v17  ;;  %v7480_v20 = vpop.permute.xlu1 %3020 }
 0x57f   : > { %v1836_v58 = vpop.f32.mrf.mxu1 }
 0x580   : > { %9211 = vst [vmem:[#allocation79_spill] sm:$0xff] %v7450_v13  ;;  %v1913_v27 = vmax.f32 %v7447_v34, %v7450_v13  ;;  %v7457_v57 = vadd.f32 %v1836_v58, %v9208_v44 }
 0x581   : > { %v1838_v24 = vpop.f32.mrf.mxu1 }
 0x582   : > { %9212 = vst [vmem:[#allocation48_spill] sm:$0xff] %v7457_v57  ;;  %v7460_v32 = vadd.f32 %v1838_v24, %v9209_v17  ;;  %1914 = vmax.xlane.f32.xlu1 %v1913_v27  ;;  %v7497_v1 = vpop.permute.xlu1 %3050 }
 0x583   : > { %v7464_v33 = vpop.f32.mrf.mxu1 }
 0x584   : > { %9213 = vst [vmem:[#allocation47_spill] sm:$0xff] %v7460_v32  ;;  %v1916_v48 = vmax.f32 %v7457_v57, %v7460_v32  ;;  %v3781_v32 = vld [vmem:[#allocation3 + $0xe8] sm:$0xff] }
 0x585   : > { %v7468_v61 = vpop.f32.mrf.mxu1 }
 0x586   : > { %1917 = vmax.xlane.f32.xlu1 %v1916_v48 }
 0x587   : > { %v1848_v14 = vpop.f32.mrf.mxu1 }
 0x588   : > { %v7475_v52 = vadd.f32 %v1848_v14, %v9208_v44  ;;  %v7491_v14 = vpop.permute.xlu0 %3040 }
 0x589   : > { %v1850_v56 = vpop.f32.mrf.mxu1  ;;  %9219 = vst [vmem:[#allocation53_spill] sm:$0xff] %v7491_v14 }
 0x58a   : > { %9215 = vst [vmem:[#allocation49_spill] sm:$0xff] %v7475_v52  ;;  %v7478_v53 = vadd.f32 %v1850_v56, %v9209_v17 }
 0x58b   : > { %v1854_v25 = vpop.f32.mrf.mxu1 }
 0x58c   : > { %9216 = vst [vmem:[#allocation85_spill] sm:$0xff] %v7478_v53  ;;  %v1922_v58 = vmax.f32 %v7475_v52, %v7478_v53  ;;  %3851 = vrot.lane.b32.xlu0 %v3783_v41, %s5983_s4  ;;  %v7486_v24 = vadd.f32 %v1854_v25, %v9208_v44  ;;  %v7499_v43 = vpop.permute.xlu0 %3008 }
 0x58d   : > { %v1856_v27 = vpop.f32.mrf.mxu1  ;;  %9220 = vst [vmem:[#allocation50_spill] sm:$0xff] %v7499_v43 }
 0x58e   : > { %9217 = vst [vmem:[#allocation37_spill] sm:$0xff] %v7486_v24  ;;  %v7489_v48 = vadd.f32 %v1856_v27, %v9209_v17  ;;  %1923 = vmax.xlane.f32.xlu1 %v1922_v58  ;;  %v7507_v27 = vpop.permute.xlu1 %3014 }
 0x58f   : > { %v7493_v56 = vpop.f32.mrf.mxu1 }
 0x590   : > { %9218 = vst [vmem:[#allocation38_spill] sm:$0xff] %v7489_v48  ;;  %v1925_v9 = vmax.f32 %v7486_v24, %v7489_v48  ;;  %v7517_v26 = vpop.permute.xlu0 %3038 }
 0x591   : > { %v1862_v46 = vpop.f32.mrf.mxu1  ;;  %9225 = vst [vmem:[#allocation74_spill] sm:$0xff] %v7517_v26 }
 0x592   : > { %1926 = vmax.xlane.f32.xlu1 %v1925_v9  ;;  %v7521_v63 = vpop.permute.xlu1 %3044 }
 0x593   : > { %v1866_v41 = vpop.f32.mrf.mxu1 }
 0x594   : > { %v7502_v22 = vadd.f32 %v1866_v41, %v9208_v44  ;;  %v7535_v12 = vpop.permute.xlu0 %3032 }
 0x595   : > { %v1868_v25 = vpop.f32.mrf.mxu1  ;;  %9230 = vst [vmem:[#allocation81_spill] sm:$0xff] %v7535_v12 }
 0x596   : > { %9221 = vst [vmem:[#allocation57_spill] sm:$0xff] %v7502_v22  ;;  %v7505_v58 = vadd.f32 %v1868_v25, %v9209_v17 }
 0x597   : > { %v1872_v51 = vpop.f32.mrf.mxu1 }
 0x598   : > { %9222 = vst [vmem:[#allocation55_spill] sm:$0xff] %v7505_v58  ;;  %v1931_v37 = vmax.f32 %v7502_v22, %v7505_v58  ;;  %v7512_v2 = vadd.f32 %v1872_v51, %v9208_v44 }
 0x599   : > { %v1874_v5 = vpop.f32.mrf.mxu1 }
 0x59a   : > { %9223 = vst [vmem:[#allocation64_spill] sm:$0xff] %v7512_v2  ;;  %v7515_v9 = vadd.f32 %v1874_v5, %v9209_v17  ;;  %1932 = vmax.xlane.f32.xlu1 %v1931_v37 }
 0x59b   : > { %v1878_v41 = vpop.f32.mrf.mxu1 }
 0x59c   : > { %9224 = vst [vmem:[#allocation61_spill] sm:$0xff] %v7515_v9  ;;  %v1934_v25 = vmax.f32 %v7512_v2, %v7515_v9  ;;  %v7524_v21 = vadd.f32 %v1878_v41, %v9208_v44 }
 0x59d   : > { %v1880_v31 = vpop.f32.mrf.mxu1 }
 0x59e   : > { %9226 = vst [vmem:[#allocation72_spill] sm:$0xff] %v7524_v21  ;;  %v7526_v50 = vpop.f32.mrf.mxu0  ;;  %v7529_v51 = vadd.f32 %v1880_v31, %v9209_v17  ;;  %1935 = vmax.xlane.f32.xlu1 %v1934_v25  ;;  %v7545_v31 = vpop.permute.xlu1 %3042 }
 0x59f   : > { %9227 = vst [vmem:[#allocation78_spill] sm:$0xff] %v7526_v50  ;;  %v1884_v5 = vpop.f32.mrf.mxu1 }
 0x5a0   : > { %9228 = vst [vmem:[#allocation76_spill] sm:$0xff] %v7529_v51  ;;  %v1937_v37 = vmax.f32 %v7524_v21, %v7529_v51  ;;  %v7533_v39 = vpop.f32.mrf.mxu0  ;;  %v7538_v15 = vadd.f32 %v1884_v5, %v9208_v44  ;;  %v7567_v21 = vadd.f32 %v7436_v3, %v9208_v44 }
 0x5a1   : > { %9229 = vst [vmem:[#allocation84_spill] sm:$0xff] %v7533_v39  ;;  %v1886_v30 = vpop.f32.mrf.mxu1  ;;  %v7553_v39 = vadd.f32 %v7440_v49, %v9209_v17 }
 0x5a2   : > { %9231 = vst [vmem:[#allocation29_spill] sm:$0xff] %v7538_v15  ;;  %v7540_v41 = vpop.f32.mrf.mxu0  ;;  %v7543_v50 = vadd.f32 %v1886_v30, %v9209_v17  ;;  %1938 = vmax.xlane.f32.xlu1 %v1937_v37  ;;  %v7563_v37 = vpop.permute.xlu0 %3905  ;;  %9240 = vst [vmem:[#allocation62_spill] sm:$0xff] %v7567_v21 }
 0x5a3   : > { %9232 = vst [vmem:[#allocation87_spill] sm:$0xff] %v7540_v41  ;;  %v1890_v25 = vpop.f32.mrf.mxu1  ;;  %9235 = vst [vmem:[#allocation54_spill] sm:$0xff] %v7553_v39 }
 0x5a4   : > { %9233 = vst [vmem:[#allocation39_spill] sm:$0xff] %v7543_v50  ;;  %v1940_v62 = vmax.f32 %v7538_v15, %v7543_v50  ;;  %v7549_v42 = vpop.f32.mrf.mxu0  ;;  %v7556_v0 = vadd.f32 %v1890_v25, %v9208_v44  ;;  %9239 = vst [vmem:[#allocation67_spill] sm:$0xff] %v7563_v37  ;;  %v1910_v25 = vmax.f32 %v7567_v21, %v7553_v39 }
 0x5a5   : > { %9234 = vst [vmem:[#allocation42_spill] sm:$0xff] %v7549_v42  ;;  %v1892_v5 = vpop.f32.mrf.mxu1 }
 0x5a6   : > { %9236 = vst [vmem:[#allocation52_spill] sm:$0xff] %v7556_v0  ;;  %v7561_v30 = vadd.f32 %v1892_v5, %v9209_v17  ;;  %1941 = vmax.xlane.f32.xlu1 %v1940_v62  ;;  %v7577_v5 = vadd.f32 %v7468_v61, %v9209_v17  ;;  %v7579_v62 = vpop.permute.xlu1 %3006  ;;  %v7597_v24 = vpop.permute.xlu0 %3903 }
 0x5a7   : > { %v7558_v41 = vpop.f32.mrf.mxu0  ;;  %v1896_v42 = vpop.f32.mrf.mxu1  ;;  %9243 = vst [vmem:[#allocation80_spill] sm:$0xff] %v7579_v62  ;;  %9249 = vst [vmem:[#allocation89_spill] sm:$0xff] %v7597_v24 }
 0x5a8   : > { %9237 = vst [vmem:[#allocation59_spill] sm:$0xff] %v7558_v41  ;;  %9238 = vst [vmem:[#allocation56_spill] sm:$0xff] %v7561_v30  ;;  %v1943_v49 = vmax.f32 %v7556_v0, %v7561_v30  ;;  %v7582_v22 = vadd.f32 %v1896_v42, %v9208_v44 }
 0x5a9   : > { %v7571_v51 = vpop.f32.mrf.mxu0  ;;  %9242 = vst [vmem:[#allocation73_spill] sm:$0xff] %v7577_v5  ;;  %v1898_v41 = vpop.f32.mrf.mxu1 }
 0x5aa   : > { %9241 = vst [vmem:[#allocation75_spill] sm:$0xff] %v7571_v51  ;;  %9244 = vst [vmem:[#allocation77_spill] sm:$0xff] %v7582_v22  ;;  %v7587_v58 = vadd.f32 %v1898_v41, %v9209_v17  ;;  %1944 = vmax.xlane.f32.xlu1 %v1943_v49  ;;  %v7591_v51 = vadd.f32 %v7464_v33, %v9208_v44  ;;  %v7602_v41 = vadd.f32 %v1862_v46, %v9209_v17  ;;  %v7625_v53 = vpop.permute.xlu0 %3901 }
 0x5ab   : > { %v7584_v3 = vpop.f32.mrf.mxu0  ;;  %v2649_v0 = vpop.f32.mrf.mxu1  ;;  %1911 = vmax.xlane.f32.xlu0 %v1910_v25  ;;  %v7608_v33 = vadd.f32 %v7493_v56, %v9208_v44  ;;  %9258 = vst [vmem:[#allocation98_spill] sm:$0xff] %v7625_v53 }
 0x5ac   : > { %9245 = vst [vmem:[#allocation86_spill] sm:$0xff] %v7584_v3  ;;  %9246 = vst [vmem:[#allocation83_spill] sm:$0xff] %v7587_v58  ;;  %v1946_v61 = vmax.f32 %v7582_v22, %v7587_v58  ;;  %v1919_v42 = vmax.f32 %v7591_v51, %v7577_v5  ;;  %v7610_v25 = vpop.permute.xlu1 %3036 }
 0x5ad   : > { %9247 = vst [vmem:[#allocation32_spill] sm:$0xff] %v7591_v51  ;;  %v7595_v30 = vpop.f32.mrf.mxu0  ;;  %9250 = vst [vmem:[#allocation90_spill] sm:$0xff] %v7602_v41  ;;  %v2651_v49 = vpop.f32.mrf.mxu1  ;;  %v1928_v24 = vmax.f32 %v7608_v33, %v7602_v41 }
 0x5ae   : > { %9248 = vst [vmem:[#allocation33_spill] sm:$0xff] %v7595_v30  ;;  %1947 = vmax.xlane.f32.xlu1 %v1946_v61  ;;  %9252 = vst [vmem:[#allocation92_spill] sm:$0xff] %v7608_v33  ;;  %v7617_v46 = vadd.f32 %v2651_v49, %v9209_v17 }
 0x5af   : > { %v7604_v3 = vpop.f32.mrf.mxu0  ;;  %9253 = vst [vmem:[#allocation93_spill] sm:$0xff] %v7610_v25  ;;  %1920 = vmax.xlane.f32.xlu0 %v1919_v42  ;;  %v7628_v42 = vadd.f32 %v2649_v0, %v9208_v44 }
 0x5b0   : > { %9251 = vst [vmem:[#allocation91_spill] sm:$0xff] %v7604_v3  ;;  %v2655_v48 = vpop.f32.mrf.mxu1  ;;  %9255 = vst [vmem:[#allocation95_spill] sm:$0xff] %v7617_v46  ;;  %v7632_v41 = vpop.permute.xlu1 %3004 }
 0x5b1   : > { %v7612_v30 = vpop.f32.mrf.mxu0  ;;  %v7620_v3 = vadd.f32 %v2655_v48, %v9208_v44  ;;  %9259 = vst [vmem:[#allocation99_spill] sm:$0xff] %v7628_v42  ;;  %9260 = vst [vmem:[#allocation100_spill] sm:$0xff] %v7632_v41  ;;  %v2744_v48 = vmax.f32 %v7628_v42, %v7617_v46 }
 0x5b2   : > { %9254 = vst [vmem:[#allocation94_spill] sm:$0xff] %v7612_v30  ;;  %v2657_v52 = vpop.f32.mrf.mxu1 }
 0x5b3   : > { %9256 = vst [vmem:[#allocation96_spill] sm:$0xff] %v7620_v3  ;;  %v4717_v61 = vpop.f32.mrf.mxu0  ;;  %v7623_v56 = vadd.f32 %v2657_v52, %v9209_v17  ;;  %1929 = vmax.xlane.f32.xlu0 %v1928_v24 }
 0x5b4   : > { %v2661_v30 = vpop.f32.mrf.mxu1 }
 0x5b5   : > { %9257 = vst [vmem:[#allocation97_spill] sm:$0xff] %v7623_v56  ;;  %v2747_v51 = vmax.f32 %v7620_v3, %v7623_v56  ;;  %v4718_v49 = vpop.f32.mrf.mxu0  ;;  %v7639_v5 = vadd.f32 %v2661_v30, %v9208_v44  ;;  %v7648_v3 = vpop.permute.xlu0 %3869 }
 0x5b6   : > { %v7636_v33 = vadd.f32 %v4718_v49, %v4717_v61  ;;  %v2663_v52 = vpop.f32.mrf.mxu1  ;;  %9264 = vst [vmem:[#allocation104_spill] sm:$0xff] %v7648_v3  ;;  %v7652_v61 = vpop.permute.xlu1 %3034 }
 0x5b7   : > { %9262 = vst [vmem:[#allocation102_spill] sm:$0xff] %v7639_v5  ;;  %v7642_v0 = vadd.f32 %v2663_v52, %v9209_v17  ;;  %2748 = vmax.xlane.f32.xlu1 %v2747_v51  ;;  %2745 = vmax.xlane.f32.xlu0 %v2744_v48  ;;  %9265 = vst [vmem:[#allocation105_spill] sm:$0xff] %v7652_v61 }
 0x5b8   : > { %9261 = vst [vmem:[#allocation101_spill] sm:$0xff] %v7636_v33  ;;  %v7644_v24 = vpop.f32.mrf.mxu1 }
 0x5b9   : > { %9263 = vst [vmem:[#allocation103_spill] sm:$0xff] %v7642_v0  ;;  %v2750_v53 = vmax.f32 %v7639_v5, %v7642_v0  ;;  %v7654_v33 = vpop.permute.xlu0 %3899  ;;  %v3782_v5 = vld [vmem:[#allocation3 + $0x78] sm:$0xff] }
 0x5ba   : > { %v7650_v56 = vpop.f32.mrf.mxu1  ;;  %9266 = vst [vmem:[#allocation106_spill] sm:$0xff] %v7654_v33  ;;  %v7658_v51 = vpop.permute.xlu1 %3002 }
 0x5bb   : > { %2751 = vmax.xlane.f32.xlu0 %v2750_v53  ;;  %9267 = vst [vmem:[#allocation107_spill] sm:$0xff] %v7658_v51  ;;  %v3797_v53 = vld [vmem:[#allocation3 + $0x50] sm:$0xff] }
 0x5bc   : > { %v2673_v49 = vpop.f32.mrf.mxu1 }
 0x5bd   : > { %v7662_v46 = vpop.permute.xlu0 %3867  ;;  %v7726_v2 = vadd.f32 %v2673_v49, %v9208_v44 }
 0x5be   : > { %v2675_v30 = vpop.f32.mrf.mxu1  ;;  %9268 = vst [vmem:[#allocation108_spill] sm:$0xff] %v7662_v46  ;;  %v7664_v0 = vpop.permute.xlu1 %3000  ;;  %v3798_v46 = vld [vmem:[#allocation3 + $0xa0] sm:$0xff] }
 0x5bf   : > { %9269 = vst [vmem:[#allocation109_spill] sm:$0xff] %v7664_v0  ;;  %9283 = vst [vmem:[#allocation123_spill] sm:$0xff] %v7726_v2 }
 0x5c0   : > { %v7656_v52 = vpop.f32.mrf.mxu1 }
 0x5c1   : > { %v7667_v22 = vpop.permute.xlu0 %3897 }
 0x5c2   : > { %v7660_v42 = vpop.f32.mrf.mxu1  ;;  %9270 = vst [vmem:[#allocation110_spill] sm:$0xff] %v7667_v22  ;;  %v7672_v34 = vpop.permute.xlu1 %3873 }
 0x5c3   : > { %9271 = vst [vmem:[#allocation111_spill] sm:$0xff] %v7672_v34 }
 0x5c4   : > { %v2685_v48 = vpop.f32.mrf.mxu1 }
 0x5c5   : > { %v7677_v37 = vpop.permute.xlu0 %3895 }
 0x5c6   : > { %v2687_v3 = vpop.f32.mrf.mxu1  ;;  %9272 = vst [vmem:[#allocation112_spill] sm:$0xff] %v7677_v37  ;;  %v7680_v22 = vpop.permute.xlu1 %3871 }
 0x5c7   : > { %9273 = vst [vmem:[#allocation113_spill] sm:$0xff] %v7680_v22  ;;  %v7733_v43 = vadd.f32 %v2687_v3, %v9209_v17 }
 0x5c8   : > { %v2691_v57 = vpop.f32.mrf.mxu1  ;;  %3849 = vrot.lane.b32.xlu1 %v3782_v5, %s5983_s4  ;;  %v3796_v5 = vld [vmem:[#allocation3 + $0x70] sm:$0xff] }
 0x5c9   : > { %v7687_v15 = vpop.permute.xlu0 %3861  ;;  %9284 = vst [vmem:[#allocation124_spill] sm:$0xff] %v7733_v43 }
 0x5ca   : > { %v2693_v58 = vpop.f32.mrf.mxu1  ;;  %9274 = vst [vmem:[#allocation114_spill] sm:$0xff] %v7687_v15 }
 0x5cc   : > { %v7669_v33 = vpop.f32.mrf.mxu1  ;;  %3879 = vrot.lane.b32.xlu1 %v3797_v53, %s5983_s4  ;;  %v3780_v53 = vld [vmem:[#allocation3 + $0xc8] sm:$0xff] }
 0x5cd   : > { %v7698_v22 = vpop.permute.xlu0 %3891 }
 0x5ce   : > { %v7674_v39 = vpop.f32.mrf.mxu1  ;;  %9276 = vst [vmem:[#allocation116_spill] sm:$0xff] %v7698_v22  ;;  %v7719_v22 = vadd.f32 %v2675_v30, %v9209_v17  ;;  %v7740_v30 = vadd.f32 %v2685_v48, %v9208_v44  ;;  %v7758_v48 = vadd.f32 %v7650_v56, %v9209_v17 }
 0x5d0   : > { %v2703_v21 = vpop.f32.mrf.mxu1  ;;  %3847 = vrot.lane.b32.xlu1 %v3781_v32, %s5983_s4  ;;  %v7692_v32 = vpop.permute.xlu1 %3865  ;;  %9281 = vst [vmem:[#allocation121_spill] sm:$0xff] %v7719_v22  ;;  %9286 = vst [vmem:[#allocation126_spill] sm:$0xff] %v7740_v30  ;;  %v2762_v6 = vmax.f32 %v7740_v30, %v7733_v43 }
 0x5d1   : > { %3881 = vrot.lane.b32.xlu0 %v3798_v46, %s5983_s4  ;;  %9275 = vst [vmem:[#allocation115_spill] sm:$0xff] %v7692_v32  ;;  %v7708_v15 = vpop.permute.xlu0 %3859  ;;  %9291 = vst [vmem:[#allocation131_spill] sm:$0xff] %v7758_v48 }
 0x5d2   : > { %v2705_v13 = vpop.f32.mrf.mxu1  ;;  %9278 = vst [vmem:[#allocation118_spill] sm:$0xff] %v7708_v15 }
 0x5d3   : > { %v7763_v43 = vadd.f32 %v2705_v13, %v9209_v17 }
 0x5d4   : > { %v7682_v50 = vpop.f32.mrf.mxu1  ;;  %3877 = vrot.lane.b32.xlu1 %v3796_v5, %s5983_s4  ;;  %v7702_v5 = vpop.permute.xlu1 %3863 }
 0x5d5   : > { %9277 = vst [vmem:[#allocation117_spill] sm:$0xff] %v7702_v5  ;;  %v7714_v62 = vpop.permute.xlu0 %3889  ;;  %9292 = vst [vmem:[#allocation132_spill] sm:$0xff] %v7763_v43 }
 0x5d6   : > { %v7685_v34 = vpop.f32.mrf.mxu1  ;;  %9280 = vst [vmem:[#allocation120_spill] sm:$0xff] %v7714_v62 }
 0x5d8   : > { %v7689_v0 = vpop.f32.mrf.mxu1  ;;  %3845 = vrot.lane.b32.xlu1 %v3780_v53, %s5983_s4  ;;  %v7710_v53 = vpop.permute.xlu1 %3893 }
 0x5d9   : > { %9279 = vst [vmem:[#allocation119_spill] sm:$0xff] %v7710_v53  ;;  %v2756_v53 = vmax.f32 %v7726_v2, %v7719_v22  ;;  %v7735_v62 = vpop.permute.xlu0 %3855  ;;  %v7749_v22 = vadd.f32 %v2693_v58, %v9209_v17  ;;  %v7752_v2 = vadd.f32 %v2691_v57, %v9208_v44  ;;  %v7767_v58 = vadd.f32 %v7644_v24, %v9208_v44 }
 0x5da   : > { %v7694_v37 = vpop.f32.mrf.mxu1  ;;  %9285 = vst [vmem:[#allocation125_spill] sm:$0xff] %v7735_v62 }
 0x5db   : > { %9288 = vst [vmem:[#allocation128_spill] sm:$0xff] %v7749_v22  ;;  %9289 = vst [vmem:[#allocation129_spill] sm:$0xff] %v7752_v2  ;;  %v2753_v56 = vmax.f32 %v7767_v58, %v7758_v48 }
 0x5dc   : > { %v7696_v46 = vpop.f32.mrf.mxu1  ;;  %v7721_v5 = vpop.permute.xlu1 %3857  ;;  %9293 = vst [vmem:[#allocation133_spill] sm:$0xff] %v7767_v58 }
 0x5dd   : > { %9282 = vst [vmem:[#allocation122_spill] sm:$0xff] %v7721_v5  ;;  %v7754_v62 = vpop.permute.xlu0 %3853 }
 0x5de   : > { %v7700_v12 = vpop.f32.mrf.mxu1  ;;  %9290 = vst [vmem:[#allocation130_spill] sm:$0xff] %v7754_v62 }
 0x5e0   : > { %v7704_v51 = vpop.f32.mrf.mxu1  ;;  %v7742_v5 = vpop.permute.xlu1 %3887 }
 0x5e1   : > { %9287 = vst [vmem:[#allocation127_spill] sm:$0xff] %v7742_v5  ;;  %v2765_v5 = vmax.f32 %v7752_v2, %v7749_v22  ;;  %v7780_v2 = vadd.f32 %v7660_v42, %v9209_v17  ;;  %v7786_v62 = vpop.permute.xlu0 %3883 }
 0x5e2   : > { %v7706_v61 = vpop.f32.mrf.mxu1  ;;  %9296 = vst [vmem:[#allocation136_spill] sm:$0xff] %v7786_v62 }
 0x5e4   : > { %v2733_v41 = vpop.f32.mrf.mxu1  ;;  %v7769_v57 = vpop.permute.xlu1 %3885 }
 0x5e5   : > { %9294 = vst [vmem:[#allocation134_spill] sm:$0xff] %v7769_v57  ;;  %v7796_v42 = vadd.f32 %v2733_v41, %v9208_v44 }
 0x5e6   : > { %v2735_v32 = vpop.f32.mrf.mxu1 }
 0x5e7   : > { %v7789_v57 = vadd.f32 %v2735_v32, %v9209_v17  ;;  %v7804_v32 = vadd.f32 %v7674_v39, %v9209_v17 }
 0x5e8   : > { %v7712_v25 = vpop.f32.mrf.mxu1 }
 0x5e9   : > { %9297 = vst [vmem:[#allocation137_spill] sm:$0xff] %v7789_v57 }
 0x5ea   : > { %v7716_v9 = vpop.f32.mrf.mxu1 }
 0x5ec   : > { %v7723_v26 = vpop.f32.mrf.mxu1 }
 0x5ee   : > { %v7728_v15 = vpop.f32.mrf.mxu1 }
 0x5f0   : > { %v7737_v14 = vpop.f32.mrf.mxu1  ;;  %2757 = vmax.xlane.f32.xlu0 %v2756_v53 }
 0x5f2   : > { %v7744_v49 = vpop.f32.mrf.mxu1 }
 0x5f4   : > { %v3504_v3 = vpop.f32.mrf.mxu1  ;;  %2763 = vmax.xlane.f32.xlu0 %v2762_v6  ;;  %v7774_v6 = vadd.f32 %v2703_v21, %v9208_v44  ;;  %v7793_v21 = vadd.f32 %v7656_v52, %v9208_v44 }
 0x5f5   : > { %v7818_v39 = vadd.f32 %v3504_v3, %v9208_v44 }
 0x5f6   : > { %v3506_v53 = vpop.f32.mrf.mxu1  ;;  %9295 = vst [vmem:[#allocation135_spill] sm:$0xff] %v7774_v6  ;;  %v2771_v24 = vmax.f32 %v7774_v6, %v7763_v43  ;;  %v2759_v6 = vmax.f32 %v7793_v21, %v7780_v2 }
 0x5f7   : > { %v7809_v43 = vadd.f32 %v3506_v53, %v9209_v17 }
 0x5f8   : > { %v7771_v30 = vpop.f32.mrf.mxu1  ;;  %2766 = vmax.xlane.f32.xlu0 %v2765_v5 }
 0x5f9   : > { %v3593_v3 = vmax.f32 %v7818_v39, %v7809_v43 }
 0x5fa   : > { %v7782_v13 = vpop.f32.mrf.mxu1 }
 0x5fb   : > { %v1903_v22 = vpop.xlane.xlu1 %1902 }
 0x5fc   : > { %v3516_v5 = vpop.f32.mrf.mxu1  ;;  %2754 = vmax.xlane.f32.xlu1 %v2753_v56  ;;  %v1949_v48 = vsub.f32 %v7409_v7, %v1903_v22  ;;  %v1950_v58 = vsub.f32 %v7412_v4, %v1903_v22  ;;  %2772 = vmax.xlane.f32.xlu0 %v2771_v24  ;;  %v2786_v56 = vmax.f32 %v7796_v42, %v7789_v57 }
 0x5fd   : > { %v7813_v22 = vadd.f32 %v7669_v33, %v9208_v44 }
 0x5fe   : > { %v3518_v52 = vpop.f32.mrf.mxu1  ;;  %v1981_v41 = vmul.f32 1.442695, %v1949_v48  ;;  %v1983_v62 = vmul.f32 1.442695, %v1950_v58  ;;  %v7825_v48 = vadd.f32 %v7685_v34, %v9209_v17 }
 0x5ff   : > { %v1906_v4 = vpop.xlane.xlu0 %1905  ;;  %v2768_v53 = vmax.f32 %v7813_v22, %v7804_v32 }
 0x600   : > { %v7815_v7 = vpop.f32.mrf.mxu1  ;;  %2760 = vmax.xlane.f32.xlu1 %v2759_v6  ;;  %5401 = vpow2.f32 %v1981_v41  ;;  %v1951_v24 = vsub.f32 %v7419_v16, %v1906_v4  ;;  %2787 = vmax.xlane.f32.xlu0 %v2786_v56  ;;  %v1952_v33 = vsub.f32 %v7422_v55, %v1906_v4  ;;  %v7833_v6 = vadd.f32 %v3518_v52, %v9209_v17 }
 0x601   : > { %5403 = vpow2.f32 %v1983_v62  ;;  %v7837_v56 = vadd.f32 %v7682_v50, %v9208_v44  ;;  %v7840_v62 = vadd.f32 %v3516_v5, %v9208_v44  ;;  %v7847_v4 = vadd.f32 %v7694_v37, %v9209_v17 }
 0x602   : > { %v7828_v58 = vpop.f32.mrf.mxu1  ;;  %v1985_v16 = vmul.f32 1.442695, %v1951_v24  ;;  %v1987_v41 = vmul.f32 1.442695, %v1952_v33 }
 0x603   : > { %v1909_v34 = vpop.xlane.xlu1 %1908  ;;  %v2774_v52 = vmax.f32 %v7837_v56, %v7825_v48 }
 0x604   : > { %v3528_v57 = vpop.f32.mrf.mxu1  ;;  %2769 = vmax.xlane.f32.xlu1 %v2768_v53  ;;  %5405 = vpow2.f32 %v1985_v16  ;;  %v1953_v55 = vsub.f32 %v7429_v28, %v1909_v34  ;;  %3594 = vmax.xlane.f32.xlu0 %v3593_v3  ;;  %v1954_v50 = vsub.f32 %v7432_v54, %v1909_v34  ;;  %v3599_v53 = vmax.f32 %v7840_v62, %v7833_v6 }
 0x605   : > { %5407 = vpow2.f32 %v1987_v41  ;;  %v7857_v28 = vadd.f32 %v7689_v0, %v9208_v44  ;;  %v7860_v37 = vadd.f32 %v3528_v57, %v9208_v44  ;;  %v7866_v41 = vadd.f32 %v7700_v12, %v9209_v17 }
 0x606   : > { %v3530_v24 = vpop.f32.mrf.mxu1  ;;  %v1989_v5 = vmul.f32 1.442695, %v1953_v55  ;;  %v1991_v3 = vmul.f32 1.442695, %v1954_v50  ;;  %v7875_v57 = vadd.f32 %v7696_v46, %v9208_v44 }
 0x607   : > { %v7853_v33 = vadd.f32 %v3530_v24, %v9209_v17  ;;  %9299 = vst [vmem:[#allocation139_spill] sm:$0xff] %v7860_v37  ;;  %v2777_v54 = vmax.f32 %v7857_v28, %v7847_v4 }
 0x608   : > { %v3534_v16 = vpop.f32.mrf.mxu1  ;;  %2775 = vmax.xlane.f32.xlu1 %v2774_v52  ;;  %5409 = vpow2.f32 %v1989_v5  ;;  %3600 = vmax.xlane.f32.xlu0 %v3599_v53  ;;  %v2780_v24 = vmax.f32 %v7875_v57, %v7866_v41  ;;  %v7886_v5 = vadd.f32 %v7706_v61, %v9209_v17 }
 0x609   : > { %9298 = vst [vmem:[#allocation138_spill] sm:$0xff] %v7853_v33  ;;  %5411 = vpow2.f32 %v1991_v3  ;;  %v3605_v0 = vmax.f32 %v7860_v37, %v7853_v33  ;;  %v7878_v52 = vadd.f32 %v3534_v16, %v9208_v44 }
 0x60a   : > { %v3536_v34 = vpop.f32.mrf.mxu1 }
 0x60b   : > { %v7871_v55 = vadd.f32 %v3536_v34, %v9209_v17  ;;  %9301 = vst [vmem:[#allocation141_spill] sm:$0xff] %v7878_v52  ;;  %v7890_v3 = vpop.xlane.xlu1 %1914 }
 0x60c   : > { %2778 = vmax.xlane.f32.xlu1 %v2777_v54  ;;  %v7880_v50 = vpop.f32.mrf.mxu1  ;;  %3606 = vmax.xlane.f32.xlu0 %v3605_v0  ;;  %v7896_v54 = vadd.f32 %v7704_v51, %v9208_v44 }
 0x60d   : > { %9300 = vst [vmem:[#allocation140_spill] sm:$0xff] %v7871_v55  ;;  %v5402_v12 = vpop.eup %5401  ;;  %v3608_v46 = vmax.f32 %v7878_v52, %v7871_v55 }
 0x60e   : > { %v5404_v53 = vpop.eup %5403  ;;  %9302 = vst [vmem:[#allocation142_spill] sm:$0xff] %v7896_v54  ;;  %v7898_v34 = vpop.f32.mrf.mxu1  ;;  %v2783_v55 = vmax.f32 %v7896_v54, %v7886_v5  ;;  %v9337_v54 = vld [vmem:[#allocation92_spill] sm:$0xff] }
 0x60f   : > { %2317 = vmatprep.mubr.f32.mxu0 %v5404_v53  ;;  %v7892_v16 = vadd.f32 %v5404_v53, %v5402_v12 }
 0x610   : > { %2781 = vmax.xlane.f32.xlu1 %v2780_v24  ;;  %2318 = vmatmul.mubr.f32.vlgmr.msra.gmra.mxu0 %v5402_v12  ;;  %v7905_v24 = vadd.f32 %v7716_v9, %v9209_v17  ;;  %v7913_v12 = vadd.f32 %v7712_v25, %v9208_v44 }
 0x611   : > { %3609 = vmax.xlane.f32.xlu0 %v3608_v46  ;;  %v5406_v0 = vpop.eup %5405  ;;  %4831 = vmatpush3.msra.mxu0 %v7356_v47  ;;  %v7915_v47 = vpop.f32.mrf.mxu1 }
 0x612   : > { %v5408_v61 = vpop.eup %5407  ;;  %9303 = vst [vmem:[#allocation143_spill] sm:$0xff] %v7905_v24  ;;  %4832 = vmatprep.subr.mxu0 %v7424_v11  ;;  %9304 = vst [vmem:[#allocation144_spill] sm:$0xff] %v7913_v12  ;;  %v7918_v46 = vpop.xlane.xlu1 %1917  ;;  %v2789_v11 = vmax.f32 %v7913_v12, %v7905_v24 }
 0x613   : > { %4833 = vmatpush3.msra.mxu0 %v7442_v18  ;;  %2322 = vmatprep.mubr.f32.mxu0 %v5408_v61  ;;  %v7909_v51 = vadd.f32 %v5408_v61, %v5406_v0  ;;  %v7924_v18 = vadd.f32 %v7728_v15, %v9209_v17  ;;  %v9315_v61 = vld [vmem:[#allocation74_spill] sm:$0xff] }
 0x614   : > { %4834 = vmatprep.subr.mxu0 %v7452_v23  ;;  %2784 = vmax.xlane.f32.xlu1 %v2783_v55  ;;  %v7932_v23 = vadd.f32 %v7723_v26, %v9208_v44  ;;  %v7934_v55 = vpop.f32.mrf.mxu1  ;;  %v7950_v26 = vadd.f32 %v7737_v14, %v9208_v44  ;;  %v3795_v14 = vld [vmem:[#allocation3 + $0x10] sm:$0xff] }
 0x615   : > { %v5410_v53 = vpop.eup %5409  ;;  %2323 = vmatmul.mubr.f32.gmra.mxu0 %v5406_v0  ;;  %v9314_v0 = vld [vmem:[#allocation64_spill] sm:$0xff] }
 0x616   : > { %v5412_v9 = vpop.eup %5411  ;;  %4835 = vmatpush3.msra.mxu0 %v7364_v40  ;;  %v3587_v40 = vmax.f32 %v7932_v23, %v7924_v18  ;;  %9306 = vst [vmem:[#allocation146_spill] sm:$0xff] %v7950_v26 }
 0x617   : > { %4836 = vmatprep.subr.mxu0 %v7369_v29  ;;  %2327 = vmatprep.mubr.f32.mxu0 %v5412_v9  ;;  %v7928_v25 = vadd.f32 %v5412_v9, %v5410_v53  ;;  %v7938_v15 = vpop.xlane.xlu1 %1923  ;;  %v7944_v29 = vadd.f32 %v7744_v49, %v9209_v17  ;;  %v7960_v49 = vadd.f32 %v7782_v13, %v9209_v17  ;;  %v9317_v9 = vld [vmem:[#allocation80_spill] sm:$0xff] }
 0x618   : > { %4837 = vmatpush3.msra.mxu0 %v7377_v45  ;;  %2790 = vmax.xlane.f32.xlu1 %v2789_v11  ;;  %v7952_v45 = vpop.f32.mrf.mxu1 }
 0x619   : > { %4838 = vmatprep.subr.mxu0 %v7382_v60  ;;  %2328 = vmatmul.mubr.f32.gmra.mxu0 %v5410_v53  ;;  %9305 = vst [vmem:[#allocation145_spill] sm:$0xff] %v7944_v29  ;;  %v3590_v60 = vmax.f32 %v7950_v26, %v7944_v29  ;;  %9307 = vst [vmem:[#allocation147_spill] sm:$0xff] %v7960_v49 }
 0x61a   : > { %4839 = vmatpush3.msra.mxu0 %v7470_v38  ;;  %v7968_v38 = vadd.f32 %v7771_v30, %v9208_v44 }
 0x61b   : > { %4840 = vmatprep.subr.mxu0 %v7396_v36  ;;  %v7963_v36 = vpop.xlane.xlu1 %1926 }
 0x61c   : > { %4841 = vmatpush3.msra.mxu0 %v7480_v20  ;;  %3588 = vmax.xlane.f32.xlu1 %v3587_v40  ;;  %9308 = vst [vmem:[#allocation148_spill] sm:$0xff] %v7968_v38  ;;  %v7970_v20 = vpop.f32.mrf.mxu1 }
 0x61d   : > { %4842 = vmatprep.subr.mxu0 %v7497_v1  ;;  %v3596_v1 = vmax.f32 %v7968_v38, %v7960_v49 }
 0x61e   : > { %4843 = vmatpush3.msra.mxu0 %v7406_v8  ;;  %v7978_v8 = vadd.f32 %v7828_v58, %v9209_v17  ;;  %v7988_v30 = vpop.f32.mrf.mxu1 }
 0x61f   : > { %4844 = vmatprep.subr.mxu0 %v7416_v10 }
 0x620   : > { %4845 = vmatpush3.msra.mxu0 %v7434_v19  ;;  %3591 = vmax.xlane.f32.xlu1 %v3590_v60  ;;  %9309 = vst [vmem:[#allocation149_spill] sm:$0xff] %v7978_v8  ;;  %v7986_v19 = vadd.f32 %v7815_v7, %v9208_v44  ;;  %v7997_v58 = vpop.f32.mrf.mxu1  ;;  %v9313_v7 = vld [vmem:[#allocation50_spill] sm:$0xff]  ;;  %v9318_v60 = vld [vmem:[#allocation93_spill] sm:$0xff] }
 0x621   : > { %4846 = vmatprep.subr.mxu0 %v7444_v35 }
 0x622   : > { %4847 = vmatpush3.msra.mxu0 %v7507_v27  ;;  %9310 = vst [vmem:[#allocation150_spill] sm:$0xff] %v7986_v19  ;;  %v3602_v35 = vmax.f32 %v7986_v19, %v7978_v8  ;;  %v9311_v27 = vld [vmem:[#allocation88_spill] sm:$0xff] }
 0x623   : > { %4848 = vmatprep.subr.mxu0 %v7521_v63  ;;  %v7982_v10 = vpop.xlane.xlu1 %1932  ;;  %v9312_v63 = vld [vmem:[#allocation53_spill] sm:$0xff] }
 0x624   : > { %4849 = vmatpush3.msra.mxu0 %v7462_v59  ;;  %3597 = vmax.xlane.f32.xlu1 %v3596_v1 }
 0x625   : > { %4850 = vmatprep.subr.mxu0 %v7545_v31  ;;  %v9316_v31 = vld [vmem:[#allocation61_spill] sm:$0xff] }
 0x626   : > { %4851 = vmatpush3.msra.mxu0 %v9311_v27  ;;  %v9319_v27 = vld [vmem:[#allocation100_spill] sm:$0xff] }
 0x627   : > { %3875 = vrot.lane.b32.xlu0 %v3795_v14, %s5983_s4  ;;  %4852 = vmatprep.subr.mxu0 %v9312_v63  ;;  %v1936_v13 = vpop.xlane.xlu1 %1935  ;;  %v8007_v14 = vpop.f32.mrf.mxu1  ;;  %v9321_v63 = vld [vmem:[#allocation107_spill] sm:$0xff] }
 0x628   : > { %4853 = vmatpush3.msra.mxu0 %v9313_v7  ;;  %3603 = vmax.xlane.f32.xlu1 %v3602_v35  ;;  %v1971_v59 = vsub.f32 %v9314_v0, %v1936_v13  ;;  %v1972_v53 = vsub.f32 %v9316_v31, %v1936_v13  ;;  %v9320_v35 = vld [vmem:[#allocation105_spill] sm:$0xff]  ;;  %v8013_v0 = vpop.permute.xlu0 %3851 }
 0x629   : > { %4854 = vmatprep.subr.mxu0 %v9315_v61  ;;  %v9322_v7 = vld [vmem:[#allocation81_spill] sm:$0xff] }
 0x62a   : > { %4855 = vmatpush3.msra.mxu0 %v9317_v9  ;;  %v2025_v11 = vmul.f32 1.442695, %v1971_v59  ;;  %v2027_v40 = vmul.f32 1.442695, %v1972_v53  ;;  %v8015_v59 = vpop.f32.mrf.mxu1  ;;  %v9323_v61 = vld [vmem:[#allocation109_spill] sm:$0xff]  ;;  %v9325_v9 = vld [vmem:[#allocation39_spill] sm:$0xff] }
 0x62b   : > { %4856 = vmatprep.subr.mxu0 %v9318_v60  ;;  %v8005_v1 = vpop.xlane.xlu1 %1938  ;;  %v9324_v31 = vld [vmem:[#allocation29_spill] sm:$0xff]  ;;  %v9326_v60 = vld [vmem:[#allocation79_spill] sm:$0xff] }
 0x62c   : > { %5413 = vpow2.f32 %v2025_v11  ;;  %4857 = vmatpush3.msra.mxu0 %v9319_v27  ;;  %v9327_v27 = vld [vmem:[#allocation67_spill] sm:$0xff] }
 0x62d   : > { %5415 = vpow2.f32 %v2027_v40  ;;  %4858 = vmatprep.subr.mxu0 %v9320_v35  ;;  %v1958_v40 = vsub.f32 %v9326_v60, %v7890_v3  ;;  %v3779_v60 = vld [vmem:[#allocation3 + $0x80] sm:$0xff] }
 0x62e   : > { %4859 = vmatpush3.msra.mxu0 %v9321_v63 }
 0x62f   : > { %4860 = vmatprep.subr.mxu0 %v9322_v7  ;;  %v1942_v13 = vpop.xlane.xlu1 %1941  ;;  %v8025_v7 = vpop.f32.mrf.mxu1  ;;  %v1999_v19 = vmul.f32 1.442695, %v1958_v40  ;;  %v9333_v40 = vld [vmem:[#allocation83_spill] sm:$0xff] }
 0x630   : > { %4861 = vmatpush3.msra.mxu0 %v9323_v61  ;;  %v1975_v53 = vsub.f32 %v9324_v31, %v1942_v13  ;;  %v1976_v11 = vsub.f32 %v9325_v9, %v1942_v13  ;;  %v9328_v61 = vld [vmem:[#allocation62_spill] sm:$0xff]  ;;  %v9330_v13 = vld [vmem:[#allocation40_spill] sm:$0xff] }
 0x631   : > { %4910 = vmatprep.subr.mxu0 %v9327_v27  ;;  %v9329_v31 = vld [vmem:[#allocation54_spill] sm:$0xff]  ;;  %v1957_v9 = vsub.f32 %v9330_v13, %v7890_v3  ;;  %v8033_v12 = vpop.f32.mrf.mxu1  ;;  %v9335_v13 = vld [vmem:[#allocation48_spill] sm:$0xff] }
 0x632   : > { %v2033_v35 = vmul.f32 1.442695, %v1975_v53  ;;  %v2035_v63 = vmul.f32 1.442695, %v1976_v11  ;;  %v9331_v11 = vld [vmem:[#allocation47_spill] sm:$0xff] }
 0x633   : > { %v8023_v52 = vpop.xlane.xlu1 %1944  ;;  %v1960_v29 = vsub.f32 %v9331_v11, %v7918_v46 }
 0x634   : > { %5417 = vpow2.f32 %v2033_v35  ;;  %v1912_v8 = vpop.xlane.xlu0 %1911  ;;  %v9332_v35 = vld [vmem:[#allocation77_spill] sm:$0xff] }
 0x635   : > { %5419 = vpow2.f32 %v2035_v63  ;;  %v1955_v49 = vsub.f32 %v9328_v61, %v1912_v8  ;;  %v1956_v38 = vsub.f32 %v9329_v31, %v1912_v8  ;;  %v2003_v11 = vmul.f32 1.442695, %v1960_v29 }
 0x636   : > { %5421 = vpow2.f32 %v1999_v19 }
 0x637   : > { %v1993_v26 = vmul.f32 1.442695, %v1955_v49  ;;  %v1995_v27 = vmul.f32 1.442695, %v1956_v38  ;;  %v1948_v53 = vpop.xlane.xlu1 %1947  ;;  %v1997_v49 = vmul.f32 1.442695, %v1957_v9 }
 0x638   : > { %v1979_v24 = vsub.f32 %v9332_v35, %v1948_v53  ;;  %v1980_v63 = vsub.f32 %v9333_v40, %v1948_v53  ;;  %v1921_v33 = vpop.xlane.xlu0 %1920  ;;  %v1959_v53 = vsub.f32 %v9335_v13, %v7918_v46  ;;  %v3576_v35 = vpop.f32.mrf.mxu1 }
 0x639   : > { %v8037_v61 = vpop.eup %5413  ;;  %3843 = vrot.lane.b32.xlu1 %v3779_v60, %s5983_s4  ;;  %5423 = vpow2.f32 %v1993_v26  ;;  %v9336_v60 = vld [vmem:[#allocation73_spill] sm:$0xff]  ;;  %v9338_v26 = vld [vmem:[#allocation90_spill] sm:$0xff] }
 0x63a   : > { %v8040_v3 = vpop.eup %5415  ;;  %v2041_v38 = vmul.f32 1.442695, %v1979_v24  ;;  %v2043_v8 = vmul.f32 1.442695, %v1980_v63  ;;  %5425 = vpow2.f32 %v1995_v27  ;;  %v1962_v40 = vsub.f32 %v9336_v60, %v1921_v33  ;;  %v9340_v63 = vld [vmem:[#allocation32_spill] sm:$0xff] }
 0x63b   : > { %v8044_v31 = vadd.f32 %v8040_v3, %v8037_v61  ;;  %v8053_v27 = vadd.f32 %v7934_v55, %v9209_v17  ;;  %v1961_v37 = vsub.f32 %v9340_v63, %v1921_v33  ;;  %v2001_v29 = vmul.f32 1.442695, %v1959_v53 }
 0x63c   : > { %5427 = vpow2.f32 %v2041_v38  ;;  %v1930_v19 = vpop.xlane.xlu0 %1929  ;;  %v3578_v38 = vpop.f32.mrf.mxu1 }
 0x63d   : > { %9334 = vst [vmem:[#allocation88_spill] sm:$0xff] %v8044_v31  ;;  %5429 = vpow2.f32 %v2043_v8  ;;  %v1967_v9 = vsub.f32 %v9337_v54, %v1930_v19  ;;  %v1968_v24 = vsub.f32 %v9338_v26, %v1930_v19  ;;  %9339 = vst [vmem:[#allocation53_spill] sm:$0xff] %v8053_v27  ;;  %v8060_v8 = vadd.f32 %v7915_v47, %v9208_v44  ;;  %v9341_v54 = vld [vmem:[#allocation85_spill] sm:$0xff] }
 0x63e   : > { %5431 = vpow2.f32 %v1997_v49  ;;  %v1964_v49 = vsub.f32 %v9341_v54, %v7938_v15  ;;  %v2007_v19 = vmul.f32 1.442695, %v1962_v40  ;;  %v8069_v53 = vadd.f32 %v3578_v38, %v9209_v17  ;;  %v9343_v47 = vld [vmem:[#allocation49_spill] sm:$0xff] }
 0x63f   : > { %v2017_v31 = vmul.f32 1.442695, %v1967_v9  ;;  %v2019_v46 = vmul.f32 1.442695, %v1968_v24  ;;  %5433 = vpow2.f32 %v2003_v11  ;;  %v3614_v33 = vmax.f32 %v8060_v8, %v8053_v27 }
 0x640   : > { %9342 = vst [vmem:[#allocation50_spill] sm:$0xff] %v8069_v53  ;;  %v2005_v11 = vmul.f32 1.442695, %v1961_v37  ;;  %v1963_v9 = vsub.f32 %v9343_v47, %v7938_v15  ;;  %v2011_v40 = vmul.f32 1.442695, %v1964_v49  ;;  %v8080_v24 = vadd.f32 %v3576_v35, %v9208_v44  ;;  %v9346_v15 = vld [vmem:[#allocation37_spill] sm:$0xff] }
 0x641   : > { %v8056_v13 = vpop.eup %5417  ;;  %5435 = vpow2.f32 %v2017_v31  ;;  %v9344_v31 = vld [vmem:[#allocation38_spill] sm:$0xff]  ;;  %v1965_v54 = vsub.f32 %v9346_v15, %v7963_v36 }
 0x642   : > { %v8064_v55 = vpop.eup %5419  ;;  %5437 = vpow2.f32 %v2019_v46  ;;  %v1966_v26 = vsub.f32 %v9344_v31, %v7963_v36  ;;  %9345 = vst [vmem:[#allocation64_spill] sm:$0xff] %v8080_v24  ;;  %v3629_v37 = vmax.f32 %v8080_v24, %v8069_v53  ;;  %v2009_v38 = vmul.f32 1.442695, %v1963_v9  ;;  %v9347_v9 = vld [vmem:[#allocation55_spill] sm:$0xff] }
 0x643   : > { %v8073_v60 = vadd.f32 %v8064_v55, %v8056_v13  ;;  %5439 = vpow2.f32 %v2001_v29  ;;  %v5422_v63 = vpop.eup %5421  ;;  %v2013_v47 = vmul.f32 1.442695, %v1965_v54 }
 0x644   : > { %5441 = vpow2.f32 %v2007_v19  ;;  %v2015_v35 = vmul.f32 1.442695, %v1966_v26 }
 0x645   : > { %5443 = vpow2.f32 %v2005_v11 }
 0x646   : > { %3615 = vmax.xlane.f32.xlu0 %v3614_v33  ;;  %v8082_v46 = vpop.eup %5423  ;;  %5445 = vpow2.f32 %v2011_v40  ;;  %v1970_v40 = vsub.f32 %v9347_v9, %v7982_v10 }
 0x647   : > { %v8086_v29 = vpop.eup %5425  ;;  %5447 = vpow2.f32 %v2009_v38 }
 0x648   : > { %2332 = vmatprep.mubr.f32.mxu0 %v8086_v29  ;;  %5449 = vpow2.f32 %v2015_v35  ;;  %v2023_v54 = vmul.f32 1.442695, %v1970_v40  ;;  %v8120_v40 = vadd.f32 %v7898_v34, %v9209_v17 }
 0x649   : > { %v8090_v49 = vpop.eup %5427  ;;  %2333 = vmatmul.mubr.f32.gmra.mxu0 %v8082_v46  ;;  %5451 = vpow2.f32 %v2013_v47  ;;  %v9349_v47 = vld [vmem:[#allocation76_spill] sm:$0xff] }
 0x64a   : > { %3630 = vmax.xlane.f32.xlu0 %v3629_v37  ;;  %v8093_v19 = vpop.eup %5429  ;;  %2337 = vmatprep.mubr.f32.mxu0 %v5422_v63  ;;  %v9348_v37 = vld [vmem:[#allocation57_spill] sm:$0xff]  ;;  %5453 = vpow2.f32 %v2023_v54  ;;  %v1974_v27 = vsub.f32 %v9349_v47, %v8005_v1  ;;  %v9353_v47 = vld [vmem:[#allocation44_spill] sm:$0xff] }
 0x64b   : > { %v5432_v33 = vpop.eup %5431  ;;  %v8098_v11 = vadd.f32 %v8093_v19, %v8090_v49  ;;  %v1969_v15 = vsub.f32 %v9348_v37, %v7982_v10 }
 0x64c   : > { %v8100_v36 = vpop.eup %5433  ;;  %v2031_v54 = vmul.f32 1.442695, %v1974_v27  ;;  %v9352_v27 = vld [vmem:[#allocation56_spill] sm:$0xff] }
 0x64d   : > { %2338 = vmatmul.mubr.f32.gmra.mxu0 %v5432_v33  ;;  %v2021_v24 = vmul.f32 1.442695, %v1969_v15  ;;  %v8129_v15 = vadd.f32 %v7880_v50, %v9208_v44  ;;  %v8145_v50 = vadd.f32 %v7952_v45, %v9208_v44  ;;  %v9355_v45 = vld [vmem:[#allocation52_spill] sm:$0xff] }
 0x64e   : > { %2046 = vadd.xlane.f32.xlu0 %v7892_v16  ;;  %v5436_v31 = vpop.eup %5435  ;;  %2342 = vmatprep.mubr.f32.mxu0 %v8100_v36  ;;  %v2057_v16 = vadd.f32 %v5432_v33, %v5422_v63  ;;  %v9350_v63 = vld [vmem:[#allocation72_spill] sm:$0xff] }
 0x64f   : > { %v5438_v26 = vpop.eup %5437  ;;  %5455 = vpow2.f32 %v2021_v24  ;;  %v1973_v33 = vsub.f32 %v9350_v63, %v8005_v1  ;;  %v3611_v34 = vmax.f32 %v8129_v15, %v8120_v40  ;;  %v8138_v24 = vadd.f32 %v7970_v20, %v9209_v17 }
 0x650   : > { %v8108_v53 = vadd.f32 %v5438_v26, %v5436_v31  ;;  %v8110_v38 = vpop.eup %5439  ;;  %5457 = vpow2.f32 %v2031_v54  ;;  %v1977_v63 = vsub.f32 %v9355_v45, %v8023_v52  ;;  %v9360_v45 = vld [vmem:[#allocation35_spill] sm:$0xff] }
 0x651   : > { %v5442_v35 = vpop.eup %5441  ;;  %2343 = vmatmul.mubr.f32.gmra.mxu0 %v8110_v38  ;;  %9351 = vst [vmem:[#allocation74_spill] sm:$0xff] %v8138_v24  ;;  %v2029_v1 = vmul.f32 1.442695, %v1973_v33  ;;  %v3617_v20 = vmax.f32 %v8145_v50, %v8138_v24  ;;  %v8161_v33 = vadd.f32 %v7988_v30, %v9208_v44  ;;  %v2746_v24 = vpop.xlane.xlu0 %2745 }
 0x652   : > { %2052 = vadd.xlane.f32.xlu0 %v7928_v25  ;;  %2347 = vmatprep.mubr.f32.mxu0 %v5442_v35  ;;  %v5444_v9 = vpop.eup %5443  ;;  %v2037_v30 = vmul.f32 1.442695, %v1977_v63  ;;  %v8186_v63 = vadd.f32 %v8033_v12, %v9209_v17 }
 0x653   : > { %v8116_v10 = vpop.eup %5445  ;;  %v2063_v25 = vadd.f32 %v5444_v9, %v5442_v35  ;;  %5459 = vpow2.f32 %v2029_v1  ;;  %9356 = vst [vmem:[#allocation80_spill] sm:$0xff] %v8161_v33 }
 0x654   : > { %v8125_v37 = vpop.eup %5447  ;;  %9361 = vst [vmem:[#allocation100_spill] sm:$0xff] %v8186_v63 }
 0x655   : > { %2348 = vmatmul.mubr.f32.gmra.mxu0 %v5444_v9  ;;  %v1978_v9 = vsub.f32 %v9352_v27, %v8023_v52  ;;  %v3582_v52 = vpop.f32.mrf.mxu1 }
 0x656   : > { %2058 = vadd.xlane.f32.xlu0 %v2057_v16  ;;  %2352 = vmatprep.mubr.f32.mxu0 %v8116_v10  ;;  %v8131_v16 = vpop.eup %5449 }
 0x657   : > { %v8141_v35 = vpop.eup %5451  ;;  %v2039_v54 = vmul.f32 1.442695, %v1978_v9  ;;  %v8177_v9 = vadd.f32 %v8007_v14, %v9208_v44  ;;  %v9362_v14 = vld [vmem:[#allocation99_spill] sm:$0xff] }
 0x658   : > { %v8164_v27 = vpop.eup %5453 }
 0x659   : > { %2353 = vmatmul.mubr.f32.gmra.mxu0 %v8125_v37  ;;  %5461 = vpow2.f32 %v2039_v54  ;;  %v2792_v54 = vsub.f32 %v9362_v14, %v2746_v24 }
 0x65a   : > { %2064 = vadd.xlane.f32.xlu0 %v2063_v25  ;;  %2357 = vmatprep.mubr.f32.mxu0 %v8131_v16  ;;  %v8155_v25 = vadd.f32 %v7997_v58, %v9209_v17  ;;  %5463 = vpow2.f32 %v2037_v30  ;;  %v2752_v30 = vpop.xlane.xlu0 %2751 }
 0x65c   : > { %9354 = vst [vmem:[#allocation61_spill] sm:$0xff] %v8155_v25  ;;  %v3620_v58 = vmax.f32 %v8161_v33, %v8155_v25  ;;  %v8173_v1 = vpop.eup %5455 }
 0x65d   : > { %3612 = vmax.xlane.f32.xlu1 %v3611_v34  ;;  %2358 = vmatmul.mubr.f32.gmra.mxu0 %v8141_v35  ;;  %v9357_v34 = vld [vmem:[#allocation43_spill] sm:$0xff]  ;;  %v8198_v12 = vpop.eup %5457 }
 0x65e   : > { %1396 = vadd.xlane.f32.xlu0 %v9353_v47  ;;  %2362 = vmatprep.mubr.f32.mxu0 %v5438_v26  ;;  %v2749_v47 = vpop.xlane.xlu1 %2748  ;;  %v8170_v26 = vadd.f32 %v8015_v59, %v9209_v17 }
 0x660   : > { %9358 = vst [vmem:[#allocation93_spill] sm:$0xff] %v8170_v26  ;;  %v3623_v59 = vmax.f32 %v8177_v9, %v8170_v26  ;;  %v9365_v26 = vld [vmem:[#allocation51_spill] sm:$0xff] }
 0x661   : > { %3618 = vmax.xlane.f32.xlu1 %v3617_v20  ;;  %2363 = vmatmul.mubr.f32.gmra.mxu0 %v5436_v31  ;;  %v9359_v20 = vld [vmem:[#allocation95_spill] sm:$0xff] }
 0x662   : > { %1402 = vadd.xlane.f32.xlu0 %v9357_v34  ;;  %2367 = vmatprep.mubr.f32.mxu0 %v8164_v27  ;;  %v2793_v31 = vsub.f32 %v9359_v20, %v2746_v24  ;;  %v3584_v34 = vpop.f32.mrf.mxu1  ;;  %v8190_v25 = vpop.permute.xlu1 %3849  ;;  %v9364_v20 = vld [vmem:[#allocation97_spill] sm:$0xff] }
 0x663   : > { %v8204_v24 = vadd.f32 %v3584_v34, %v9209_v17 }
 0x664   : > { %v2826_v33 = vmul.f32 1.442695, %v2793_v31  ;;  %v8208_v31 = vpop.eup %5459 }
 0x665   : > { %3621 = vmax.xlane.f32.xlu1 %v3620_v58  ;;  %2368 = vmatmul.mubr.f32.gmra.mxu0 %v8173_v1  ;;  %v8194_v58 = vadd.f32 %v8025_v7, %v9208_v44  ;;  %v9366_v7 = vld [vmem:[#allocation96_spill] sm:$0xff] }
 0x666   : > { %1408 = vadd.xlane.f32.xlu0 %v9360_v45  ;;  %2372 = vmatprep.mubr.f32.mxu0 %v8040_v3  ;;  %v2795_v45 = vsub.f32 %v9364_v20, %v2749_v47  ;;  %v2794_v14 = vsub.f32 %v9366_v7, %v2749_v47  ;;  %v2824_v20 = vmul.f32 1.442695, %v2792_v54  ;;  %5465 = vpow2.f32 %v2826_v33  ;;  %v8215_v17 = vpop.permute.xlu1 %3879  ;;  %v9370_v33 = vld [vmem:[#allocation63_spill] sm:$0xff]  ;;  %v8223_v54 = vpop.eup %5461 }
 0x667   : > { %9363 = vst [vmem:[#allocation105_spill] sm:$0xff] %v8194_v58  ;;  %v3626_v3 = vmax.f32 %v8194_v58, %v8186_v63  ;;  %v9368_v63 = vld [vmem:[#allocation103_spill] sm:$0xff]  ;;  %v8231_v7 = vpop.permute.xlu0 %3881 }
 0x668   : > { %v2797_v58 = vsub.f32 %v9368_v63, %v2752_v30  ;;  %v2828_v34 = vmul.f32 1.442695, %v2794_v14  ;;  %5467 = vpow2.f32 %v2824_v20  ;;  %v9372_v14 = vld [vmem:[#allocation28_spill] sm:$0xff] }
 0x669   : > { %3624 = vmax.xlane.f32.xlu1 %v3623_v59  ;;  %2373 = vmatmul.mubr.f32.gmra.mxu0 %v8037_v61  ;;  %v2830_v59 = vmul.f32 1.442695, %v2795_v45  ;;  %v9367_v61 = vld [vmem:[#allocation58_spill] sm:$0xff] }
 0x66a   : > { %1414 = vadd.xlane.f32.xlu0 %v9365_v26  ;;  %2377 = vmatprep.mubr.f32.mxu0 %v8198_v12  ;;  %v8211_v26 = vadd.f32 %v3582_v52, %v9208_v44  ;;  %v9369_v44 = vld [vmem:[#allocation102_spill] sm:$0xff]  ;;  %v2834_v63 = vmul.f32 1.442695, %v2797_v58 }
 0x66b   : > { %v2796_v52 = vsub.f32 %v9369_v44, %v2752_v30  ;;  %5469 = vpow2.f32 %v2830_v59  ;;  %v9371_v30 = vld [vmem:[#allocation65_spill] sm:$0xff] }
 0x66c   : > { %v3632_v47 = vmax.f32 %v8211_v26, %v8204_v24  ;;  %5471 = vpow2.f32 %v2828_v34 }
 0x66d   : > { %3627 = vmax.xlane.f32.xlu1 %v3626_v3  ;;  %2378 = vmatmul.mubr.f32.gmra.mxu0 %v8208_v31  ;;  %v2832_v45 = vmul.f32 1.442695, %v2796_v52  ;;  %v8227_v3 = vpop.permute.xlu1 %3847  ;;  %5473 = vpow2.f32 %v2834_v63  ;;  %v9377_v63 = vld [vmem:[#allocation124_spill] sm:$0xff] }
 0x66e   : > { %1420 = vadd.xlane.f32.xlu0 %v9367_v61  ;;  %2382 = vmatprep.mubr.f32.mxu0 %v8064_v55  ;;  %v8229_v55 = vpop.eup %5463 }
 0x66f   : > { %5475 = vpow2.f32 %v2832_v45 }
 0x671   : > { %3633 = vmax.xlane.f32.xlu1 %v3632_v47  ;;  %2383 = vmatmul.mubr.f32.gmra.mxu0 %v8056_v13  ;;  %v2054_v13 = vadd.f32 %v8086_v29, %v8082_v46  ;;  %v8242_v59 = vpop.permute.xlu1 %3877  ;;  %v9373_v46 = vld [vmem:[#allocation123_spill] sm:$0xff]  ;;  %v9374_v47 = vld [vmem:[#allocation121_spill] sm:$0xff] }
 0x672   : > { %1426 = vadd.xlane.f32.xlu0 %v9370_v33  ;;  %2387 = vmatprep.mubr.f32.mxu0 %v8223_v54  ;;  %v9376_v33 = vld [vmem:[#allocation126_spill] sm:$0xff] }
 0x673   : > { %v8240_v20 = vpop.eup %5465 }
 0x675   : > { %2049 = vadd.xlane.f32.xlu1 %v7909_v51  ;;  %2388 = vmatmul.mubr.f32.gmra.mxu0 %v8229_v55  ;;  %v2060_v51 = vadd.f32 %v8110_v38, %v8100_v36  ;;  %v8251_v61 = vpop.eup %5467  ;;  %v2066_v38 = vadd.f32 %v8125_v37, %v8116_v10 }
 0x676   : > { %1432 = vadd.xlane.f32.xlu0 %v9371_v30  ;;  %2392 = vmatprep.mubr.f32.mxu0 %v8093_v19  ;;  %v2069_v19 = vadd.f32 %v8141_v35, %v8131_v16  ;;  %v8262_v16 = vpop.permute.xlu1 %3845  ;;  %v9378_v30 = vld [vmem:[#allocation89_spill] sm:$0xff] }
 0x678   : > { %v8254_v52 = vpop.eup %5469 }
 0x679   : > { %2055 = vadd.xlane.f32.xlu1 %v2054_v13  ;;  %v2758_v58 = vpop.xlane.xlu0 %2757  ;;  %2393 = vmatmul.mubr.f32.gmra.mxu0 %v8090_v49  ;;  %v9375_v49 = vld [vmem:[#allocation111_spill] sm:$0xff]  ;;  %v8266_v13 = vpop.eup %5471 }
 0x67a   : > { %1438 = vadd.xlane.f32.xlu0 %v9372_v14  ;;  %3160 = vmatprep.mubr.f32.mxu0 %v8240_v20  ;;  %v2800_v29 = vsub.f32 %v9373_v46, %v2758_v58  ;;  %v2801_v34 = vsub.f32 %v9374_v47, %v2758_v58  ;;  %v9379_v14 = vld [vmem:[#allocation113_spill] sm:$0xff]  ;;  %v9380_v46 = vld [vmem:[#allocation98_spill] sm:$0xff]  ;;  %v5474_v10 = vpop.eup %5473 }
 0x67c   : > { %v2840_v35 = vmul.f32 1.442695, %v2800_v29  ;;  %v2842_v58 = vmul.f32 1.442695, %v2801_v34  ;;  %v9381_v29 = vld [vmem:[#allocation104_spill] sm:$0xff]  ;;  %v9382_v34 = vld [vmem:[#allocation106_spill] sm:$0xff] }
 0x67d   : > { %2061 = vadd.xlane.f32.xlu1 %v2060_v51  ;;  %v2764_v44 = vpop.xlane.xlu0 %2763  ;;  %3161 = vmatmul.mubr.f32.vlgmr.msra.gmra.mxu0 %v8251_v61 }
 0x67e   : > { %2070 = vadd.xlane.f32.xlu0 %v2069_v19  ;;  %4911 = vmatpush3.msra.mxu0 %v9375_v49  ;;  %v2804_v36 = vsub.f32 %v9376_v33, %v2764_v44  ;;  %v2805_v45 = vsub.f32 %v9377_v63, %v2764_v44  ;;  %v2075_v19 = vadd.f32 %v8173_v1, %v8164_v27  ;;  %5477 = vpow2.f32 %v2840_v35  ;;  %v5476_v49 = vpop.eup %5475  ;;  %v9383_v33 = vld [vmem:[#allocation108_spill] sm:$0xff]  ;;  %v9384_v27 = vld [vmem:[#allocation41_spill] sm:$0xff]  ;;  %v9386_v63 = vld [vmem:[#allocation131_spill] sm:$0xff] }
 0x67f   : > { %3165 = vmatprep.mubr.f32.mxu0 %v8254_v52  ;;  %4912 = vmatprep.subr.mxu0 %v9378_v30  ;;  %5479 = vpow2.f32 %v2842_v58  ;;  %v9385_v1 = vld [vmem:[#allocation133_spill] sm:$0xff]  ;;  %v2081_v35 = vadd.f32 %v8208_v31, %v8198_v12 }
 0x680   : > { %4913 = vmatpush3.msra.mxu0 %v9379_v14  ;;  %v2848_v37 = vmul.f32 1.442695, %v2804_v36  ;;  %v2850_v47 = vmul.f32 1.442695, %v2805_v45  ;;  %v9387_v45 = vld [vmem:[#allocation110_spill] sm:$0xff]  ;;  %v9388_v14 = vld [vmem:[#allocation115_spill] sm:$0xff] }
 0x681   : > { %2067 = vadd.xlane.f32.xlu1 %v2066_v38  ;;  %v8269_v51 = vpop.xlane.xlu0 %2766  ;;  %4914 = vmatprep.subr.mxu0 %v9380_v46  ;;  %v9389_v46 = vld [vmem:[#allocation112_spill] sm:$0xff] }
 0x682   : > { %3166 = vmatmul.mubr.f32.gmra.mxu0 %v8266_v13  ;;  %2076 = vadd.xlane.f32.xlu0 %v2075_v19  ;;  %5481 = vpow2.f32 %v2848_v37  ;;  %v2087_v37 = vadd.f32 %v8229_v55, %v8223_v54 }
 0x683   : > { %4915 = vmatpush3.msra.mxu0 %v9381_v29  ;;  %3170 = vmatprep.mubr.f32.mxu0 %v5474_v10  ;;  %5483 = vpow2.f32 %v2850_v47 }
 0x684   : > { %4916 = vmatprep.subr.mxu0 %v9382_v34  ;;  %v9390_v34 = vld [vmem:[#allocation117_spill] sm:$0xff] }
 0x685   : > { %v2755_v44 = vpop.xlane.xlu1 %2754  ;;  %4917 = vmatpush3.msra.mxu0 %v9383_v33  ;;  %1399 = vadd.xlane.f32.xlu1 %v9384_v27  ;;  %v8281_v36 = vpop.xlane.xlu0 %2772  ;;  %v9392_v33 = vld [vmem:[#allocation119_spill] sm:$0xff]  ;;  %v9393_v27 = vld [vmem:[#allocation114_spill] sm:$0xff] }
 0x686   : > { %v2798_v38 = vsub.f32 %v9385_v1, %v2755_v44  ;;  %v2799_v30 = vsub.f32 %v9386_v63, %v2755_v44  ;;  %4918 = vmatprep.subr.mxu0 %v9387_v45  ;;  %3171 = vmatmul.mubr.f32.gmra.mxu0 %v5476_v49  ;;  %v9391_v44 = vld [vmem:[#allocation46_spill] sm:$0xff]  ;;  %v2888_v45 = vadd.f32 %v8251_v61, %v8240_v20  ;;  %v9401_v20 = vld [vmem:[#allocation125_spill] sm:$0xff] }
 0x687   : > { %4919 = vmatpush3.msra.mxu0 %v9388_v14  ;;  %2082 = vadd.xlane.f32.xlu0 %v2081_v35  ;;  %v9397_v14 = vld [vmem:[#allocation120_spill] sm:$0xff]  ;;  %v9402_v61 = vld [vmem:[#allocation45_spill] sm:$0xff] }
 0x688   : > { %v2836_v58 = vmul.f32 1.442695, %v2798_v38  ;;  %v2838_v19 = vmul.f32 1.442695, %v2799_v30  ;;  %4920 = vmatprep.subr.mxu0 %v9389_v46  ;;  %v9394_v38 = vld [vmem:[#allocation116_spill] sm:$0xff]  ;;  %v9395_v30 = vld [vmem:[#allocation118_spill] sm:$0xff] }
 0x689   : > { %v2761_v29 = vpop.xlane.xlu1 %2760  ;;  %4921 = vmatpush3.msra.mxu0 %v9390_v34  ;;  %1405 = vadd.xlane.f32.xlu1 %v9391_v44  ;;  %v8291_v31 = vpop.xlane.xlu0 %2787 }
 0x68a   : > { %5485 = vpow2.f32 %v2836_v58  ;;  %v2803_v12 = vsub.f32 %v7780_v2, %v2761_v29  ;;  %4922 = vmatprep.subr.mxu0 %v9392_v33  ;;  %v2802_v47 = vsub.f32 %v7793_v21, %v2761_v29  ;;  %v9396_v2 = vld [vmem:[#allocation36_spill] sm:$0xff]  ;;  %v9398_v21 = vld [vmem:[#allocation122_spill] sm:$0xff]  ;;  %v9399_v29 = vld [vmem:[#allocation127_spill] sm:$0xff] }
 0x68b   : > { %5487 = vpow2.f32 %v2838_v19  ;;  %4923 = vmatpush3.msra.mxu0 %v9393_v27  ;;  %2088 = vadd.xlane.f32.xlu0 %v2087_v37  ;;  %v8310_v44 = vpop.eup %5477 }
 0x68c   : > { %v2846_v1 = vmul.f32 1.442695, %v2803_v12  ;;  %4924 = vmatprep.subr.mxu0 %v9394_v38  ;;  %v2844_v46 = vmul.f32 1.442695, %v2802_v47  ;;  %v5480_v47 = vpop.eup %5479 }
 0x68d   : > { %v2770_v63 = vpop.xlane.xlu1 %2769  ;;  %4925 = vmatpush3.msra.mxu0 %v9395_v30  ;;  %1411 = vadd.xlane.f32.xlu1 %v9396_v2  ;;  %v8303_v55 = vpop.xlane.xlu0 %3594  ;;  %v9405_v30 = vld [vmem:[#allocation129_spill] sm:$0xff] }
 0x68e   : > { %v2808_v35 = vsub.f32 %v7813_v22, %v2770_v63  ;;  %v2809_v54 = vsub.f32 %v7804_v32, %v2770_v63  ;;  %4926 = vmatprep.subr.mxu0 %v9397_v14  ;;  %5489 = vpow2.f32 %v2846_v1  ;;  %v2894_v22 = vadd.f32 %v5476_v49, %v5474_v10  ;;  %v9400_v32 = vld [vmem:[#allocation128_spill] sm:$0xff]  ;;  %v9403_v1 = vld [vmem:[#allocation134_spill] sm:$0xff] }
 0x68f   : > { %4927 = vmatpush3.msra.mxu0 %v9398_v21  ;;  %2889 = vadd.xlane.f32.xlu0 %v2888_v45  ;;  %v2807_v12 = vsub.f32 %v9400_v32, %v8269_v51  ;;  %v9404_v10 = vld [vmem:[#allocation130_spill] sm:$0xff]  ;;  %v8322_v63 = vpop.eup %5481  ;;  %v2806_v2 = vsub.f32 %v9405_v30, %v8269_v51  ;;  %v9407_v45 = vld [vmem:[#allocation60_spill] sm:$0xff]  ;;  %v2900_v21 = vadd.f32 %v5480_v47, %v8310_v44 }
 0x690   : > { %v2856_v58 = vmul.f32 1.442695, %v2808_v35  ;;  %v2858_v19 = vmul.f32 1.442695, %v2809_v54  ;;  %4928 = vmatprep.subr.mxu0 %v9399_v29  ;;  %v8329_v35 = vpop.eup %5483  ;;  %v9410_v32 = vld [vmem:[#allocation66_spill] sm:$0xff] }
 0x691   : > { %v2776_v34 = vpop.xlane.xlu1 %2775  ;;  %4929 = vmatpush3.msra.mxu0 %v9401_v20  ;;  %1417 = vadd.xlane.f32.xlu1 %v9402_v61  ;;  %v8318_v27 = vpop.xlane.xlu0 %3600  ;;  %v2854_v54 = vmul.f32 1.442695, %v2807_v12  ;;  %v2906_v20 = vadd.f32 %v8329_v35, %v8322_v63 }
 0x692   : > { %5491 = vpow2.f32 %v2856_v58  ;;  %v2812_v37 = vsub.f32 %v7837_v56, %v2776_v34  ;;  %v2813_v33 = vsub.f32 %v7825_v48, %v2776_v34  ;;  %4930 = vmatprep.subr.mxu0 %v9403_v1  ;;  %v9406_v56 = vld [vmem:[#allocation136_spill] sm:$0xff]  ;;  %v9409_v34 = vld [vmem:[#allocation137_spill] sm:$0xff]  ;;  %v9412_v1 = vld [vmem:[#allocation34_spill] sm:$0xff] }
 0x693   : > { %5493 = vpow2.f32 %v2858_v19  ;;  %4931 = vmatpush3.msra.mxu0 %v9404_v10  ;;  %2895 = vadd.xlane.f32.xlu0 %v2894_v22  ;;  %v2820_v19 = vsub.f32 %v7796_v42, %v8291_v31  ;;  %v2821_v22 = vsub.f32 %v9409_v34, %v8291_v31 }
 0x694   : > { %v2864_v49 = vmul.f32 1.442695, %v2812_v37  ;;  %v2866_v38 = vmul.f32 1.442695, %v2813_v33  ;;  %5495 = vpow2.f32 %v2844_v46  ;;  %4932 = vmatprep.subr.mxu0 %v9406_v56  ;;  %v9408_v46 = vld [vmem:[#allocation132_spill] sm:$0xff]  ;;  %v9413_v56 = vld [vmem:[#allocation30_spill] sm:$0xff] }
 0x695   : > { %v8327_v48 = vpop.xlane.xlu1 %2778  ;;  %4933 = vmatpush3.msra.mxu0 %v8013_v0  ;;  %1423 = vadd.xlane.f32.xlu1 %v9407_v45  ;;  %v8333_v14 = vpop.xlane.xlu0 %3606  ;;  %v2852_v0 = vmul.f32 1.442695, %v2806_v2  ;;  %v2811_v29 = vsub.f32 %v9408_v46, %v8281_v36 }
 0x696   : > { %5497 = vpow2.f32 %v2864_v49  ;;  %4934 = vmatprep.subr.mxu0 %v8231_v7  ;;  %v2815_v2 = vsub.f32 %v7847_v4, %v8327_v48 }
 0x697   : > { %v8336_v58 = vpop.eup %5485  ;;  %5499 = vpow2.f32 %v2866_v38  ;;  %4935 = vmatpush3.msra.mxu0 %v8190_v25  ;;  %2901 = vadd.xlane.f32.xlu0 %v2900_v21  ;;  %v2862_v33 = vmul.f32 1.442695, %v2811_v29  ;;  %v2814_v21 = vsub.f32 %v7857_v28, %v8327_v48  ;;  %v3643_v28 = vsub.f32 %v7840_v62, %v8318_v27 }
 0x698   : > { %v8339_v51 = vpop.eup %5487  ;;  %4936 = vmatprep.subr.mxu0 %v8215_v17  ;;  %5501 = vpow2.f32 %v2854_v54  ;;  %v2880_v17 = vmul.f32 1.442695, %v2820_v19  ;;  %v3640_v19 = vsub.f32 %v7809_v43, %v8303_v55  ;;  %v3644_v48 = vsub.f32 %v7833_v6, %v8318_v27 }
 0x699   : > { %3175 = vmatprep.mubr.f32.mxu0 %v8339_v51  ;;  %v2782_v7 = vpop.xlane.xlu1 %2781  ;;  %4937 = vmatpush3.msra.mxu0 %v8227_v3  ;;  %5503 = vpow2.f32 %v2852_v0  ;;  %v2870_v0 = vmul.f32 1.442695, %v2815_v2  ;;  %v2868_v43 = vmul.f32 1.442695, %v2814_v21  ;;  %v3683_v27 = vmul.f32 1.442695, %v3643_v28 }
 0x69a   : > { %1429 = vadd.xlane.f32.xlu1 %v9410_v32  ;;  %v2816_v42 = vsub.f32 %v7875_v57, %v2782_v7  ;;  %v2817_v25 = vsub.f32 %v7866_v41, %v2782_v7  ;;  %v8354_v12 = vpop.xlane.xlu0 %3609  ;;  %4938 = vmatprep.subr.mxu0 %v8242_v59  ;;  %v9411_v57 = vld [vmem:[#allocation135_spill] sm:$0xff]  ;;  %v2882_v41 = vmul.f32 1.442695, %v2821_v22  ;;  %v9419_v2 = vld [vmem:[#allocation144_spill] sm:$0xff] }
 0x69b   : > { %3176 = vmatmul.mubr.f32.gmra.mxu0 %v8336_v58  ;;  %2907 = vadd.xlane.f32.xlu0 %v2906_v20  ;;  %v2810_v61 = vsub.f32 %v9411_v57, %v8281_v36  ;;  %v8363_v37 = vpop.eup %5489  ;;  %v9415_v32 = vld [vmem:[#allocation139_spill] sm:$0xff]  ;;  %v3685_v20 = vmul.f32 1.442695, %v3644_v48  ;;  %v9417_v57 = vld [vmem:[#allocation138_spill] sm:$0xff] }
 0x69c   : > { %4939 = vmatpush3.msra.mxu0 %v8262_v16  ;;  %v2872_v31 = vmul.f32 1.442695, %v2816_v42  ;;  %v2874_v3 = vmul.f32 1.442695, %v2817_v25  ;;  %3180 = vmatprep.mubr.f32.mxu0 %v5480_v47  ;;  %v3639_v47 = vsub.f32 %v7818_v39, %v8303_v55  ;;  %v3647_v42 = vsub.f32 %v9415_v32, %v8333_v14 }
 0x69d   : > { %v8366_v59 = vpop.xlane.xlu1 %2784  ;;  %v2860_v36 = vmul.f32 1.442695, %v2810_v61  ;;  %v3648_v61 = vsub.f32 %v9417_v57, %v8333_v14 }
 0x69e   : > { %5505 = vpow2.f32 %v2872_v31  ;;  %1435 = vadd.xlane.f32.xlu1 %v9412_v1  ;;  %v3876_v10 = vpop.permute.xlu0 %3875  ;;  %v3675_v39 = vmul.f32 1.442695, %v3639_v47 }
 0x69f   : > { %v8368_v49 = vpop.eup %5491  ;;  %5507 = vpow2.f32 %v2874_v3  ;;  %3181 = vmatmul.mubr.f32.gmra.mxu0 %v8310_v44  ;;  %4940 = vmatprep.subr.mxu0 %v3876_v10 }
 0x6a0   : > { %v5494_v16 = vpop.eup %5493  ;;  %5509 = vpow2.f32 %v2880_v17  ;;  %3185 = vmatprep.mubr.f32.mxu0 %v8363_v37 }
 0x6a1   : > { %5511 = vpow2.f32 %v2882_v41  ;;  %v2912_v38 = vadd.f32 %v5494_v16, %v8368_v49  ;;  %v8375_v30 = vpop.eup %5495  ;;  %v8380_v44 = vpop.xlane.xlu1 %2790 }
 0x6a2   : > { %5513 = vpow2.f32 %v2862_v33  ;;  %1441 = vadd.xlane.f32.xlu1 %v9413_v56  ;;  %v2822_v56 = vsub.f32 %v9419_v2, %v8380_v44 }
 0x6a3   : > { %v8382_v54 = vpop.eup %5497  ;;  %3186 = vmatmul.mubr.f32.gmra.mxu0 %v8375_v30  ;;  %2913 = vadd.xlane.f32.xlu0 %v2912_v38  ;;  %5515 = vpow2.f32 %v2860_v36  ;;  %v3693_v36 = vmul.f32 1.442695, %v3648_v61  ;;  %v2891_v38 = vadd.f32 %v8266_v13, %v8254_v52  ;;  %v2897_v52 = vadd.f32 %v8339_v51, %v8336_v58 }
 0x6a4   : > { %v8385_v45 = vpop.eup %5499  ;;  %3190 = vmatprep.mubr.f32.mxu0 %v8329_v35  ;;  %5517 = vpow2.f32 %v3675_v39  ;;  %v2903_v58 = vadd.f32 %v8375_v30, %v8363_v37  ;;  %v9423_v37 = vld [vmem:[#allocation147_spill] sm:$0xff] }
 0x6a5   : > { %v2918_v4 = vadd.f32 %v8385_v45, %v8382_v54  ;;  %v3589_v46 = vpop.xlane.xlu1 %3588  ;;  %v8395_v29 = vpop.eup %5501  ;;  %5519 = vpow2.f32 %v2870_v0  ;;  %v9420_v0 = vld [vmem:[#allocation145_spill] sm:$0xff] }
 0x6a6   : > { %2073 = vadd.xlane.f32.xlu1 %v8108_v53  ;;  %v3635_v35 = vsub.f32 %v7932_v23, %v3589_v46  ;;  %v3636_v34 = vsub.f32 %v7924_v18, %v3589_v46  ;;  %v8405_v22 = vpop.eup %5503  ;;  %v2819_v18 = vsub.f32 %v7886_v5, %v8366_v59  ;;  %v9414_v23 = vld [vmem:[#allocation88_spill] sm:$0xff]  ;;  %v9416_v5 = vld [vmem:[#allocation142_spill] sm:$0xff] }
 0x6a7   : > { %3191 = vmatmul.mubr.f32.gmra.mxu0 %v8322_v63  ;;  %2919 = vadd.xlane.f32.xlu0 %v2918_v4  ;;  %v3677_v63 = vmul.f32 1.442695, %v3640_v19  ;;  %v2818_v17 = vsub.f32 %v9416_v5, %v8366_v59  ;;  %v3691_v59 = vmul.f32 1.442695, %v3647_v42 }
 0x6a8   : > { %3195 = vmatprep.mubr.f32.mxu0 %v8395_v29  ;;  %v3667_v53 = vmul.f32 1.442695, %v3635_v35  ;;  %v3669_v55 = vmul.f32 1.442695, %v3636_v34  ;;  %v2878_v41 = vmul.f32 1.442695, %v2819_v18 }
 0x6a9   : > { %v8410_v7 = vpop.xlane.xlu1 %3591  ;;  %v2876_v10 = vmul.f32 1.442695, %v2818_v17  ;;  %v9421_v34 = vld [vmem:[#allocation146_spill] sm:$0xff]  ;;  %v9422_v18 = vld [vmem:[#allocation148_spill] sm:$0xff] }
 0x6aa   : > { %2079 = vadd.xlane.f32.xlu1 %v9414_v23  ;;  %5521 = vpow2.f32 %v3667_v53  ;;  %v3638_v46 = vsub.f32 %v9420_v0, %v8410_v7  ;;  %v3637_v28 = vsub.f32 %v9421_v34, %v8410_v7  ;;  %v9424_v17 = vld [vmem:[#allocation150_spill] sm:$0xff] }
 0x6ab   : > { %v8412_v62 = vpop.eup %5505  ;;  %3196 = vmatmul.mubr.f32.gmra.mxu0 %v8405_v22  ;;  %5523 = vpow2.f32 %v3669_v55 }
 0x6ac   : > { %v5508_v6 = vpop.eup %5507  ;;  %3200 = vmatprep.mubr.f32.mxu0 %v5494_v16  ;;  %5525 = vpow2.f32 %v2868_v43  ;;  %v8474_v43 = vpop.f32.mrf.mxu0  ;;  %v3673_v53 = vmul.f32 1.442695, %v3638_v46  ;;  %v3671_v7 = vmul.f32 1.442695, %v3637_v28 }
 0x6ad   : > { %v8417_v25 = vpop.eup %5509  ;;  %v2924_v31 = vadd.f32 %v5508_v6, %v8412_v62  ;;  %5527 = vpow2.f32 %v3677_v63  ;;  %v8427_v33 = vpop.xlane.xlu1 %3597 }
 0x6ae   : > { %v8422_v3 = vpop.eup %5511  ;;  %2085 = vadd.xlane.f32.xlu1 %v8073_v60  ;;  %5529 = vpow2.f32 %v3683_v27  ;;  %v9418_v60 = vld [vmem:[#allocation143_spill] sm:$0xff]  ;;  %v3641_v23 = vsub.f32 %v9422_v18, %v8427_v33  ;;  %v3642_v30 = vsub.f32 %v9423_v37, %v8427_v33  ;;  %v8487_v42 = vpop.f32.mrf.mxu0 }
 0x6af   : > { %v8429_v1 = vpop.eup %5513  ;;  %3201 = vmatmul.mubr.f32.gmra.mxu0 %v8368_v49  ;;  %2925 = vadd.xlane.f32.xlu0 %v2924_v31  ;;  %5531 = vpow2.f32 %v3685_v20  ;;  %v2930_v16 = vadd.f32 %v8422_v3, %v8417_v25  ;;  %v2823_v47 = vsub.f32 %v9418_v60, %v8380_v44  ;;  %v2884_v44 = vmul.f32 1.442695, %v2822_v56 }
 0x6b0   : > { %3205 = vmatprep.mubr.f32.mxu0 %v8429_v1  ;;  %v8435_v14 = vpop.eup %5515  ;;  %5533 = vpow2.f32 %v2878_v41  ;;  %v3679_v5 = vmul.f32 1.442695, %v3641_v23  ;;  %v3681_v57 = vmul.f32 1.442695, %v3642_v30  ;;  %v8500_v41 = vpop.f32.mrf.mxu0 }
 0x6b1   : > { %v8440_v49 = vpop.xlane.xlu1 %3603  ;;  %5535 = vpow2.f32 %v3691_v59  ;;  %v8448_v39 = vpop.eup %5517  ;;  %v2886_v21 = vmul.f32 1.442695, %v2823_v47  ;;  %v2915_v61 = vadd.f32 %v8435_v14, %v8429_v1 }
 0x6b2   : > { %2091 = vadd.xlane.f32.xlu1 %v8098_v11  ;;  %5537 = vpow2.f32 %v2876_v10  ;;  %v8450_v4 = vpop.eup %5519  ;;  %v3645_v31 = vsub.f32 %v9424_v17, %v8440_v49  ;;  %v9426_v10 = vld [vmem:[#allocation141_spill] sm:$0xff] }
 0x6b3   : > { %3206 = vmatmul.mubr.f32.gmra.mxu0 %v8435_v14  ;;  %2931 = vadd.xlane.f32.xlu0 %v2930_v16  ;;  %5539 = vpow2.f32 %v3693_v36  ;;  %v3649_v16 = vsub.f32 %v9426_v10, %v8354_v12 }
 0x6b4   : > { %3210 = vmatprep.mubr.f32.mxu0 %v8385_v45  ;;  %5541 = vpow2.f32 %v2886_v21  ;;  %v3687_v36 = vmul.f32 1.442695, %v3645_v31 }
 0x6b5   : > { %v3844_v11 = vpop.permute.xlu1 %3843  ;;  %5543 = vpow2.f32 %v2884_v44 }
 0x6b6   : > { %2892 = vadd.xlane.f32.xlu1 %v2891_v38  ;;  %4941 = vmatpush3.msra.mxu0 %v3844_v11  ;;  %5545 = vpow2.f32 %v3673_v53  ;;  %v3695_v38 = vmul.f32 1.442695, %v3649_v16 }
 0x6b7   : > { %3211 = vmatmul.mubr.f32.gmra.mxu0 %v8382_v54  ;;  %v8453_v19 = vpop.eup %5521  ;;  %5547 = vpow2.f32 %v3671_v7 }
 0x6b8   : > { %3215 = vmatprep.mubr.f32.mxu0 %v8450_v4  ;;  %v8458_v13 = vpop.eup %5523  ;;  %5549 = vpow2.f32 %v3679_v5 }
 0x6b9   : > { %v5526_v45 = vpop.eup %5525  ;;  %v3731_v54 = vadd.f32 %v8458_v13, %v8453_v19  ;;  %5551 = vpow2.f32 %v3681_v57 }
 0x6ba   : > { %2898 = vadd.xlane.f32.xlu1 %v2897_v52  ;;  %v8464_v35 = vpop.eup %5527  ;;  %v2921_v1 = vadd.f32 %v5526_v45, %v8450_v4  ;;  %5553 = vpow2.f32 %v3687_v36  ;;  %v9428_v4 = vld [vmem:[#allocation53_spill] sm:$0xff]  ;;  %v9429_v36 = vld [vmem:[#allocation74_spill] sm:$0xff] }
 0x6bb   : > { %3216 = vmatmul.mubr.f32.gmra.mxu0 %v5526_v45  ;;  %3732 = vadd.xlane.f32.xlu0 %v3731_v54  ;;  %v8470_v51 = vpop.eup %5529  ;;  %v3737_v55 = vadd.f32 %v8464_v35, %v8448_v39 }
 0x6bc   : > { %3220 = vmatprep.mubr.f32.mxu0 %v5508_v6  ;;  %v8472_v48 = vpop.eup %5531  ;;  %v2909_v6 = vadd.f32 %v8405_v22, %v8395_v29  ;;  %v9425_v29 = vld [vmem:[#allocation149_spill] sm:$0xff] }
 0x6bd   : > { %v5534_v63 = vpop.eup %5533  ;;  %v3743_v20 = vadd.f32 %v8472_v48, %v8470_v51  ;;  %v3646_v22 = vsub.f32 %v9425_v29, %v8440_v49  ;;  %v8510_v49 = vpop.f32.mrf.mxu0 }
 0x6be   : > { %2904 = vadd.xlane.f32.xlu1 %v2903_v58  ;;  %v8485_v27 = vpop.eup %5535 }
 0x6bf   : > { %3221 = vmatmul.mubr.f32.gmra.mxu0 %v8412_v62  ;;  %3738 = vadd.xlane.f32.xlu0 %v3737_v55  ;;  %v5538_v32 = vpop.eup %5537  ;;  %v3689_v47 = vmul.f32 1.442695, %v3646_v22  ;;  %v8513_v56 = vpop.f32.mrf.mxu0 }
 0x6c0   : > { %3225 = vmatprep.mubr.f32.mxu0 %v5534_v63  ;;  %v8491_v62 = vpop.eup %5539 }
 0x6c1   : > { %v3749_v33 = vadd.f32 %v8491_v62, %v8485_v27  ;;  %v5542_v59 = vpop.eup %5541  ;;  %5555 = vpow2.f32 %v3689_v47  ;;  %v8518_v0 = vpop.f32.mrf.mxu0 }
 0x6c2   : > { %2910 = vadd.xlane.f32.xlu1 %v2909_v6  ;;  %v5544_v14 = vpop.eup %5543  ;;  %5557 = vpow2.f32 %v3695_v38  ;;  %v9431_v38 = vld [vmem:[#allocation80_spill] sm:$0xff] }
 0x6c3   : > { %3226 = vmatmul.mubr.f32.gmra.mxu0 %v5538_v32  ;;  %3744 = vadd.xlane.f32.xlu0 %v3743_v20  ;;  %v2933_v44 = vadd.f32 %v5544_v14, %v5542_v59 }
 0x6c4   : > { %3230 = vmatprep.mubr.f32.mxu0 %v8422_v3  ;;  %v9427_v3 = vld [vmem:[#allocation140_spill] sm:$0xff] }
 0x6c5   : > { %v3650_v60 = vsub.f32 %v9427_v3, %v8354_v12  ;;  %v5546_v12 = vpop.eup %5545 }
 0x6c6   : > { %2916 = vadd.xlane.f32.xlu1 %v2915_v61  ;;  %v5548_v45 = vpop.eup %5547 }
 0x6c7   : > { %3231 = vmatmul.mubr.f32.gmra.mxu0 %v8417_v25  ;;  %3750 = vadd.xlane.f32.xlu0 %v3749_v33  ;;  %v3697_v2 = vmul.f32 1.442695, %v3650_v60  ;;  %v2927_v25 = vadd.f32 %v5538_v32, %v5534_v63  ;;  %v5550_v34 = vpop.eup %5549 }
 0x6c8   : > { %3235 = vmatprep.mubr.f32.mxu0 %v5542_v59  ;;  %v5552_v28 = vpop.eup %5551 }
 0x6c9   : > { %5559 = vpow2.f32 %v3697_v2  ;;  %v5554_v53 = vpop.eup %5553  ;;  %v3740_v55 = vadd.f32 %v5552_v28, %v5550_v34 }
 0x6ca   : > { %2922 = vadd.xlane.f32.xlu1 %v2921_v1 }
 0x6cb   : > { %3236 = vmatmul.mubr.f32.gmra.mxu0 %v5544_v14 }
 0x6cc   : > { %4003 = vmatprep.mubr.f32.mxu0 %v8458_v13 }
 0x6ce   : > { %2928 = vadd.xlane.f32.xlu1 %v2927_v25  ;;  %v5556_v63 = vpop.eup %5555  ;;  %v9432_v25 = vld [vmem:[#allocation61_spill] sm:$0xff] }
 0x6cf   : > { %4004 = vmatmul.mubr.f32.vlgmr.msra.gmra.mxu0 %v8453_v19  ;;  %v3616_v21 = vpop.xlane.xlu0 %3615  ;;  %v3734_v19 = vadd.f32 %v5548_v45, %v5546_v12  ;;  %v3746_v7 = vadd.f32 %v5556_v63, %v5554_v53 }
 0x6d0   : > { %4008 = vmatprep.mubr.f32.mxu0 %v5546_v12  ;;  %v3653_v11 = vsub.f32 %v8060_v8, %v3616_v21  ;;  %v3654_v52 = vsub.f32 %v9428_v4, %v3616_v21  ;;  %v8523_v8 = vpop.f32.mrf.mxu0  ;;  %v9433_v4 = vld [vmem:[#allocation50_spill] sm:$0xff] }
 0x6d2   : > { %v3703_v13 = vmul.f32 1.442695, %v3653_v11  ;;  %v3705_v46 = vmul.f32 1.442695, %v3654_v52  ;;  %2934 = vadd.xlane.f32.xlu1 %v2933_v44  ;;  %v8528_v18 = vpop.f32.mrf.mxu0 }
 0x6d3   : > { %4009 = vmatmul.mubr.f32.gmra.mxu0 %v5548_v45  ;;  %v8520_v54 = vpop.xlane.xlu0 %3630 }
 0x6d4   : > { %5561 = vpow2.f32 %v3703_v13  ;;  %4013 = vmatprep.mubr.f32.mxu0 %v8464_v35  ;;  %v5558_v35 = vpop.eup %5557  ;;  %v8533_v30 = vpop.f32.mrf.mxu0  ;;  %v3664_v52 = vsub.f32 %v9433_v4, %v8520_v54  ;;  %v9442_v4 = vld [vmem:[#allocation94_spill] sm:$0xff] }
 0x6d5   : > { %5563 = vpow2.f32 %v3705_v46  ;;  %v9434_v46 = vld [vmem:[#allocation78_spill] sm:$0xff] }
 0x6d6   : > { %3735 = vadd.xlane.f32.xlu1 %v3734_v19  ;;  %v5560_v37 = vpop.eup %5559  ;;  %v8542_v5 = vpop.f32.mrf.mxu0 }
 0x6d7   : > { %4014 = vmatmul.mubr.f32.gmra.mxu0 %v8448_v39  ;;  %v8526_v58 = vpop.xlane.xlu0 %2046  ;;  %v3752_v6 = vadd.f32 %v5560_v37, %v5558_v35 }
 0x6d8   : > { %4018 = vmatprep.mubr.f32.mxu0 %v5552_v28 }
 0x6da   : > { %3741 = vadd.xlane.f32.xlu1 %v3740_v55 }
 0x6db   : > { %4019 = vmatmul.mubr.f32.gmra.mxu0 %v5550_v34  ;;  %v8530_v23 = vpop.xlane.xlu0 %2052  ;;  %v9435_v34 = vld [vmem:[#allocation84_spill] sm:$0xff] }
 0x6dc   : > { %4023 = vmatprep.mubr.f32.mxu0 %v8472_v48  ;;  %v4704_v19 = vadd.f32 %v9435_v34, %v9434_v46 }
 0x6de   : > { %3747 = vadd.xlane.f32.xlu1 %v3746_v7 }
 0x6df   : > { %4024 = vmatmul.mubr.f32.gmra.mxu0 %v8470_v51  ;;  %v8536_v39 = vpop.xlane.xlu0 %2058  ;;  %v8549_v51 = vpop.f32.mrf.mxu0 }
 0x6e0   : > { %4028 = vmatprep.mubr.f32.mxu0 %v5556_v63 }
 0x6e1   : > { %v8538_v32 = vpop.eup %5561  ;;  %v8554_v61 = vpop.f32.mrf.mxu0 }
 0x6e2   : > { %v8540_v20 = vpop.eup %5563  ;;  %3753 = vadd.xlane.f32.xlu1 %v3752_v6 }
 0x6e3   : > { %4029 = vmatmul.mubr.f32.gmra.mxu0 %v5554_v53  ;;  %v8544_v48 = vpop.xlane.xlu0 %2064  ;;  %v3758_v17 = vadd.f32 %v8540_v20, %v8538_v32  ;;  %v8558_v3 = vpop.f32.mrf.mxu0  ;;  %v9436_v53 = vld [vmem:[#allocation93_spill] sm:$0xff] }
 0x6e4   : > { %4033 = vmatprep.mubr.f32.mxu0 %v8491_v62 }
 0x6e6   : > { %3759 = vadd.xlane.f32.xlu1 %v3758_v17  ;;  %v3613_v31 = vpop.xlane.xlu1 %3612 }
 0x6e7   : > { %4034 = vmatmul.mubr.f32.gmra.mxu0 %v8485_v27  ;;  %v1397_v57 = vpop.xlane.xlu0 %1396  ;;  %v3651_v29 = vsub.f32 %v8129_v15, %v3613_v31  ;;  %v3652_v22 = vsub.f32 %v8120_v40, %v3613_v31  ;;  %v9430_v40 = vld [vmem:[#allocation64_spill] sm:$0xff] }
 0x6e8   : > { %4038 = vmatprep.mubr.f32.mxu0 %v5560_v37  ;;  %5565 = vrcp.f32 %v1397_v57  ;;  %v3663_v47 = vsub.f32 %v9430_v40, %v8520_v54  ;;  %v3725_v54 = vmul.f32 1.442695, %v3664_v52  ;;  %v9437_v57 = vld [vmem:[#allocation105_spill] sm:$0xff] }
 0x6e9   : > { %v3699_v33 = vmul.f32 1.442695, %v3651_v29  ;;  %v3701_v59 = vmul.f32 1.442695, %v3652_v22  ;;  %v9438_v22 = vld [vmem:[#allocation100_spill] sm:$0xff] }
 0x6ea   : > { %v3619_v10 = vpop.xlane.xlu1 %3618  ;;  %v3723_v44 = vmul.f32 1.442695, %v3663_v47 }
 0x6eb   : > { %4039 = vmatmul.mubr.f32.gmra.mxu0 %v5558_v35  ;;  %v1403_v62 = vpop.xlane.xlu0 %1402  ;;  %5567 = vpow2.f32 %v3699_v33  ;;  %v3655_v16 = vsub.f32 %v8145_v50, %v3619_v10  ;;  %v3656_v27 = vsub.f32 %v9429_v36, %v3619_v10  ;;  %v8564_v50 = vpop.f32.mrf.mxu0 }
 0x6ec   : > { %5569 = vpow2.f32 %v3701_v59 }
 0x6ed   : > { %v3707_v60 = vmul.f32 1.442695, %v3655_v16  ;;  %v3709_v15 = vmul.f32 1.442695, %v3656_v27  ;;  %5571 = vrcp.f32 %v1403_v62  ;;  %v8572_v35 = vpop.f32.mrf.mxu0  ;;  %v9439_v62 = vld [vmem:[#allocation59_spill] sm:$0xff] }
 0x6ee   : > { %v3622_v1 = vpop.xlane.xlu1 %3621  ;;  %v9440_v16 = vld [vmem:[#allocation75_spill] sm:$0xff] }
 0x6ef   : > { %v1409_v14 = vpop.xlane.xlu0 %1408  ;;  %5573 = vpow2.f32 %v3707_v60  ;;  %v3657_v2 = vsub.f32 %v9431_v38, %v3622_v1  ;;  %v3658_v12 = vsub.f32 %v9432_v25, %v3622_v1  ;;  %v8577_v59 = vpop.f32.mrf.mxu0  ;;  %v4710_v36 = vadd.f32 %v9440_v16, %v9439_v62 }
 0x6f0   : > { %5575 = vpow2.f32 %v3709_v15  ;;  %v4734_v16 = vadd.f32 %v8542_v5, %v8533_v30  ;;  %v4740_v30 = vadd.f32 %v8564_v50, %v8558_v3 }
 0x6f1   : > { %v3711_v21 = vmul.f32 1.442695, %v3657_v2  ;;  %v3713_v11 = vmul.f32 1.442695, %v3658_v12  ;;  %5577 = vrcp.f32 %v1409_v14  ;;  %v8583_v12 = vpop.f32.mrf.mxu0 }
 0x6f2   : > { %v3625_v45 = vpop.xlane.xlu1 %3624 }
 0x6f3   : > { %v1415_v13 = vpop.xlane.xlu0 %1414  ;;  %5579 = vpow2.f32 %v3711_v21  ;;  %v3659_v28 = vsub.f32 %v8177_v9, %v3625_v45  ;;  %v3660_v55 = vsub.f32 %v9436_v53, %v3625_v45  ;;  %v4722_v53 = vadd.f32 %v8487_v42, %v8474_v43 }
 0x6f4   : > { %5581 = vpow2.f32 %v3713_v11  ;;  %v9441_v11 = vld [vmem:[#allocation91_spill] sm:$0xff]  ;;  %v4728_v43 = vadd.f32 %v8518_v0, %v8513_v56 }
 0x6f5   : > { %v5566_v63 = vpop.eup %5565  ;;  %v3715_v7 = vmul.f32 1.442695, %v3659_v28  ;;  %v3717_v37 = vmul.f32 1.442695, %v3660_v55  ;;  %5583 = vrcp.f32 %v1415_v13  ;;  %v4716_v52 = vadd.f32 %v9442_v4, %v9441_v11 }
 0x6f6   : > { %v1636_v6 = vmul.f32 %v5566_v63, %v4704_v19  ;;  %5585 = vpow2.f32 %v3723_v44  ;;  %v3628_v17 = vpop.xlane.xlu1 %3627  ;;  %v8592_v19 = vpop.f32.mrf.mxu0 }
 0x6f7   : > { %v1421_v31 = vpop.xlane.xlu0 %1420  ;;  %5587 = vpow2.f32 %v3715_v7  ;;  %v3661_v29 = vsub.f32 %v9437_v57, %v3628_v17  ;;  %v3662_v33 = vsub.f32 %v9438_v22, %v3628_v17 }
 0x6f8   : > { %1652 = vst.msk [vmem:[#allocation4] sm:$0xff] %vm1041_vm0, %v1636_v6  ;;  %v5568_v9 = vpop.eup %5567  ;;  %5589 = vpow2.f32 %v3717_v37  ;;  %v8597_v17 = vpop.f32.mrf.mxu0 }
 0x6f9   : > { %v5570_v10 = vpop.eup %5569  ;;  %v3719_v27 = vmul.f32 1.442695, %v3661_v29  ;;  %v3721_v60 = vmul.f32 1.442695, %v3662_v33  ;;  %5591 = vrcp.f32 %v1421_v31 }
 0x6fa   : > { %v5572_v15 = vpop.eup %5571  ;;  %5593 = vpow2.f32 %v3725_v54  ;;  %4043 = vmatprep.mubr.f32.mxu0 %v5570_v10  ;;  %v3634_v40 = vpop.xlane.xlu1 %3633  ;;  %v3755_v1 = vadd.f32 %v5570_v10, %v5568_v9 }
 0x6fb   : > { %v1427_v47 = vpop.xlane.xlu0 %1426  ;;  %5595 = vpow2.f32 %v3719_v27  ;;  %4044 = vmatmul.mubr.f32.gmra.mxu0 %v5568_v9  ;;  %v3665_v14 = vsub.f32 %v8211_v26, %v3634_v40  ;;  %v3666_v38 = vsub.f32 %v8204_v24, %v3634_v40  ;;  %v1638_v2 = vmul.f32 %v5572_v15, %v4710_v36  ;;  %v8602_v10 = vpop.f32.mrf.mxu0 }
 0x6fc   : > { %v5574_v25 = vpop.eup %5573  ;;  %5597 = vpow2.f32 %v3721_v60  ;;  %4048 = vmatprep.mubr.f32.mxu0 %v8540_v20  ;;  %3756 = vadd.xlane.f32.xlu0 %v3755_v1 }
 0x6fd   : > { %v5576_v21 = vpop.eup %5575  ;;  %v3727_v44 = vmul.f32 1.442695, %v3665_v14  ;;  %v3729_v45 = vmul.f32 1.442695, %v3666_v38  ;;  %5599 = vrcp.f32 %v1427_v47  ;;  %1654 = vst.msk [vmem:[#allocation4 + $0x10] sm:$0xff] %vm1041_vm0, %v1638_v2 }
 0x6fe   : > { %v5578_v26 = vpop.eup %5577  ;;  %v8589_v13 = vpop.xlane.xlu1 %2049  ;;  %v3761_v46 = vadd.f32 %v5576_v21, %v5574_v25 }
 0x6ff   : > { %v1433_v24 = vpop.xlane.xlu0 %1432  ;;  %5601 = vpow2.f32 %v3727_v44  ;;  %4049 = vmatmul.mubr.f32.gmra.mxu0 %v8538_v32  ;;  %v1640_v34 = vmul.f32 %v5578_v26, %v4716_v52 }
 0x700   : > { %v5580_v20 = vpop.eup %5579  ;;  %5603 = vpow2.f32 %v3729_v45  ;;  %4053 = vmatprep.mubr.f32.mxu0 %v5576_v21  ;;  %3762 = vadd.xlane.f32.xlu0 %v3761_v46  ;;  %v9444_v21 = vld [vmem:[#allocation68_spill] sm:$0xff] }
 0x701   : > { %v5582_v28 = vpop.eup %5581  ;;  %1656 = vst.msk [vmem:[#allocation4 + $0x20] sm:$0xff] %vm1041_vm0, %v1640_v34  ;;  %5605 = vrcp.f32 %v1433_v24 }
 0x702   : > { %v5584_v55 = vpop.eup %5583  ;;  %v2056_v63 = vpop.xlane.xlu1 %2055  ;;  %v3764_v37 = vadd.f32 %v5582_v28, %v5580_v20 }
 0x703   : > { %v1439_v7 = vpop.xlane.xlu0 %1438  ;;  %v5586_v6 = vpop.eup %5585  ;;  %4054 = vmatmul.mubr.f32.gmra.mxu0 %v5574_v25  ;;  %v1642_v32 = vmul.f32 %v5584_v55, %v4722_v53  ;;  %v9443_v25 = vld [vmem:[#allocation70_spill] sm:$0xff] }
 0x704   : > { %v5588_v54 = vpop.eup %5587  ;;  %5607 = vrcp.f32 %v1439_v7  ;;  %4058 = vmatprep.mubr.f32.mxu0 %v5582_v28  ;;  %3765 = vadd.xlane.f32.xlu1 %v3764_v37  ;;  %v4746_v11 = vadd.f32 %v9444_v21, %v9443_v25  ;;  %v9445_v28 = vld [vmem:[#allocation87_spill] sm:$0xff]  ;;  %v9446_v53 = vld [vmem:[#allocation42_spill] sm:$0xff] }
 0x705   : > { %v5590_v31 = vpop.eup %5589  ;;  %1658 = vst.msk [vmem:[#allocation4 + $0x30] sm:$0xff] %vm1041_vm0, %v1642_v32  ;;  %5609 = vrcp.f32 %v8526_v58  ;;  %v4707_v55 = vadd.f32 %v9446_v53, %v9445_v28 }
 0x706   : > { %v5592_v42 = vpop.eup %5591  ;;  %v2062_v57 = vpop.xlane.xlu1 %2061  ;;  %v3767_v29 = vadd.f32 %v5590_v31, %v5588_v54 }
 0x707   : > { %v5594_v22 = vpop.eup %5593  ;;  %4059 = vmatmul.mubr.f32.gmra.mxu0 %v5580_v20  ;;  %v1644_v33 = vmul.f32 %v5592_v42, %v4728_v43  ;;  %v2071_v24 = vpop.xlane.xlu0 %2070 }
 0x708   : > { %v5596_v9 = vpop.eup %5595  ;;  %4063 = vmatprep.mubr.f32.mxu0 %v5590_v31  ;;  %3768 = vadd.xlane.f32.xlu0 %v3767_v29  ;;  %v3773_v27 = vadd.f32 %v5594_v22, %v5586_v6  ;;  %v9448_v29 = vld [vmem:[#allocation33_spill] sm:$0xff] }
 0x709   : > { %v5598_v62 = vpop.eup %5597  ;;  %1660 = vst.msk [vmem:[#allocation4 + $0x40] sm:$0xff] %vm1041_vm0, %v1644_v33  ;;  %v8607_v0 = vpop.f32.mrf.mxu0 }
 0x70a   : > { %v5600_v56 = vpop.eup %5599  ;;  %v2068_v36 = vpop.xlane.xlu1 %2067  ;;  %v3770_v60 = vadd.f32 %v5598_v62, %v5596_v9 }
 0x70b   : > { %4064 = vmatmul.mubr.f32.gmra.mxu0 %v5588_v54  ;;  %v1646_v15 = vmul.f32 %v5600_v56, %v4734_v16  ;;  %v8609_v47 = vpop.f32.mrf.mxu0  ;;  %v4784_v54 = vadd.f32 %v8577_v59, %v8572_v35  ;;  %v4790_v35 = vadd.f32 %v8602_v10, %v8597_v17 }
 0x70c   : > { %v5602_v40 = vpop.eup %5601  ;;  %3774 = vadd.xlane.f32.xlu0 %v3773_v27  ;;  %4068 = vmatprep.mubr.f32.mxu0 %v5598_v62  ;;  %v4793_v59 = vadd.f32 %v8609_v47, %v8607_v0  ;;  %v9449_v47 = vld [vmem:[#allocation101_spill] sm:$0xff] }
 0x70d   : > { %v5604_v1 = vpop.eup %5603  ;;  %3771 = vadd.xlane.f32.xlu1 %v3770_v60  ;;  %1662 = vst.msk [vmem:[#allocation4 + $0x50] sm:$0xff] %vm1041_vm0, %v1646_v15  ;;  %v8615_v5 = vpop.f32.mrf.mxu0 }
 0x70e   : > { %v1400_v14 = vpop.xlane.xlu1 %1399  ;;  %v3776_v38 = vadd.f32 %v5604_v1, %v5602_v40  ;;  %v5606_v2 = vpop.eup %5605 }
 0x70f   : > { %4069 = vmatmul.mubr.f32.gmra.mxu0 %v5596_v9  ;;  %5611 = vrcp.f32 %v1400_v14  ;;  %v4795_v4 = vpop.f32.mrf.mxu0  ;;  %v1648_v52 = vmul.f32 %v5606_v2, %v4740_v30  ;;  %v4725_v2 = vadd.f32 %v8510_v49, %v8500_v41 }
 0x710   : > { %5613 = vrcp.f32 %v8589_v13  ;;  %4073 = vmatprep.mubr.f32.mxu0 %v5594_v22  ;;  %v4796_v15 = vadd.f32 %v4795_v4, %v8615_v5 }
 0x711   : > { %v5608_v44 = vpop.eup %5607  ;;  %3777 = vadd.xlane.f32.xlu1 %v3776_v38  ;;  %5615 = vrcp.f32 %v8530_v23  ;;  %v4797_v58 = vpop.f32.mrf.mxu0  ;;  %1664 = vst.msk [vmem:[#allocation4 + $0x60] sm:$0xff] %vm1041_vm0, %v1648_v52 }
 0x712   : > { %v1406_v3 = vpop.xlane.xlu1 %1405  ;;  %v1650_v50 = vmul.f32 %v5608_v44, %v4746_v11  ;;  %v5610_v20 = vpop.eup %5609 }
 0x713   : > { %4074 = vmatmul.mubr.f32.gmra.mxu0 %v5586_v6  ;;  %5617 = vrcp.f32 %v1406_v3  ;;  %v4798_v45 = vpop.f32.mrf.mxu0  ;;  %v2077_v6 = vpop.xlane.xlu0 %2076  ;;  %v2414_v62 = vmul.f32 %v5610_v20, %v4784_v54 }
 0x714   : > { %5619 = vrcp.f32 %v2056_v63  ;;  %4078 = vmatprep.mubr.f32.mxu0 %v5604_v1  ;;  %1666 = vst.msk [vmem:[#allocation4 + $0x70] sm:$0xff] %vm1041_vm0, %v1650_v50  ;;  %v4799_v17 = vadd.f32 %v4798_v45, %v4797_v58  ;;  %v4731_v45 = vadd.f32 %v8528_v18, %v8523_v8  ;;  %v4737_v8 = vadd.f32 %v8554_v61, %v8549_v51 }
 0x715   : > { %v8623_v26 = vpop.f32.mrf.mxu0 }
 0x716   : > { %v1412_v13 = vpop.xlane.xlu1 %1411 }
 0x717   : > { %4079 = vmatmul.mubr.f32.gmra.mxu0 %v5602_v40  ;;  %5621 = vrcp.f32 %v1412_v13  ;;  %v4801_v23 = vpop.f32.mrf.mxu0 }
 0x718   : > { %5623 = vrcp.f32 %v2062_v57  ;;  %v9447_v57 = vld [vmem:[#allocation86_spill] sm:$0xff]  ;;  %v4802_v11 = vadd.f32 %v4801_v23, %v8623_v26 }
 0x719   : > { %5625 = vrcp.f32 %v8536_v39  ;;  %v4803_v46 = vpop.f32.mrf.mxu0  ;;  %v4787_v39 = vadd.f32 %v8592_v19, %v8583_v12  ;;  %v4713_v22 = vadd.f32 %v9448_v29, %v9447_v57 }
 0x71a   : > { %v1418_v34 = vpop.xlane.xlu1 %1417 }
 0x71b   : > { %5627 = vrcp.f32 %v1418_v34  ;;  %v4804_v7 = vpop.f32.mrf.mxu0 }
 0x71c   : > { %v5612_v63 = vpop.eup %5611  ;;  %5629 = vrcp.f32 %v8544_v48  ;;  %v4805_v4 = vadd.f32 %v4804_v7, %v4803_v46 }
 0x71d   : > { %v5614_v37 = vpop.eup %5613  ;;  %v1637_v32 = vmul.f32 %v5612_v63, %v4707_v55  ;;  %5631 = vrcp.f32 %v2068_v36  ;;  %v4806_v31 = vpop.f32.mrf.mxu0 }
 0x71e   : > { %v1424_v43 = vpop.xlane.xlu1 %1423  ;;  %v5616_v42 = vpop.eup %5615  ;;  %v2415_v9 = vmul.f32 %v5614_v37, %v4787_v39 }
 0x71f   : > { %5633 = vrcp.f32 %v1424_v43  ;;  %1653 = vst.msk [vmem:[#allocation4 + $0x8] sm:$0xff] %vm1041_vm0, %v1637_v32  ;;  %v4807_v48 = vpop.f32.mrf.mxu0  ;;  %v2083_v36 = vpop.xlane.xlu0 %2082  ;;  %v2416_v40 = vmul.f32 %v5616_v42, %v4790_v35  ;;  %v9451_v43 = vld [vmem:[#allocation82_spill] sm:$0xff] }
 0x720   : > { %v5618_v33 = vpop.eup %5617  ;;  %5635 = vrcp.f32 %v2071_v24  ;;  %v4808_v23 = vadd.f32 %v4807_v48, %v4806_v31  ;;  %v9450_v31 = vld [vmem:[#allocation31_spill] sm:$0xff] }
 0x721   : > { %v5620_v16 = vpop.eup %5619  ;;  %v1639_v56 = vmul.f32 %v5618_v33, %v4713_v22  ;;  %v8641_v12 = vpop.f32.mrf.mxu0  ;;  %v4743_v42 = vadd.f32 %v9451_v43, %v9450_v31 }
 0x722   : > { %2448 = vrot.lane.b32.xlu1 %v2415_v9, %s5983_s4  ;;  %2446 = vrot.lane.b32.xlu0 %v2414_v62, %s5983_s4  ;;  %v2417_v60 = vmul.f32 %v5620_v16, %v4793_v59  ;;  %v9452_v62 = vld [vmem:[#allocation71_spill] sm:$0xff]  ;;  %v9453_v16 = vld [vmem:[#allocation69_spill] sm:$0xff] }
 0x723   : > { %v1430_v19 = vpop.xlane.xlu1 %1429  ;;  %1655 = vst.msk [vmem:[#allocation4 + $0x18] sm:$0xff] %vm1041_vm0, %v1639_v56  ;;  %v8646_v10 = vpop.f32.mrf.mxu0  ;;  %v4749_v56 = vadd.f32 %v9453_v16, %v9452_v62 }
 0x724   : > { %5637 = vrcp.f32 %v1430_v19  ;;  %v5622_v27 = vpop.eup %5621  ;;  %v2089_v44 = vpop.xlane.xlu0 %2088 }
 0x725   : > { %v5624_v0 = vpop.eup %5623  ;;  %v1641_v1 = vmul.f32 %v5622_v27, %v9449_v47  ;;  %5639 = vrcp.f32 %v2077_v6  ;;  %v4812_v30 = vpop.f32.mrf.mxu0 }
 0x726   : > { %2450 = vrot.lane.b32.xlu1 %v2416_v40, %s5983_s4  ;;  %2452 = vrot.lane.b32.xlu0 %v2417_v60, %s5983_s4  ;;  %v5626_v38 = vpop.eup %5625  ;;  %v2419_v21 = vmul.f32 %v5624_v0, %v4799_v17  ;;  %v4811_v0 = vadd.f32 %v8646_v10, %v8641_v12 }
 0x727   : > { %v1436_v14 = vpop.xlane.xlu1 %1435  ;;  %1657 = vst.msk [vmem:[#allocation4 + $0x28] sm:$0xff] %vm1041_vm0, %v1641_v1  ;;  %v2418_v25 = vmul.f32 %v5626_v38, %v4796_v15  ;;  %v4813_v52 = vpop.f32.mrf.mxu0 }
 0x728   : > { %5641 = vrcp.f32 %v1436_v14  ;;  %v5628_v5 = vpop.eup %5627  ;;  %v4814_v63 = vadd.f32 %v4813_v52, %v4812_v30  ;;  %v2890_v37 = vpop.xlane.xlu0 %2889 }
 0x729   : > { %v1643_v58 = vmul.f32 %v5628_v5, %v4725_v2  ;;  %v5630_v3 = vpop.eup %5629  ;;  %5643 = vrcp.f32 %v2083_v36  ;;  %v8656_v50 = vpop.f32.mrf.mxu0 }
 0x72a   : > { %2454 = vrot.lane.b32.xlu1 %v2418_v25, %s5983_s4  ;;  %2456 = vrot.lane.b32.xlu0 %v2419_v21, %s5983_s4  ;;  %v5632_v49 = vpop.eup %5631  ;;  %v2420_v13 = vmul.f32 %v5630_v3, %v4802_v11 }
 0x72b   : > { %v1442_v41 = vpop.xlane.xlu1 %1441  ;;  %1659 = vst.msk [vmem:[#allocation4 + $0x38] sm:$0xff] %vm1041_vm0, %v1643_v58  ;;  %v2421_v24 = vmul.f32 %v5632_v49, %v4805_v4  ;;  %v4816_v46 = vpop.f32.mrf.mxu0 }
 0x72c   : > { %5645 = vrcp.f32 %v1442_v41  ;;  %v5634_v26 = vpop.eup %5633  ;;  %v2896_v36 = vpop.xlane.xlu0 %2895  ;;  %v4817_v5 = vadd.f32 %v4816_v46, %v8656_v50 }
 0x72d   : > { %5647 = vrcp.f32 %v2089_v44  ;;  %v1645_v34 = vmul.f32 %v5634_v26, %v4731_v45  ;;  %v4818_v20 = vpop.f32.mrf.mxu0  ;;  %v5636_v53 = vpop.eup %5635 }
 0x72e   : > { %2458 = vrot.lane.b32.xlu1 %v2420_v13, %s5983_s4  ;;  %2460 = vrot.lane.b32.xlu0 %v2421_v24, %s5983_s4  ;;  %v2422_v55 = vmul.f32 %v5636_v53, %v4808_v23 }
 0x72f   : > { %v2074_v28 = vpop.xlane.xlu1 %2073  ;;  %1661 = vst.msk [vmem:[#allocation4 + $0x48] sm:$0xff] %vm1041_vm0, %v1645_v34  ;;  %v4819_v7 = vpop.f32.mrf.mxu0 }
 0x730   : > { %5649 = vrcp.f32 %v2074_v28  ;;  %v4820_v57 = vadd.f32 %v4819_v7, %v4818_v20 }
 0x731   : > { %v5638_v18 = vpop.eup %5637  ;;  %v4821_v32 = vpop.f32.mrf.mxu0 }
 0x732   : > { %v1647_v6 = vmul.f32 %v5638_v18, %v4737_v8  ;;  %2462 = vrot.lane.b32.xlu1 %v2422_v55, %s5983_s4  ;;  %v5640_v39 = vpop.eup %5639  ;;  %v2902_v8 = vpop.xlane.xlu0 %2901 }
 0x733   : > { %v2080_v54 = vpop.xlane.xlu1 %2079  ;;  %v2424_v61 = vmul.f32 %v5640_v39, %v4814_v63  ;;  %v4822_v29 = vpop.f32.mrf.mxu0 }
 0x734   : > { %5651 = vrcp.f32 %v2080_v54  ;;  %1663 = vst.msk [vmem:[#allocation4 + $0x58] sm:$0xff] %vm1041_vm0, %v1647_v6  ;;  %v4823_v52 = vadd.f32 %v4822_v29, %v4821_v32 }
 0x735   : > { %v5642_v51 = vpop.eup %5641  ;;  %5653 = vrcp.f32 %v2890_v37  ;;  %v4824_v33 = vpop.f32.mrf.mxu0 }
 0x736   : > { %v1649_v22 = vmul.f32 %v5642_v51, %v4743_v42  ;;  %2466 = vrot.lane.b32.xlu1 %v2424_v61, %s5983_s4  ;;  %v5644_v9 = vpop.eup %5643  ;;  %v2908_v63 = vpop.xlane.xlu0 %2907 }
 0x737   : > { %v2086_v48 = vpop.xlane.xlu1 %2085  ;;  %v2426_v59 = vmul.f32 %v5644_v9, %v4820_v57  ;;  %v4825_v19 = vpop.f32.mrf.mxu0 }
 0x738   : > { %5655 = vrcp.f32 %v2086_v48  ;;  %1665 = vst.msk [vmem:[#allocation4 + $0x68] sm:$0xff] %vm1041_vm0, %v1649_v22  ;;  %v4826_v27 = vadd.f32 %v4825_v19, %v4824_v33 }
 0x739   : > { %v5646_v35 = vpop.eup %5645  ;;  %v4827_v17 = vpop.f32.mrf.mxu0 }
 0x73a   : > { %v1651_v60 = vmul.f32 %v5646_v35, %v4749_v56  ;;  %v5648_v15 = vpop.eup %5647  ;;  %2470 = vrot.lane.b32.xlu1 %v2426_v59, %s5983_s4  ;;  %v2914_v6 = vpop.xlane.xlu0 %2913 }
 0x73b   : > { %v2092_v40 = vpop.xlane.xlu1 %2091  ;;  %v2428_v47 = vmul.f32 %v5648_v15, %v4826_v27  ;;  %v4828_v30 = vpop.f32.mrf.mxu0 }
 0x73c   : > { %5657 = vrcp.f32 %v2092_v40  ;;  %1667 = vst.msk [vmem:[#allocation4 + $0x78] sm:$0xff] %vm1041_vm0, %v1651_v60  ;;  %v4829_v50 = vadd.f32 %v4828_v30, %v4827_v17 }
 0x73d   : > { %v5650_v1 = vpop.eup %5649  ;;  %5659 = vrcp.f32 %v2896_v36  ;;  %v4862_v38 = vpop.f32.mrf.mxu0 }
 0x73e   : > { %v2423_v14 = vmul.f32 %v5650_v1, %v4811_v0  ;;  %2474 = vrot.lane.b32.xlu1 %v2428_v47, %s5983_s4  ;;  %v2920_v29 = vpop.xlane.xlu0 %2919 }
 0x73f   : > { %v2893_v2 = vpop.xlane.xlu1 %2892  ;;  %v4863_v21 = vpop.f32.mrf.mxu0 }
 0x740   : > { %5661 = vrcp.f32 %v2893_v2  ;;  %2464 = vrot.lane.b32.xlu0 %v2423_v14, %s5983_s4  ;;  %v4864_v12 = vadd.f32 %v4863_v21, %v4862_v38 }
 0x741   : > { %v5652_v25 = vpop.eup %5651 }
 0x742   : > { %v2425_v10 = vmul.f32 %v5652_v25, %v4817_v5  ;;  %v5654_v11 = vpop.eup %5653  ;;  %v4865_v4 = vpop.f32.mrf.mxu0 }
 0x743   : > { %v3257_v44 = vmul.f32 %v5654_v11, %v4864_v12  ;;  %v2899_v28 = vpop.xlane.xlu1 %2898  ;;  %v2926_v56 = vpop.xlane.xlu0 %2925  ;;  %v4228_v11 = vld [vmem:[#allocation11 + $0x78] sm:$0xff] }
 0x744   : > { %2468 = vrot.lane.b32.xlu0 %v2425_v10, %s5983_s4  ;;  %v4866_v3 = vpop.f32.mrf.mxu0  ;;  %5663 = vrcp.f32 %v2899_v28  ;;  %5078 = vmatprep.subr.mxu1 %v4228_v11  ;;  %v4224_v28 = vld [vmem:[#allocation11 + $0x58] sm:$0xff] }
 0x745   : > { %v5656_v58 = vpop.eup %5655  ;;  %3289 = vrot.lane.b32.xlu1 %v3257_v44, %s5982_s12  ;;  %v4867_v46 = vadd.f32 %v4866_v3, %v4865_v4  ;;  %5665 = vrcp.f32 %v2902_v8  ;;  %v4227_v4 = vld [vmem:[#allocation11 + $0x70] sm:$0xff]  ;;  %5079 = vmatpush3.msra.mxu1 %v4228_v11 }
 0x746   : > { %v2427_v41 = vmul.f32 %v5656_v58, %v4823_v52  ;;  %v4868_v49 = vpop.f32.mrf.mxu0  ;;  %5080 = vmatprep.subr.mxu1 %v4227_v4 }
 0x747   : > { %v2905_v18 = vpop.xlane.xlu1 %2904  ;;  %v2932_v40 = vpop.xlane.xlu0 %2931  ;;  %5081 = vmatpush3.msra.mxu1 %v4227_v4 }
 0x748   : > { %2472 = vrot.lane.b32.xlu0 %v2427_v41, %s5983_s4  ;;  %v4869_v26 = vpop.f32.mrf.mxu0  ;;  %5667 = vrcp.f32 %v2905_v18 }
 0x749   : > { %v5658_v45 = vpop.eup %5657  ;;  %v4870_v24 = vadd.f32 %v4869_v26, %v4868_v49  ;;  %5669 = vrcp.f32 %v2908_v63  ;;  %v4225_v26 = vld [vmem:[#allocation11 + $0x60] sm:$0xff] }
 0x74a   : > { %v2429_v13 = vmul.f32 %v5658_v45, %v4829_v50  ;;  %v5660_v23 = vpop.eup %5659  ;;  %v4226_v45 = vld [vmem:[#allocation11 + $0x68] sm:$0xff] }
 0x74b   : > { %v3259_v34 = vmul.f32 %v5660_v23, %v4870_v24  ;;  %v2911_v55 = vpop.xlane.xlu1 %2910  ;;  %v8692_v2 = vpop.xlane.xlu0 %3732  ;;  %5082 = vmatprep.subr.mxu1 %v4226_v45 }
 0x74c   : > { %2476 = vrot.lane.b32.xlu0 %v2429_v13, %s5983_s4  ;;  %5671 = vrcp.f32 %v2911_v55  ;;  %5083 = vmatpush3.msra.mxu1 %v4226_v45 }
 0x74d   : > { %v5662_v20 = vpop.eup %5661  ;;  %3293 = vrot.lane.b32.xlu1 %v3259_v34, %s5982_s12  ;;  %5673 = vrcp.f32 %v2914_v6  ;;  %5084 = vmatprep.subr.mxu1 %v4225_v26  ;;  %v4222_v6 = vld [vmem:[#allocation11 + $0x48] sm:$0xff] }
 0x74e   : > { %v3258_v53 = vmul.f32 %v5662_v20, %v4867_v46  ;;  %5085 = vmatpush3.msra.mxu1 %v4225_v26 }
 0x74f   : > { %v2917_v39 = vpop.xlane.xlu1 %2916  ;;  %v8698_v41 = vpop.xlane.xlu0 %3738  ;;  %5086 = vmatprep.subr.mxu1 %v4224_v28 }
 0x750   : > { %3291 = vrot.lane.b32.xlu0 %v3258_v53, %s5982_s12  ;;  %5675 = vrcp.f32 %v2917_v39  ;;  %v4223_v53 = vld [vmem:[#allocation11 + $0x50] sm:$0xff]  ;;  %5087 = vmatpush3.msra.mxu1 %v4224_v28 }
 0x751   : > { %v5664_v54 = vpop.eup %5663  ;;  %5677 = vrcp.f32 %v2920_v29  ;;  %5088 = vmatprep.subr.mxu1 %v4223_v53  ;;  %v4219_v29 = vld [vmem:[#allocation11 + $0x30] sm:$0xff] }
 0x752   : > { %v5666_v61 = vpop.eup %5665  ;;  %5089 = vmatpush3.msra.mxu1 %v4223_v53 }
 0x753   : > { %v2923_v33 = vpop.xlane.xlu1 %2922  ;;  %v8703_v8 = vpop.xlane.xlu0 %3744  ;;  %5090 = vmatprep.subr.mxu1 %v4222_v6 }
 0x754   : > { %5679 = vrcp.f32 %v2923_v33  ;;  %5091 = vmatpush3.msra.mxu1 %v4222_v6 }
 0x755   : > { %v5668_v62 = vpop.eup %5667  ;;  %5681 = vrcp.f32 %v2926_v56 }
 0x756   : > { %v5670_v36 = vpop.eup %5669 }
 0x757   : > { %v2929_v27 = vpop.xlane.xlu1 %2928 }
 0x758   : > { %5683 = vrcp.f32 %v2929_v27 }
 0x759   : > { %v5672_v47 = vpop.eup %5671  ;;  %5685 = vrcp.f32 %v2932_v40  ;;  %v4215_v40 = vld [vmem:[#allocation11 + $0x10] sm:$0xff] }
 0x75a   : > { %v5674_v25 = vpop.eup %5673 }
 0x75b   : > { %v4871_v7 = vpop.f32.mrf.mxu0  ;;  %v2935_v14 = vpop.xlane.xlu1 %2934 }
 0x75c   : > { %5687 = vrcp.f32 %v2935_v14 }
 0x75d   : > { %v4872_v37 = vpop.f32.mrf.mxu0  ;;  %v5676_v44 = vpop.eup %5675  ;;  %5689 = vrcp.f32 %v8692_v2 }
 0x75e   : > { %v4873_v32 = vadd.f32 %v4872_v37, %v4871_v7  ;;  %v5678_v24 = vpop.eup %5677 }
 0x75f   : > { %v4874_v31 = vpop.f32.mrf.mxu0  ;;  %v8696_v58 = vpop.xlane.xlu1 %3735 }
 0x760   : > { %v3260_v43 = vmul.f32 %v5664_v54, %v4873_v32  ;;  %v4221_v32 = vld [vmem:[#allocation11 + $0x40] sm:$0xff]  ;;  %5691 = vrcp.f32 %v8696_v58 }
 0x761   : > { %v4875_v42 = vpop.f32.mrf.mxu0  ;;  %v5680_v55 = vpop.eup %5679  ;;  %5092 = vmatprep.subr.mxu1 %v4221_v32  ;;  %5693 = vrcp.f32 %v8698_v41 }
 0x762   : > { %v4876_v51 = vadd.f32 %v4875_v42, %v4874_v31  ;;  %3295 = vrot.lane.b32.xlu0 %v3260_v43, %s5982_s12  ;;  %v5682_v39 = vpop.eup %5681  ;;  %v8709_v42 = vpop.xlane.xlu0 %3750  ;;  %5093 = vmatpush3.msra.mxu1 %v4221_v32 }
 0x763   : > { %v4877_v57 = vpop.f32.mrf.mxu0  ;;  %v8701_v34 = vpop.xlane.xlu1 %3741 }
 0x764   : > { %v3261_v22 = vmul.f32 %v5666_v61, %v4876_v51  ;;  %5695 = vrcp.f32 %v8701_v34 }
 0x765   : > { %v4878_v48 = vpop.f32.mrf.mxu0  ;;  %v5684_v33 = vpop.eup %5683  ;;  %5697 = vrcp.f32 %v8703_v8 }
 0x766   : > { %v4879_v9 = vadd.f32 %v4878_v48, %v4877_v57  ;;  %3297 = vrot.lane.b32.xlu1 %v3261_v22, %s5982_s12  ;;  %v4220_v57 = vld [vmem:[#allocation11 + $0x38] sm:$0xff] }
 0x767   : > { %v4880_v16 = vpop.f32.mrf.mxu0  ;;  %v8707_v31 = vpop.xlane.xlu1 %3747  ;;  %5094 = vmatprep.subr.mxu1 %v4220_v57 }
 0x768   : > { %v3262_v35 = vmul.f32 %v5668_v62, %v4879_v9  ;;  %5095 = vmatpush3.msra.mxu1 %v4220_v57  ;;  %5699 = vrcp.f32 %v8707_v31 }
 0x769   : > { %v4881_v59 = vpop.f32.mrf.mxu0  ;;  %5096 = vmatprep.subr.mxu1 %v4219_v29  ;;  %5701 = vrcp.f32 %v8709_v42 }
 0x76a   : > { %v4882_v19 = vadd.f32 %v4881_v59, %v4880_v16  ;;  %3299 = vrot.lane.b32.xlu0 %v3262_v35, %s5982_s12  ;;  %5097 = vmatpush3.msra.mxu1 %v4219_v29  ;;  %v4218_v35 = vld [vmem:[#allocation11 + $0x28] sm:$0xff]  ;;  %v4217_v59 = vld [vmem:[#allocation11 + $0x20] sm:$0xff] }
 0x76b   : > { %v4883_v60 = vpop.f32.mrf.mxu0  ;;  %v8715_v16 = vpop.xlane.xlu1 %3753  ;;  %5098 = vmatprep.subr.mxu1 %v4218_v35 }
 0x76c   : > { %v3263_v15 = vmul.f32 %v5670_v36, %v4882_v19  ;;  %v5686_v36 = vpop.eup %5685  ;;  %5099 = vmatpush3.msra.mxu1 %v4218_v35  ;;  %5703 = vrcp.f32 %v8715_v16 }
 0x76d   : > { %v4884_v17 = vpop.f32.mrf.mxu0  ;;  %5100 = vmatprep.subr.mxu1 %v4217_v59 }
 0x76e   : > { %v4885_v0 = vadd.f32 %v4884_v17, %v4883_v60  ;;  %3301 = vrot.lane.b32.xlu1 %v3263_v15, %s5982_s12  ;;  %5101 = vmatpush3.msra.mxu1 %v4217_v59  ;;  %v4216_v17 = vld [vmem:[#allocation11 + $0x18] sm:$0xff] }
 0x76f   : > { %v4886_v1 = vpop.f32.mrf.mxu0  ;;  %5102 = vmatprep.subr.mxu1 %v4216_v17 }
 0x770   : > { %v3264_v30 = vmul.f32 %v5672_v47, %v4885_v0  ;;  %5103 = vmatpush3.msra.mxu1 %v4216_v17 }
 0x771   : > { %v4887_v38 = vpop.f32.mrf.mxu0  ;;  %5104 = vmatprep.subr.mxu1 %v4215_v40 }
 0x772   : > { %v4888_v5 = vadd.f32 %v4887_v38, %v4886_v1  ;;  %3303 = vrot.lane.b32.xlu0 %v3264_v30, %s5982_s12  ;;  %v5688_v1 = vpop.eup %5687  ;;  %v8723_v30 = vpop.xlane.xlu1 %3759  ;;  %5105 = vmatpush3.msra.mxu1 %v4215_v40 }
 0x773   : > { %v4889_v21 = vpop.f32.mrf.mxu0 }
 0x774   : > { %v3265_v12 = vmul.f32 %v5674_v25, %v4888_v5  ;;  %v4214_v5 = vld [vmem:[#allocation11 + $0x8] sm:$0xff]  ;;  %v4213_v25 = vld [vmem:[#allocation11] sm:$0xff] }
 0x775   : > { %v4890_v10 = vpop.f32.mrf.mxu0  ;;  %5106 = vmatprep.subr.mxu1 %v4214_v5 }
 0x776   : > { %v4891_v52 = vadd.f32 %v4890_v10, %v4889_v21  ;;  %3305 = vrot.lane.b32.xlu1 %v3265_v12, %s5982_s12  ;;  %v5690_v10 = vpop.eup %5689  ;;  %5107 = vmatpush3.msra.mxu1 %v4214_v5 }
 0x777   : > { %v4892_v3 = vpop.f32.mrf.mxu0  ;;  %5108 = vmatprep.subr.mxu1 %v4213_v25  ;;  %v5692_v41 = vpop.eup %5691 }
 0x778   : > { %v3266_v49 = vmul.f32 %v5676_v44, %v4891_v52  ;;  %5109 = vmatpush3.msra.mxu1 %v4213_v25 }
 0x779   : > { %v4893_v50 = vpop.f32.mrf.mxu0 }
 0x77a   : > { %v4894_v13 = vadd.f32 %v4893_v50, %v4892_v3  ;;  %3307 = vrot.lane.b32.xlu0 %v3266_v49, %s5982_s12 }
 0x77b   : > { %v4895_v23 = vpop.f32.mrf.mxu0 }
 0x77c   : > { %v3267_v46 = vmul.f32 %v5678_v24, %v4894_v13 }
 0x77d   : > { %v4896_v20 = vpop.f32.mrf.mxu0 }
 0x77e   : > { %v4897_v18 = vadd.f32 %v4896_v20, %v4895_v23  ;;  %3309 = vrot.lane.b32.xlu1 %v3267_v46, %s5982_s12  ;;  %v5694_v23 = vpop.eup %5693 }
 0x77f   : > { %v4898_v63 = vpop.f32.mrf.mxu0 }
 0x780   : > { %v3268_v7 = vmul.f32 %v5680_v55, %v4897_v18  ;;  %v5696_v18 = vpop.eup %5695 }
 0x781   : > { %v4899_v37 = vpop.f32.mrf.mxu0 }
 0x782   : > { %v4900_v54 = vadd.f32 %v4899_v37, %v4898_v63  ;;  %3311 = vrot.lane.b32.xlu0 %v3268_v7, %s5982_s12 }
 0x783   : > { %v4901_v43 = vpop.f32.mrf.mxu0 }
 0x784   : > { %v3269_v51 = vmul.f32 %v5682_v39, %v4900_v54  ;;  %v5698_v54 = vpop.eup %5697 }
 0x785   : > { %v4902_v61 = vpop.f32.mrf.mxu0  ;;  %v8713_v62 = vpop.xlane.xlu0 %3756 }
 0x786   : > { %v4903_v22 = vadd.f32 %v4902_v61, %v4901_v43  ;;  %3313 = vrot.lane.b32.xlu1 %v3269_v51, %s5982_s12  ;;  %v5700_v57 = vpop.eup %5699  ;;  %5705 = vrcp.f32 %v8713_v62 }
 0x787   : > { %v4904_v48 = vpop.f32.mrf.mxu0  ;;  %v5702_v16 = vpop.eup %5701  ;;  %5707 = vrcp.f32 %v8723_v30 }
 0x788   : > { %v3270_v9 = vmul.f32 %v5684_v33, %v4903_v22 }
 0x789   : > { %v4905_v56 = vpop.f32.mrf.mxu0  ;;  %v8720_v0 = vpop.xlane.xlu0 %3762 }
 0x78a   : > { %v4906_v19 = vadd.f32 %v4905_v56, %v4904_v48  ;;  %3315 = vrot.lane.b32.xlu0 %v3270_v9, %s5982_s12  ;;  %5709 = vrcp.f32 %v8720_v0 }
 0x78b   : > { %v4907_v27 = vpop.f32.mrf.mxu0 }
 0x78c   : > { %v3271_v60 = vmul.f32 %v5686_v36, %v4906_v19 }
 0x78d   : > { %v4908_v15 = vpop.f32.mrf.mxu0  ;;  %v8729_v11 = vpop.xlane.xlu1 %3765 }
 0x78e   : > { %v4909_v47 = vadd.f32 %v4908_v15, %v4907_v27  ;;  %3317 = vrot.lane.b32.xlu1 %v3271_v60, %s5982_s12  ;;  %v5704_v27 = vpop.eup %5703  ;;  %5711 = vrcp.f32 %v8729_v11 }
 0x78f   : > { %v4942_v14 = vpop.f32.mrf.mxu0 }
 0x790   : > { %v3272_v38 = vmul.f32 %v5688_v1, %v4909_v47 }
 0x791   : > { %v4943_v2 = vpop.f32.mrf.mxu0  ;;  %v8726_v12 = vpop.xlane.xlu0 %3768 }
 0x792   : > { %v4944_v21 = vadd.f32 %v4943_v2, %v4942_v14  ;;  %3319 = vrot.lane.b32.xlu0 %v3272_v38, %s5982_s12  ;;  %5713 = vrcp.f32 %v8726_v12 }
 0x793   : > { %v4945_v4 = vpop.f32.mrf.mxu0 }
 0x794   : > { %v4100_v52 = vmul.f32 %v5690_v10, %v4944_v21  ;;  %v5706_v21 = vpop.eup %5705 }
 0x795   : > { %v4946_v44 = vpop.f32.mrf.mxu0  ;;  %v8732_v3 = vpop.xlane.xlu0 %3774 }
 0x796   : > { %v4947_v58 = vadd.f32 %v4946_v44, %v4945_v4  ;;  %4132 = vrot.lane.b32.xlu1 %v4100_v52, %s5981_s21  ;;  %v8735_v49 = vpop.xlane.xlu1 %3771  ;;  %v5708_v11 = vpop.eup %5707 }
 0x797   : > { %v4948_v50 = vpop.f32.mrf.mxu0  ;;  %5715 = vrcp.f32 %v8735_v49 }
 0x798   : > { %v4101_v45 = vmul.f32 %v5692_v41, %v4947_v58  ;;  %5717 = vrcp.f32 %v8732_v3 }
 0x799   : > { %v4949_v26 = vpop.f32.mrf.mxu0  ;;  %v2447_v24 = vpop.permute.xlu0 %2446 }
 0x79a   : > { %v4950_v13 = vadd.f32 %v4949_v26, %v4948_v50  ;;  %4134 = vrot.lane.b32.xlu0 %v4101_v45, %s5981_s21  ;;  %2495 = vst.msk [vmem:[#allocation4] sm:$0xff] %vm2494_vm1, %v2447_v24  ;;  %v8740_v46 = vpop.xlane.xlu1 %3777 }
 0x79b   : > { %v4951_v34 = vpop.f32.mrf.mxu0  ;;  %5719 = vrcp.f32 %v8740_v46 }
 0x79c   : > { %v4102_v20 = vmul.f32 %v5694_v23, %v4950_v13  ;;  %v5710_v13 = vpop.eup %5709 }
 0x79d   : > { %v4952_v28 = vpop.f32.mrf.mxu0  ;;  %v2453_v8 = vpop.permute.xlu0 %2452 }
 0x79e   : > { %v4953_v53 = vadd.f32 %v4952_v28, %v4951_v34  ;;  %4136 = vrot.lane.b32.xlu1 %v4102_v20, %s5981_s21  ;;  %2498 = vst.msk [vmem:[#allocation4 + $0x18] sm:$0xff] %vm2494_vm1, %v2453_v8  ;;  %v2449_v55 = vpop.permute.xlu1 %2448  ;;  %v5712_v20 = vpop.eup %5711 }
 0x79f   : > { %v4954_v63 = vpop.f32.mrf.mxu0  ;;  %2496 = vst.msk [vmem:[#allocation4 + $0x8] sm:$0xff] %vm2494_vm1, %v2449_v55  ;;  %v5714_v49 = vpop.eup %5713 }
 0x7a0   : > { %v4103_v7 = vmul.f32 %v5696_v18, %v4953_v53 }
 0x7a1   : > { %v4955_v37 = vpop.f32.mrf.mxu0  ;;  %v2457_v32 = vpop.permute.xlu0 %2456 }
 0x7a2   : > { %v4956_v6 = vadd.f32 %v4955_v37, %v4954_v63  ;;  %4138 = vrot.lane.b32.xlu0 %v4103_v7, %s5981_s21  ;;  %2500 = vst.msk [vmem:[#allocation4 + $0x28] sm:$0xff] %vm2494_vm1, %v2457_v32  ;;  %v2451_v39 = vpop.permute.xlu1 %2450 }
 0x7a3   : > { %v4957_v31 = vpop.f32.mrf.mxu0  ;;  %2497 = vst.msk [vmem:[#allocation4 + $0x10] sm:$0xff] %vm2494_vm1, %v2451_v39 }
 0x7a4   : > { %v4104_v43 = vmul.f32 %v5698_v54, %v4956_v6  ;;  %v5716_v3 = vpop.eup %5715 }
 0x7a5   : > { %v4958_v42 = vpop.f32.mrf.mxu0  ;;  %v2461_v61 = vpop.permute.xlu0 %2460 }
 0x7a6   : > { %v4959_v51 = vadd.f32 %v4958_v42, %v4957_v31  ;;  %4140 = vrot.lane.b32.xlu1 %v4104_v43, %s5981_s21  ;;  %2502 = vst.msk [vmem:[#allocation4 + $0x38] sm:$0xff] %vm2494_vm1, %v2461_v61  ;;  %v2455_v29 = vpop.permute.xlu1 %2454  ;;  %v5718_v46 = vpop.eup %5717 }
 0x7a7   : > { %v4960_v22 = vpop.f32.mrf.mxu0  ;;  %2499 = vst.msk [vmem:[#allocation4 + $0x20] sm:$0xff] %vm2494_vm1, %v2455_v29 }
 0x7a8   : > { %v4105_v33 = vmul.f32 %v5700_v57, %v4959_v51  ;;  %v5720_v29 = vpop.eup %5719 }
 0x7a9   : > { %v4961_v48 = vpop.f32.mrf.mxu0 }
 0x7aa   : > { %v4962_v9 = vadd.f32 %v4961_v48, %v4960_v22  ;;  %4142 = vrot.lane.b32.xlu0 %v4105_v33, %s5981_s21  ;;  %v2459_v56 = vpop.permute.xlu1 %2458 }
 0x7ab   : > { %v4963_v35 = vpop.f32.mrf.mxu0  ;;  %2501 = vst.msk [vmem:[#allocation4 + $0x30] sm:$0xff] %vm2494_vm1, %v2459_v56 }
 0x7ac   : > { %v4106_v59 = vmul.f32 %v5702_v16, %v4962_v9 }
 0x7ad   : > { %v4964_v19 = vpop.f32.mrf.mxu0 }
 0x7ae   : > { %v4965_v36 = vadd.f32 %v4964_v19, %v4963_v35  ;;  %4144 = vrot.lane.b32.xlu1 %v4106_v59, %s5981_s21  ;;  %v2463_v60 = vpop.permute.xlu1 %2462 }
 0x7af   : > { %2503 = vst.msk [vmem:[#allocation4 + $0x40] sm:$0xff] %vm2494_vm1, %v2463_v60 }
 0x7b0   : > { %v4107_v15 = vmul.f32 %v5704_v27, %v4965_v36 }
 0x7b2   : > { %4146 = vrot.lane.b32.xlu0 %v4107_v15, %s5981_s21  ;;  %v2465_v17 = vpop.permute.xlu0 %2464  ;;  %v2467_v40 = vpop.permute.xlu1 %2466 }
 0x7b3   : > { %2504 = vst.msk [vmem:[#allocation4 + $0x48] sm:$0xff] %vm2494_vm1, %v2465_v17  ;;  %2505 = vst.msk [vmem:[#allocation4 + $0x50] sm:$0xff] %vm2494_vm1, %v2467_v40 }
 0x7b6   : > { %v2469_v47 = vpop.permute.xlu0 %2468  ;;  %v2471_v1 = vpop.permute.xlu1 %2470 }
 0x7b7   : > { %2506 = vst.msk [vmem:[#allocation4 + $0x58] sm:$0xff] %vm2494_vm1, %v2469_v47  ;;  %2507 = vst.msk [vmem:[#allocation4 + $0x60] sm:$0xff] %vm2494_vm1, %v2471_v1 }
 0x7ba   : > { %v2473_v14 = vpop.permute.xlu0 %2472  ;;  %v2475_v38 = vpop.permute.xlu1 %2474 }
 0x7bb   : > { %2508 = vst.msk [vmem:[#allocation4 + $0x68] sm:$0xff] %vm2494_vm1, %v2473_v14  ;;  %2509 = vst.msk [vmem:[#allocation4 + $0x70] sm:$0xff] %vm2494_vm1, %v2475_v38  ;;  %v4966_v62 = vpop.f32.mrf.mxu0 }
 0x7bd   : > { %v4967_v2 = vpop.f32.mrf.mxu0 }
 0x7be   : > { %v2477_v5 = vpop.permute.xlu0 %2476  ;;  %v4968_v30 = vadd.f32 %v4967_v2, %v4966_v62  ;;  %v3290_v25 = vpop.permute.xlu1 %3289 }
 0x7bf   : > { %2510 = vst.msk [vmem:[#allocation4 + $0x78] sm:$0xff] %vm2494_vm1, %v2477_v5  ;;  %v4969_v10 = vpop.f32.mrf.mxu0 }
 0x7c0   : > { %3338 = vst.msk [vmem:[#allocation4] sm:$0xff] %vm3337_vm2, %v3290_v25  ;;  %v4108_v0 = vmul.f32 %v5706_v21, %v4968_v30 }
 0x7c1   : > { %v4970_v4 = vpop.f32.mrf.mxu0 }
 0x7c2   : > { %v3292_v52 = vpop.permute.xlu0 %3291  ;;  %v4971_v44 = vadd.f32 %v4970_v4, %v4969_v10  ;;  %v3294_v58 = vpop.permute.xlu1 %3293  ;;  %4148 = vrot.lane.b32.xlu1 %v4108_v0, %s5981_s21 }
 0x7c3   : > { %3339 = vst.msk [vmem:[#allocation4 + $0x8] sm:$0xff] %vm3337_vm2, %v3292_v52  ;;  %3340 = vst.msk [vmem:[#allocation4 + $0x10] sm:$0xff] %vm3337_vm2, %v3294_v58  ;;  %v4972_v41 = vpop.f32.mrf.mxu0 }
 0x7c4   : > { %v4109_v50 = vmul.f32 %v5708_v11, %v4971_v44 }
 0x7c5   : > { %v4973_v45 = vpop.f32.mrf.mxu0 }
 0x7c6   : > { %v4974_v26 = vadd.f32 %v4973_v45, %v4972_v41  ;;  %4150 = vrot.lane.b32.xlu0 %v4109_v50, %s5981_s21 }
 0x7c7   : > { %v4975_v24 = vpop.f32.mrf.mxu0 }
 0x7c8   : > { %v4110_v12 = vmul.f32 %v5710_v13, %v4974_v26 }
 0x7c9   : > { %v4976_v23 = vpop.f32.mrf.mxu0 }
 0x7ca   : > { %v4977_v34 = vadd.f32 %v4976_v23, %v4975_v24  ;;  %4152 = vrot.lane.b32.xlu1 %v4110_v12, %s5981_s21 }
 0x7cb   : > { %v4978_v28 = vpop.f32.mrf.mxu0 }
 0x7cc   : > { %v4111_v53 = vmul.f32 %v5712_v20, %v4977_v34 }
 0x7cd   : > { %v4979_v8 = vpop.f32.mrf.mxu0 }
 0x7ce   : > { %v4980_v18 = vadd.f32 %v4979_v8, %v4978_v28  ;;  %4154 = vrot.lane.b32.xlu0 %v4111_v53, %s5981_s21  ;;  %v4629_v8 = vld [vmem:[%s9454_s29] ss:$0 sm:$0xff] }
 0x7cf   : > { %v4981_v55 = vpop.f32.mrf.mxu0 }
 0x7d0   : > { %v4112_v63 = vmul.f32 %v5714_v49, %v4980_v18 }
 0x7d1   : > { %v4982_v7 = vpop.f32.mrf.mxu0 }
 0x7d2   : > { %v4983_v37 = vadd.f32 %v4982_v7, %v4981_v55  ;;  %4156 = vrot.lane.b32.xlu1 %v4112_v63, %s5981_s21 }
 0x7d3   : > { %v4984_v6 = vpop.f32.mrf.mxu0 }
 0x7d4   : > { %v3296_v32 = vpop.permute.xlu0 %3295  ;;  %v4113_v54 = vmul.f32 %v5716_v3, %v4983_v37 }
 0x7d5   : > { %3341 = vst.msk [vmem:[#allocation4 + $0x18] sm:$0xff] %vm3337_vm2, %v3296_v32  ;;  %v4985_v39 = vpop.f32.mrf.mxu0 }
 0x7d6   : > { %v4986_v31 = vadd.f32 %v4985_v39, %v4984_v6  ;;  %4158 = vrot.lane.b32.xlu0 %v4113_v54, %s5981_s21 }
 0x7d7   : > { %v4987_v43 = vpop.f32.mrf.mxu0 }
 0x7d8   : > { %v3298_v42 = vpop.permute.xlu1 %3297  ;;  %v4114_v51 = vmul.f32 %v5718_v46, %v4986_v31 }
 0x7d9   : > { %3342 = vst.msk [vmem:[#allocation4 + $0x20] sm:$0xff] %vm3337_vm2, %v3298_v42  ;;  %v4988_v61 = vpop.f32.mrf.mxu0 }
 0x7da   : > { %v4989_v57 = vadd.f32 %v4988_v61, %v4987_v43  ;;  %4160 = vrot.lane.b32.xlu1 %v4114_v51, %s5981_s21 }
 0x7dc   : > { %v3300_v22 = vpop.permute.xlu0 %3299  ;;  %v4115_v33 = vmul.f32 %v5720_v29, %v4989_v57 }
 0x7dd   : > { %3343 = vst.msk [vmem:[#allocation4 + $0x28] sm:$0xff] %vm3337_vm2, %v3300_v22 }
 0x7de   : > { %4162 = vrot.lane.b32.xlu0 %v4115_v33, %s5981_s21  ;;  %s5843_s21 = scalar_lea.vmem %s5842_s24, 4096 }
 0x7df   : > { %p5845_p6 = scmp.lt.s32.totalorder %s5843_s21, %s5837_s17 }
 0x7e0   : > { %v3302_v48 = vpop.permute.xlu1 %3301 }
 0x7e1   : > { %3344 = vst.msk [vmem:[#allocation4 + $0x30] sm:$0xff] %vm3337_vm2, %v3302_v48  ;;  %p5846_p5 = por %p5845_p6, %p5844_p12 }
 0x7e3   : > { %p5847_p1 = pnand %p5846_p5, %p5840_p10 }
 0x7e4   : > { %v3304_v9 = vpop.permute.xlu0 %3303 }
 0x7e5   : > { %3345 = vst.msk [vmem:[#allocation4 + $0x38] sm:$0xff] %vm3337_vm2, %v3304_v9 }
 0x7e8   : > { %v3306_v16 = vpop.permute.xlu1 %3305 }
 0x7e9   : > { %3346 = vst.msk [vmem:[#allocation4 + $0x40] sm:$0xff] %vm3337_vm2, %v3306_v16 }
 0x7ec   : > { %v3308_v56 = vpop.permute.xlu0 %3307 }
 0x7ed   : > { %3347 = vst.msk [vmem:[#allocation4 + $0x48] sm:$0xff] %vm3337_vm2, %v3308_v56 }
 0x7f0   : > { %v3310_v35 = vpop.permute.xlu1 %3309 }
 0x7f1   : > { %3348 = vst.msk [vmem:[#allocation4 + $0x50] sm:$0xff] %vm3337_vm2, %v3310_v35 }
 0x7f4   : > { %v3312_v59 = vpop.permute.xlu0 %3311 }
 0x7f5   : > { %3349 = vst.msk [vmem:[#allocation4 + $0x58] sm:$0xff] %vm3337_vm2, %v3312_v59 }
 0x7f8   : > { %v3314_v19 = vpop.permute.xlu1 %3313 }
 0x7f9   : > { %3350 = vst.msk [vmem:[#allocation4 + $0x60] sm:$0xff] %vm3337_vm2, %v3314_v19 }
 0x7fc   : > { %v3316_v36 = vpop.permute.xlu0 %3315 }
 0x7fd   : > { %3351 = vst.msk [vmem:[#allocation4 + $0x68] sm:$0xff] %vm3337_vm2, %v3316_v36 }
 0x800   : > { %v3318_v27 = vpop.permute.xlu1 %3317 }
 0x801   : > { %3352 = vst.msk [vmem:[#allocation4 + $0x70] sm:$0xff] %vm3337_vm2, %v3318_v27 }
 0x804   : > { %v3320_v60 = vpop.permute.xlu0 %3319 }
 0x805   : > { %3353 = vst.msk [vmem:[#allocation4 + $0x78] sm:$0xff] %vm3337_vm2, %v3320_v60 }
 0x808   : > { %v4133_v15 = vpop.permute.xlu1 %4132 }
 0x809   : > { %4181 = vst.msk [vmem:[#allocation4] sm:$0xff] %vm4180_vm3, %v4133_v15 }
 0x80c   : > { %v4135_v17 = vpop.permute.xlu0 %4134 }
 0x80d   : > { %4182 = vst.msk [vmem:[#allocation4 + $0x8] sm:$0xff] %vm4180_vm3, %v4135_v17 }
 0x810   : > { %v4137_v40 = vpop.permute.xlu1 %4136  ;;  %v4197_v47 = vld [vmem:[#allocation4] sm:$0xff] }
 0x811   : > { %4183 = vst.msk [vmem:[#allocation4 + $0x10] sm:$0xff] %vm4180_vm3, %v4137_v40  ;;  %5110 = vmatprep.mubr.f32.mxu1 %v4197_v47 }
 0x814   : > { %v4139_v1 = vpop.permute.xlu0 %4138  ;;  %v4198_v14 = vld [vmem:[#allocation4 + $0x8] sm:$0xff] }
 0x815   : > { %4184 = vst.msk [vmem:[#allocation4 + $0x18] sm:$0xff] %vm4180_vm3, %v4139_v1  ;;  %5111 = vmatmul.mubr.f32.vlgmr.msra.gmra.mxu1 %v4198_v14 }
 0x818   : > { %v4141_v38 = vpop.permute.xlu1 %4140  ;;  %v4199_v62 = vld [vmem:[#allocation4 + $0x10] sm:$0xff] }
 0x819   : > { %4185 = vst.msk [vmem:[#allocation4 + $0x20] sm:$0xff] %vm4180_vm3, %v4141_v38  ;;  %5113 = vmatprep.mubr.f32.mxu1 %v4199_v62 }
 0x81c   : > { %v4143_v2 = vpop.permute.xlu0 %4142  ;;  %v4200_v5 = vld [vmem:[#allocation4 + $0x18] sm:$0xff] }
 0x81d   : > { %4186 = vst.msk [vmem:[#allocation4 + $0x28] sm:$0xff] %vm4180_vm3, %v4143_v2  ;;  %5114 = vmatmul.mubr.f32.gmra.mxu1 %v4200_v5 }
 0x820   : > { %v4145_v30 = vpop.permute.xlu1 %4144  ;;  %v4201_v25 = vld [vmem:[#allocation4 + $0x20] sm:$0xff] }
 0x821   : > { %4187 = vst.msk [vmem:[#allocation4 + $0x30] sm:$0xff] %vm4180_vm3, %v4145_v30  ;;  %5116 = vmatprep.mubr.f32.mxu1 %v4201_v25 }
 0x824   : > { %v4147_v21 = vpop.permute.xlu0 %4146  ;;  %v4202_v10 = vld [vmem:[#allocation4 + $0x28] sm:$0xff] }
 0x825   : > { %4188 = vst.msk [vmem:[#allocation4 + $0x38] sm:$0xff] %vm4180_vm3, %v4147_v21  ;;  %5117 = vmatmul.mubr.f32.gmra.mxu1 %v4202_v10 }
 0x828   : > { %v4203_v0 = vld [vmem:[#allocation4 + $0x30] sm:$0xff] }
 0x829   : > { %5119 = vmatprep.mubr.f32.mxu1 %v4203_v0 }
 0x82c   : > { %v4204_v4 = vld [vmem:[#allocation4 + $0x38] sm:$0xff] }
 0x82d   : > { %5120 = vmatmul.mubr.f32.gmra.mxu1 %v4204_v4 }
 0x834   : > { %v4149_v52 = vpop.permute.xlu1 %4148 }
 0x835   : > { %4189 = vst.msk [vmem:[#allocation4 + $0x40] sm:$0xff] %vm4180_vm3, %v4149_v52 }
 0x838   : > { %v4151_v44 = vpop.permute.xlu0 %4150 }
 0x839   : > { %4190 = vst.msk [vmem:[#allocation4 + $0x48] sm:$0xff] %vm4180_vm3, %v4151_v44 }
 0x83c   : > { %v4153_v58 = vpop.permute.xlu1 %4152  ;;  %v4205_v11 = vld [vmem:[#allocation4 + $0x40] sm:$0xff] }
 0x83d   : > { %4191 = vst.msk [vmem:[#allocation4 + $0x50] sm:$0xff] %vm4180_vm3, %v4153_v58  ;;  %5122 = vmatprep.mubr.f32.mxu1 %v4205_v11 }
 0x840   : > { %v4155_v41 = vpop.permute.xlu0 %4154  ;;  %v4206_v50 = vld [vmem:[#allocation4 + $0x48] sm:$0xff] }
 0x841   : > { %4192 = vst.msk [vmem:[#allocation4 + $0x58] sm:$0xff] %vm4180_vm3, %v4155_v41  ;;  %5123 = vmatmul.mubr.f32.gmra.mxu1 %v4206_v50 }
 0x844   : > { %v4157_v45 = vpop.permute.xlu1 %4156  ;;  %v4207_v26 = vld [vmem:[#allocation4 + $0x50] sm:$0xff] }
 0x845   : > { %4193 = vst.msk [vmem:[#allocation4 + $0x60] sm:$0xff] %vm4180_vm3, %v4157_v45  ;;  %5125 = vmatprep.mubr.f32.mxu1 %v4207_v26 }
 0x848   : > { %v4159_v13 = vpop.permute.xlu0 %4158  ;;  %v4208_v24 = vld [vmem:[#allocation4 + $0x58] sm:$0xff] }
 0x849   : > { %4194 = vst.msk [vmem:[#allocation4 + $0x68] sm:$0xff] %vm4180_vm3, %v4159_v13  ;;  %5126 = vmatmul.mubr.f32.gmra.mxu1 %v4208_v24 }
 0x84c   : > { %v4161_v12 = vpop.permute.xlu1 %4160  ;;  %v4209_v23 = vld [vmem:[#allocation4 + $0x60] sm:$0xff] }
 0x84d   : > { %4195 = vst.msk [vmem:[#allocation4 + $0x70] sm:$0xff] %vm4180_vm3, %v4161_v12  ;;  %5128 = vmatprep.mubr.f32.mxu1 %v4209_v23 }
 0x850   : > { %v4163_v34 = vpop.permute.xlu0 %4162  ;;  %v4210_v20 = vld [vmem:[#allocation4 + $0x68] sm:$0xff] }
 0x851   : > { %4196 = vst.msk [vmem:[#allocation4 + $0x78] sm:$0xff] %vm4180_vm3, %v4163_v34  ;;  %5129 = vmatmul.mubr.f32.gmra.mxu1 %v4210_v20 }
 0x854   : > { %v4211_v28 = vld [vmem:[#allocation4 + $0x70] sm:$0xff] }
 0x855   : > { %5131 = vmatprep.mubr.f32.mxu1 %v4211_v28 }
 0x858   : > { %v4212_v53 = vld [vmem:[#allocation4 + $0x78] sm:$0xff] }
 0x859   : > { %5132 = vmatmul.mubr.f32.gmra.mxu1 %v4212_v53 }
 0x8d5   : > { %v5112_v18 = vpop.f32.mrf.mxu1 }
 0x8d6   : > { %v4308_v49 = vadd.f32 %v5112_v18, %v4629_v8 }
 0x8d7   : > { %v4302_v55 = vpop.f32.mrf.mxu1 }
 0x8d8   : > { %4382 = vst [vmem:[%s6229_s9 + $0x8] sm:$0xff] %v4308_v49  ;;  %v4303_v63 = vadd.f32 %v4629_v8, %v4302_v55 }
 0x8da   : > { %4381 = vst [vmem:[%s6229_s9] sm:$0xff] %v4303_v63 }
 0x8dd   : > { %v5115_v7 = vpop.f32.mrf.mxu1 }
 0x8de   : > { %v4318_v37 = vadd.f32 %v5115_v7, %v4629_v8 }
 0x8df   : > { %v4312_v3 = vpop.f32.mrf.mxu1 }
 0x8e0   : > { %4384 = vst [vmem:[%s6229_s9 + $0x18] sm:$0xff] %v4318_v37  ;;  %v4313_v6 = vadd.f32 %v4629_v8, %v4312_v3 }
 0x8e2   : > { %4383 = vst [vmem:[%s6229_s9 + $0x10] sm:$0xff] %v4313_v6 }
 0x8e5   : > { %v5118_v32 = vpop.f32.mrf.mxu1 }
 0x8e6   : > { %v4328_v54 = vadd.f32 %v5118_v32, %v4629_v8 }
 0x8e7   : > { %v4322_v39 = vpop.f32.mrf.mxu1 }
 0x8e8   : > { %4386 = vst [vmem:[%s6229_s9 + $0x28] sm:$0xff] %v4328_v54  ;;  %v4323_v31 = vadd.f32 %v4629_v8, %v4322_v39 }
 0x8ea   : > { %4385 = vst [vmem:[%s6229_s9 + $0x20] sm:$0xff] %v4323_v31 }
 0x8ed   : > { %v5121_v46 = vpop.f32.mrf.mxu1 }
 0x8ee   : > { %v4338_v43 = vadd.f32 %v5121_v46, %v4629_v8 }
 0x8ef   : > { %v4332_v42 = vpop.f32.mrf.mxu1 }
 0x8f0   : > { %4388 = vst [vmem:[%s6229_s9 + $0x38] sm:$0xff] %v4338_v43  ;;  %v4333_v51 = vadd.f32 %v4629_v8, %v4332_v42 }
 0x8f2   : > { %4387 = vst [vmem:[%s6229_s9 + $0x30] sm:$0xff] %v4333_v51 }
 0x901   : > { %v5124_v61 = vpop.f32.mrf.mxu1 }
 0x902   : > { %v4348_v57 = vadd.f32 %v5124_v61, %v4629_v8 }
 0x903   : > { %v4342_v29 = vpop.f32.mrf.mxu1 }
 0x904   : > { %4390 = vst [vmem:[%s6229_s9 + $0x48] sm:$0xff] %v4348_v57  ;;  %v4343_v22 = vadd.f32 %v4629_v8, %v4342_v29 }
 0x906   : > { %4389 = vst [vmem:[%s6229_s9 + $0x40] sm:$0xff] %v4343_v22 }
 0x909   : > { %v5127_v33 = vpop.f32.mrf.mxu1 }
 0x90a   : > { %v4358_v48 = vadd.f32 %v5127_v33, %v4629_v8 }
 0x90b   : > { %v4352_v9 = vpop.f32.mrf.mxu1 }
 0x90c   : > { %4392 = vst [vmem:[%s6229_s9 + $0x58] sm:$0xff] %v4358_v48  ;;  %v4353_v16 = vadd.f32 %v4629_v8, %v4352_v9 }
 0x90e   : > { %4391 = vst [vmem:[%s6229_s9 + $0x50] sm:$0xff] %v4353_v16 }
 0x911   : > { %v5130_v56 = vpop.f32.mrf.mxu1 }
 0x912   : > { %v4368_v35 = vadd.f32 %v5130_v56, %v4629_v8 }
 0x913   : > { %v4362_v59 = vpop.f32.mrf.mxu1 }
 0x914   : > { %4394 = vst [vmem:[%s6229_s9 + $0x68] sm:$0xff] %v4368_v35  ;;  %v4363_v19 = vadd.f32 %v4629_v8, %v4362_v59 }
 0x916   : > { %4393 = vst [vmem:[%s6229_s9 + $0x60] sm:$0xff] %v4363_v19 }
 0x919   : > { %v5133_v36 = vpop.f32.mrf.mxu1 }
 0x91a   : > { %v4378_v27 = vadd.f32 %v5133_v36, %v4629_v8 }
 0x91b   : > { %v4372_v60 = vpop.f32.mrf.mxu1 }
 0x91c   : > { %4396 = vst [vmem:[%s6229_s9 + $0x78] sm:$0xff] %v4378_v27  ;;  %v4373_v15 = vadd.f32 %v4629_v8, %v4372_v60 }
 0x91e   : > { %4395 = vst [vmem:[%s6229_s9 + $0x70] sm:$0xff] %v4373_v15 }
 0x91f   : > { %5850 = shalt.err (!%p5847_p1)
}
 0x920   : > { %s5851_s14 = scalar_lea.hbm %s8836_s18, 2048  ;;  %s5855_s4 = scalar_lea.hbm %s9457_s11, 8192 }
 0x921   : > { %p5852_p7 = scmp.ne.s32.totalorder %s8836_s18, %s5851_s14  ;;  %p5856_p4 = scmp.lt.s32.totalorder %s8836_s18, %s9457_s11 }
 0x922   : > { %p5857_p9 = scmp.lt.s32.totalorder %s5855_s4, %s5851_s14 }
 0x923   : > { %p5853_p11 = pnand %p5852_p7, %p9458_p13 }
 0x924   : > { %p5858_p3 = por %p5857_p9, %p5856_p4 }
 0x925   : > { %p5854_p2 = pneg %p5853_p11 }
 0x927   : > { %p5859_p0 = pnand %p5858_p3, %p5854_p2 }
 0x929   : > { %5862 = shalt.err (!%p5859_p0)
}
 0x92a   : > { %s5985_s29 = smov 128   ;;  %s5986_s19 = smov 8  }
 0x92b   : > { %5210 = dma.vmem_to_hbm [thread:$0]  (%p9458_p13), %s8838_s13, 2048, %s8836_s18, %s8844_s27, %s5985_s29, %s5985_s29, %s5986_s19  }
 0x92c PF: > { %s9459_s2 = sld [smem:[#allocation19_spill]]  ;;  %p5235_p8 = scmp.ge.s32.totalorder %s5969_s7, 2 }
 0x92d   : > { %s9460_s16 = sld [smem:[#allocation24_spill]] }
 0x932   : > { %s4428_s5 = sand.u32 1, %s9459_s2  }
 0x933   : > { %p9461_p10 = scmp.ne.s32.totalorder %s9460_s16, 0  ;;  %s4429_s0 = scalar_lea.sflag [#allocation7], %s4428_s5 }
 0x935   : > { %p5227_p12 = pnand %p5235_p8, %p9461_p10 }
 0x937   : > { %p5228_p6 = pneg %p5227_p12 }
 0x939   : > { %5924 = dma.done.wait (%p5228_p6), %s4429_s0, 2048  }
 0x93a   : > { %5926 = vsyncadd (%p5228_p6), %s4429_s0, 4294965248  ;;  %s26_s7 = sadd.s32 1, %s5969_s7   ;;  %s9462_s26 = sld [smem:[#allocation20_spill]] }
 0x93b   : > { %p23_p5 = scmp.ge.s32.totalorder %s26_s7, 6   ;;  %s9463_s13 = sld [smem:[#allocation27_spill]] }
 0x93c   : > { %s9464_s27 = sld [smem:[#allocation22_spill]]  ;;  %s9467_s21 = smov %s5933_s22 }
 0x93d   : > { %s9465_s29 = sld [smem:[#allocation25_spill]]  ;;  %s9468_s22 = smov %s5937_s23 }
 0x93e   : > { %s9466_s15 = sld [smem:[#allocation26_spill]]  ;;  %s9469_s23 = smov %s6170_s6 }
 0x93f   : > { %s9470_s24 = smov %s5945_s25  ;;  %s9473_s28 = smov %s5965_s30 }
 0x940   : > { %s9471_s25 = smov %s9462_s26  ;;  %25 = sbr.rel (!%p23_p5) target bundleno = 18 (0x12), region = 115 }
 0x941   : > { %s9472_s26 = smov %s9463_s13 }
 0x944   : > { %s9474_s30 = smov %s9466_s15 }
 0x945   :  { %4434 = vsyncpa [#allocation6], 1 }
 0x946   :  { %4436 = vsyncpa [#allocation6 + $0x1], 1 }
 0x947   :  { %4437 = vsyncpa [#allocation9], 1 }
 0x948   :  { %4439 = vsyncpa [#allocation9 + $0x1], 1 }
 0x949   :  { %4440 = vsyncpa [#allocation12], 1 }
 0x94a   :  { %4441 = vsyncpa [#allocation7], 1 }
 0x94b   :  { %4443 = vsyncpa [#allocation7 + $0x1], 1 }

</bundles_post_ra>
